<compile_context>
chip_gen: v7x
topology: tpu7x:2x2x1
jax: 0.10.0
libtpu: 0.0.40
codegen_flags: <defaults>
</compile_context>

<pallas_src>
import functools

import jax
import jax.numpy as jnp
from jax import lax
from jax.experimental import pallas as pl
from jax.experimental.pallas import tpu as pltpu


LANE = 128        # lane-dense feature padding
EDGE_TILE = 512   # max edge rows per grid step
NODE_TILE = 512   # max node rows per grid step
NSPLIT = 2        # edge-grid "parallel" split (2 TensorCores on v7x)


def _pick_vmem_limit():
    """~75% of physical VMEM (96 MiB on v5e/v6e, 48 MiB on v7x); conservative fallback."""
    cap = 64 * 1024 * 1024
    try:
        cap = int(pltpu.get_tpu_info().vmem_capacity_bytes)
    except Exception:
        pass
    return max(32 * 1024 * 1024, min((cap * 3) // 4, 112 * 1024 * 1024))


VMEM_LIMIT = _pick_vmem_limit()


def _softplus_b05(x):
    """PyTorch nn.Softplus(beta=0.5, threshold=14): 2*log1p(exp(0.5*x)), linear past threshold."""
    bx = 0.5 * x
    sp = 2.0 * jnp.log1p(jnp.exp(jnp.minimum(bx, 14.0)))   # clamp so exp never overflows
    return jnp.where(bx > 14.0, x, sp)


def _round_up(x, m):
    return (x + m - 1) // m * m


def _cdiv(a, b):
    return -(-a // b)


def _pad2(x, rows, cols):
    r, c = x.shape
    return jnp.pad(x, ((0, rows - r), (0, cols - c)))


# --------------------------------------------------------------------- kernel 0: node @ W1
def _node_linear_kernel(x_ref, w_ref, o_ref):
    o_ref[...] = jnp.dot(x_ref[...].astype(jnp.bfloat16), w_ref[...],
                         preferred_element_type=jnp.float32).astype(o_ref.dtype)


# --------------------------------------------------------------------- kernel A: edge tiles
def _edge_kernel(src_ref, dst_ref, rbf_ref, new_node_ref,
                 wc1_ref, bc1_ref, wc2_ref, bc2_ref, agg_ref):
    t = pl.program_id(1)

    @pl.when(t == 0)
    def _init():
        agg_ref[...] = jnp.zeros_like(agg_ref)

    # CFConv edge MLP: Linear -> softplus(beta=0.5, th=14) -> Linear (bf16 MXU, f32 accum).
    h = jnp.dot(rbf_ref[...], wc1_ref[...], preferred_element_type=jnp.float32) + bc1_ref[...]
    h = _softplus_b05(h)
    h = jnp.dot(h.astype(jnp.bfloat16), wc2_ref[...],
                preferred_element_type=jnp.float32) + bc2_ref[...]

    edge_tile = rbf_ref.shape[0]
    n_pad = new_node_ref.shape[0]

    # Gather new_node[src] as a one-hot MXU matmul (padded edges carry src == -1 -> zero row).
    src_col = src_ref[0]                                           # [edge_tile, 1] int32
    gather_oh = jnp.where(
        src_col == lax.broadcasted_iota(jnp.int32, (edge_tile, n_pad), 1),
        1.0, 0.0).astype(jnp.bfloat16)
    gathered = jnp.dot(gather_oh, new_node_ref[...], preferred_element_type=jnp.float32)

    msg = (gathered * h).astype(jnp.bfloat16)                      # [edge_tile, dp]

    # Scatter-add sum_{e: dst(e)=v} msg_e as a one-hot MXU matmul (dst == -1 -> zero column).
    dst_row = dst_ref[0]                                           # [1, edge_tile] int32
    scatter_oh = jnp.where(
        dst_row == lax.broadcasted_iota(jnp.int32, (n_pad, edge_tile), 0),
        1.0, 0.0).astype(jnp.bfloat16)
    agg_ref[0] = agg_ref[0] + jnp.dot(scatter_oh, msg, preferred_element_type=jnp.float32)


# --------------------------------------------------------------------- kernel B: node MLP
def _node_kernel(node_ref, agg_ref, w2_ref, b2_ref, w3_ref, b3_ref, out_ref):
    # Sum the per-core partial aggregates, then node_layer2 -> softplus -> node_layer3 + residual.
    agg = jnp.sum(agg_ref[...], axis=0).astype(jnp.bfloat16)
    cf1 = jnp.dot(agg, w2_ref[...], preferred_element_type=jnp.float32) + b2_ref[...]
    sp = _softplus_b05(cf1).astype(jnp.bfloat16)
    upd = jnp.dot(sp, w3_ref[...], preferred_element_type=jnp.float32) + b3_ref[...]
    out_ref[...] = (node_ref[...] + upd).astype(out_ref.dtype)


# --------------------------------------------------------------------- wrapper
@jax.jit
def interaction_forward(node, rbf, src_idx, dst_idx, params):
    """node: [N, dim] f32; rbf: [E, rbf_dim] f32; src_idx/dst_idx: [E] int32 edge endpoints."""
    n_nodes, dim = node.shape
    n_edges, rbf_dim = rbf.shape
    w1, wc1, bc1, wc2, bc2, w2, b2, w3, b3 = params

    f32, bf16 = jnp.float32, jnp.bfloat16

    # Lane-dense feature padding; node/edge row padding to tile multiples.
    dp = _round_up(dim, LANE)
    rp = _round_up(rbf_dim, LANE)
    node_tile = min(NODE_TILE, _round_up(n_nodes, LANE))
    n_pad = _round_up(n_nodes, node_tile)
    edge_tile = min(EDGE_TILE, _round_up(n_edges, LANE))
    real_tiles = max(1, _cdiv(n_edges, edge_tile))
    n_split = NSPLIT if real_tiles >= NSPLIT else 1
    tiles_per_core = _cdiv(real_tiles, n_split)
    total_tiles = n_split * tiles_per_core
    e_pad = total_tiles * edge_tile

    node_p = _pad2(node.astype(f32), n_pad, dp)
    rbf_p = _pad2(rbf.astype(f32), e_pad, rp).astype(bf16)
    # Padded edges get index -1: their one-hot rows/columns are all zero -> no contribution.
    src_p = jnp.pad(src_idx.astype(jnp.int32), (0, e_pad - n_edges), constant_values=-1)
    dst_p = jnp.pad(dst_idx.astype(jnp.int32), (0, e_pad - n_edges), constant_values=-1)
    src3 = src_p.reshape(total_tiles, edge_tile, 1)       # column layout (gather one-hot)
    dst3 = dst_p.reshape(total_tiles, 1, edge_tile)       # row layout (scatter one-hot)

    # Zero-padded weights; MXU operands in bf16, biases in f32.
    w1_b = _pad2(w1.astype(f32), dp, dp).astype(bf16)
    wc1_b = _pad2(wc1.astype(f32), rp, dp).astype(bf16)
    bc1_p = _pad2(bc1.reshape(1, -1).astype(f32), 1, dp)
    wc2_b = _pad2(wc2.astype(f32), dp, dp).astype(bf16)
    bc2_p = _pad2(bc2.reshape(1, -1).astype(f32), 1, dp)
    w2_b = _pad2(w2.astype(f32), dp, dp).astype(bf16)
    b2_p = _pad2(b2.reshape(1, -1).astype(f32), 1, dp)
    w3_b = _pad2(w3.astype(f32), dp, dp).astype(bf16)
    b3_p = _pad2(b3.reshape(1, -1).astype(f32), 1, dp)

    # ---- kernel 0: new_node = node @ W1 (hoisted out of the edge kernel) --------------------
    new_node = pl.pallas_call(
        _node_linear_kernel,
        out_shape=jax.ShapeDtypeStruct((n_pad, dp), bf16),
        grid=(n_pad // node_tile,),
        in_specs=[
            pl.BlockSpec((node_tile, dp), lambda i: (i, 0)),
            pl.BlockSpec((dp, dp), lambda i: (0, 0)),
        ],
        out_specs=pl.BlockSpec((node_tile, dp), lambda i: (i, 0)),
        compiler_params=pltpu.CompilerParams(
            dimension_semantics=("parallel",), vmem_limit_bytes=VMEM_LIMIT),
    )(node_p, w1_b)

    # ---- kernel A: edge-tiled CFConv + one-hot MXU gather/scatter -> agg partials -----------
    tpc = tiles_per_core
    agg = pl.pallas_call(
        _edge_kernel,
        out_shape=jax.ShapeDtypeStruct((n_split, n_pad, dp), f32),
        grid=(n_split, tiles_per_core),
        in_specs=[
            pl.BlockSpec((1, edge_tile, 1), lambda c, t: (c * tpc + t, 0, 0)),   # src (per tile)
            pl.BlockSpec((1, 1, edge_tile), lambda c, t: (c * tpc + t, 0, 0)),   # dst (per tile)
            pl.BlockSpec((edge_tile, rp), lambda c, t: (c * tpc + t, 0)),        # rbf (streamed)
            pl.BlockSpec((n_pad, dp), lambda c, t: (0, 0)),                      # new_node (resident)
            pl.BlockSpec((rp, dp), lambda c, t: (0, 0)),                         # wc1
            pl.BlockSpec((1, dp), lambda c, t: (0, 0)),                          # bc1
            pl.BlockSpec((dp, dp), lambda c, t: (0, 0)),                         # wc2
            pl.BlockSpec((1, dp), lambda c, t: (0, 0)),                          # bc2
        ],
        out_specs=pl.BlockSpec((1, n_pad, dp), lambda c, t: (c, 0, 0)),          # per-core partial
        compiler_params=pltpu.CompilerParams(
            dimension_semantics=("parallel", "arbitrary"),
            vmem_limit_bytes=VMEM_LIMIT),
    )(src3, dst3, rbf_p, new_node, wc1_b, bc1_p, wc2_b, bc2_p)

    # ---- kernel B: node-tiled final MLP + residual (also sums the split partials) -----------
    # Kept as a separate "parallel" kernel (rather than fused into kernel A's last grid step)
    # so the node MLP still shards across both TensorCores on v7x.
    out_p = pl.pallas_call(
        _node_kernel,
        out_shape=jax.ShapeDtypeStruct((n_pad, dp), f32),
        grid=(n_pad // node_tile,),
        in_specs=[
            pl.BlockSpec((node_tile, dp), lambda i: (i, 0)),             # node (f32 residual)
            pl.BlockSpec((n_split, node_tile, dp), lambda i: (0, i, 0)), # agg partials
            pl.BlockSpec((dp, dp), lambda i: (0, 0)),                    # w2
            pl.BlockSpec((1, dp), lambda i: (0, 0)),                     # b2
            pl.BlockSpec((dp, dp), lambda i: (0, 0)),                    # w3
            pl.BlockSpec((1, dp), lambda i: (0, 0)),                     # b3
        ],
        out_specs=pl.BlockSpec((node_tile, dp), lambda i: (i, 0)),
        compiler_params=pltpu.CompilerParams(
            dimension_semantics=("parallel",), vmem_limit_bytes=VMEM_LIMIT),
    )(node_p, agg, w2_b, b2_p, w3_b, b3_p)

    return out_p[:n_nodes, :dim]


# --------------------------------------------------------------------- reference & test
def _reference_forward(node, rbf, src_idx, dst_idx, params):
    """Pure-JAX f32 reference of the Interaction forward (for validation)."""
    w1, wc1, bc1, wc2, bc2, w2, b2, w3, b3 = params
    dot = functools.partial(jnp.dot, precision=lax.Precision.HIGHEST)
    new_node = dot(node, w1)
    h = dot(_softplus_b05(dot(rbf, wc1) + bc1), wc2) + bc2
    msg = new_node[src_idx] * h
    agg = jnp.zeros_like(node).at[dst_idx].add(msg)
    upd = dot(_softplus_b05(dot(agg, w2) + b2), w3) + b3
    return node + upd


def _init_params(key, rbf_dim, dim):
    """Deterministic synthetic parameters. Weights stored as [in, out] (x @ W + b)."""
    ks = jax.random.split(key, 9)
    s = 0.2
    w1 = s * jax.random.normal(ks[0], (dim, dim), jnp.float32)       # node_layer1 (no bias)
    wc1 = s * jax.random.normal(ks[1], (rbf_dim, dim), jnp.float32)  # cfconv.linear_layer1
    bc1 = s * jax.random.normal(ks[2], (dim,), jnp.float32)
    wc2 = s * jax.random.normal(ks[3], (dim, dim), jnp.float32)      # cfconv.linear_layer2
    bc2 = s * jax.random.normal(ks[4], (dim,), jnp.float32)
    w2 = s * jax.random.normal(ks[5], (dim, dim), jnp.float32)       # node_layer2
    b2 = s * jax.random.normal(ks[6], (dim,), jnp.float32)
    w3 = s * jax.random.normal(ks[7], (dim, dim), jnp.float32)       # node_layer3
    b3 = s * jax.random.normal(ks[8], (dim,), jnp.float32)
    return (w1, wc1, bc1, wc2, bc2, w2, b2, w3, b3)


if __name__ == "__main__":
    rbf_dim, dim = 32, 64
    n_nodes, n_edges = 32, 600   # >1 edge tile -> exercises the 2-way split + accumulation

    key = jax.random.PRNGKey(0)
    k_node, k_rbf, k_src, k_dst, k_par = jax.random.split(key, 5)

    node = jax.random.normal(k_node, (n_nodes, dim), jnp.float32)
    rbf = jax.random.normal(k_rbf, (n_edges, rbf_dim), jnp.float32)
    src_idx = jax.random.randint(k_src, (n_edges,), 0, n_nodes, dtype=jnp.int32)
    dst_idx = jax.random.randint(k_dst, (n_edges,), 0, n_nodes, dtype=jnp.int32)
    params = _init_params(k_par, rbf_dim, dim)

    out = interaction_forward(node, rbf, src_idx, dst_idx, params)
    out = jax.block_until_ready(out)

    ref = _reference_forward(node, rbf, src_idx, dst_idx, params)
    assert out.shape == (n_nodes, dim) and out.dtype == jnp.float32

    # bf16 MXU operands (f32 accumulation) -> validate with a scale-relative bound vs the
    # f32 reference; structural bugs would give errors on the order of the full output range.
    err = float(jnp.max(jnp.abs(out - ref)))
    scale = float(jnp.max(jnp.abs(ref)))
    assert err <= 5e-2 * scale + 1e-2, f"mismatch vs reference: max_err={err}, scale={scale}"

    print("KERNEL_OK")
</pallas_src>

<mosaic_0001>
module attributes {stable_mosaic.version = 11 : i64} {
  func.func @_node_linear_kernel(%arg0: i32, %arg1: memref<128x128xf32, #tpu.memory_space<vmem>>, %arg2: memref<128x128xbf16, #tpu.memory_space<vmem>>, %arg3: memref<128x128xbf16, #tpu.memory_space<vmem>>) attributes {dimension_semantics = [#tpu.dimension_semantics<parallel>], iteration_bounds = array<i64: 1>, scalar_prefetch = 0 : i64, scratch_operands = 0 : i64, tpu.core_type = #tpu.core_type<tc>, window_params = [{transform_indices = @transform_0, window_bounds = array<i64: 128, 128>}, {pipeline_mode = #tpu.pipeline_mode<synchronous>, transform_indices = @transform_1, window_bounds = array<i64: 128, 128>}, {transform_indices = @transform_2, window_bounds = array<i64: 128, 128>}]} {
    %c0 = arith.constant 0 : index
    %c0_0 = arith.constant 0 : index
    %0 = vector.load %arg1[%c0, %c0_0] : memref<128x128xf32, #tpu.memory_space<vmem>>, vector<128x128xf32>
    %1 = arith.truncf %0 : vector<128x128xf32> to vector<128x128xbf16>
    %c0_1 = arith.constant 0 : index
    %c0_2 = arith.constant 0 : index
    %2 = vector.load %arg2[%c0_1, %c0_2] : memref<128x128xbf16, #tpu.memory_space<vmem>>, vector<128x128xbf16>
    %cst = arith.constant dense<0.000000e+00> : vector<128x128xf32>
    %3 = tpu.matmul %1, %2, %cst {dimension_numbers = #tpu.dot_dimension_numbers<[1], [0], [0], [1], [0, 0, 1, 1], [], []>} : vector<128x128xbf16>, vector<128x128xbf16>, vector<128x128xf32> -> vector<128x128xf32>
    %4 = arith.truncf %3 : vector<128x128xf32> to vector<128x128xbf16>
    %c0_3 = arith.constant 0 : index
    %c0_4 = arith.constant 0 : index
    %5 = vector.load %arg3[%c0_3, %c0_4] : memref<128x128xbf16, #tpu.memory_space<vmem>>, vector<128x128xbf16>
    tpu.vector_store %arg3[%c0_3, %c0_4], %4 {strides = array<i32>} : memref<128x128xbf16, #tpu.memory_space<vmem>>, vector<128x128xbf16>,
    return
  }
  func.func @transform_0(%arg0: i32) -> (i32, i32) {
    %c0_i32 = arith.constant 0 : i32
    %c0_i32_0 = arith.constant 0 : i32
    return %arg0, %c0_i32 : i32, i32
  }
  func.func @transform_1(%arg0: i32) -> (i32, i32) {
    %c0_i32 = arith.constant 0 : i32
    %c0_i32_0 = arith.constant 0 : i32
    %c0_i32_1 = arith.constant 0 : i32
    return %c0_i32, %c0_i32_0 : i32, i32
  }
  func.func @transform_2(%arg0: i32) -> (i32, i32) {
    %c0_i32 = arith.constant 0 : i32
    %c0_i32_0 = arith.constant 0 : i32
    return %arg0, %c0_i32 : i32, i32
  }
}

module attributes {stable_mosaic.version = 11 : i64} {
  func.func @_node_kernel(%arg0: i32, %arg1: memref<128x128xf32, #tpu.memory_space<vmem>>, %arg2: memref<2x128x128xf32, #tpu.memory_space<vmem>>, %arg3: memref<128x128xbf16, #tpu.memory_space<vmem>>, %arg4: memref<1x128xf32, #tpu.memory_space<vmem>>, %arg5: memref<128x128xbf16, #tpu.memory_space<vmem>>, %arg6: memref<1x128xf32, #tpu.memory_space<vmem>>, %arg7: memref<128x128xf32, #tpu.memory_space<vmem>>) attributes {dimension_semantics = [#tpu.dimension_semantics<parallel>], iteration_bounds = array<i64: 1>, scalar_prefetch = 0 : i64, scratch_operands = 0 : i64, tpu.core_type = #tpu.core_type<tc>, window_params = [{transform_indices = @transform_0, window_bounds = array<i64: 128, 128>}, {transform_indices = @transform_1, window_bounds = array<i64: 2, 128, 128>}, {pipeline_mode = #tpu.pipeline_mode<synchronous>, transform_indices = @transform_2, window_bounds = array<i64: 128, 128>}, {pipeline_mode = #tpu.pipeline_mode<synchronous>, transform_indices = @transform_3, window_bounds = array<i64: 1, 128>}, {pipeline_mode = #tpu.pipeline_mode<synchronous>, transform_indices = @transform_4, window_bounds = array<i64: 128, 128>}, {pipeline_mode = #tpu.pipeline_mode<synchronous>, transform_indices = @transform_5, window_bounds = array<i64: 1, 128>}, {transform_indices = @transform_6, window_bounds = array<i64: 128, 128>}]} {
    %c0 = arith.constant 0 : index
    %c0_0 = arith.constant 0 : index
    %c0_1 = arith.constant 0 : index
    %0 = vector.load %arg2[%c0, %c0_0, %c0_1] : memref<2x128x128xf32, #tpu.memory_space<vmem>>, vector<2x128x128xf32>
    %cst = arith.constant dense<0.000000e+00> : vector<128x128xf32>
    %1 = vector.multi_reduction <add>, %0, %cst [0] : vector<2x128x128xf32> to vector<128x128xf32>
    %2 = arith.truncf %1 : vector<128x128xf32> to vector<128x128xbf16>
    %c0_2 = arith.constant 0 : index
    %c0_3 = arith.constant 0 : index
    %3 = vector.load %arg3[%c0_2, %c0_3] : memref<128x128xbf16, #tpu.memory_space<vmem>>, vector<128x128xbf16>
    %cst_4 = arith.constant dense<0.000000e+00> : vector<128x128xf32>
    %4 = tpu.matmul %2, %3, %cst_4 {dimension_numbers = #tpu.dot_dimension_numbers<[1], [0], [0], [1], [0, 0, 1, 1], [], []>} : vector<128x128xbf16>, vector<128x128xbf16>, vector<128x128xf32> -> vector<128x128xf32>
    %c0_5 = arith.constant 0 : index
    %c0_6 = arith.constant 0 : index
    %5 = vector.load %arg4[%c0_5, %c0_6] : memref<1x128xf32, #tpu.memory_space<vmem>>, vector<1x128xf32>
    %6 = vector.broadcast %5 : vector<1x128xf32> to vector<128x128xf32>
    %7 = arith.addf %4, %6 : vector<128x128xf32>
    %cst_7 = arith.constant 5.000000e-01 : f32
    %8 = vector.broadcast %cst_7 : f32 to vector<128x128xf32>
    %9 = arith.mulf %8, %7 : vector<128x128xf32>
    %cst_8 = arith.constant 1.400000e+01 : f32
    %10 = vector.broadcast %cst_8 : f32 to vector<128x128xf32>
    %11 = arith.minimumf %9, %10 : vector<128x128xf32>
    %12 = math.exp %11 : vector<128x128xf32>
    %13 = math.log1p %12 : vector<128x128xf32>
    %cst_9 = arith.constant 2.000000e+00 : f32
    %14 = vector.broadcast %cst_9 : f32 to vector<128x128xf32>
    %15 = arith.mulf %14, %13 : vector<128x128xf32>
    %cst_10 = arith.constant 1.400000e+01 : f32
    %16 = vector.broadcast %cst_10 : f32 to vector<128x128xf32>
    %17 = arith.cmpf ogt, %9, %16 : vector<128x128xf32>
    %18 = arith.select %17, %7, %15 : vector<128x128xi1>, vector<128x128xf32>
    %19 = arith.truncf %18 : vector<128x128xf32> to vector<128x128xbf16>
    %c0_11 = arith.constant 0 : index
    %c0_12 = arith.constant 0 : index
    %20 = vector.load %arg5[%c0_11, %c0_12] : memref<128x128xbf16, #tpu.memory_space<vmem>>, vector<128x128xbf16>
    %cst_13 = arith.constant dense<0.000000e+00> : vector<128x128xf32>
    %21 = tpu.matmul %19, %20, %cst_13 {dimension_numbers = #tpu.dot_dimension_numbers<[1], [0], [0], [1], [0, 0, 1, 1], [], []>} : vector<128x128xbf16>, vector<128x128xbf16>, vector<128x128xf32> -> vector<128x128xf32>
    %c0_14 = arith.constant 0 : index
    %c0_15 = arith.constant 0 : index
    %22 = vector.load %arg6[%c0_14, %c0_15] : memref<1x128xf32, #tpu.memory_space<vmem>>, vector<1x128xf32>
    %23 = vector.broadcast %22 : vector<1x128xf32> to vector<128x128xf32>
    %24 = arith.addf %21, %23 : vector<128x128xf32>
    %c0_16 = arith.constant 0 : index
    %c0_17 = arith.constant 0 : index
    %25 = vector.load %arg1[%c0_16, %c0_17] : memref<128x128xf32, #tpu.memory_space<vmem>>, vector<128x128xf32>
    %26 = arith.addf %25, %24 : vector<128x128xf32>
    %c0_18 = arith.constant 0 : index
    %c0_19 = arith.constant 0 : index
    %27 = vector.load %arg7[%c0_18, %c0_19] : memref<128x128xf32, #tpu.memory_space<vmem>>, vector<128x128xf32>
    tpu.vector_store %arg7[%c0_18, %c0_19], %26 {strides = array<i32>} : memref<128x128xf32, #tpu.memory_space<vmem>>, vector<128x128xf32>,
    return
  }
  func.func @transform_0(%arg0: i32) -> (i32, i32) {
    %c0_i32 = arith.constant 0 : i32
    %c0_i32_0 = arith.constant 0 : i32
    return %arg0, %c0_i32 : i32, i32
  }
  func.func @transform_1(%arg0: i32) -> (i32, i32, i32) {
    %c0_i32 = arith.constant 0 : i32
    %c0_i32_0 = arith.constant 0 : i32
    %c0_i32_1 = arith.constant 0 : i32
    return %c0_i32, %arg0, %c0_i32_0 : i32, i32, i32
  }
  func.func @transform_2(%arg0: i32) -> (i32, i32) {
    %c0_i32 = arith.constant 0 : i32
    %c0_i32_0 = arith.constant 0 : i32
    %c0_i32_1 = arith.constant 0 : i32
    return %c0_i32, %c0_i32_0 : i32, i32
  }
  func.func @transform_3(%arg0: i32) -> (i32, i32) {
    %c0_i32 = arith.constant 0 : i32
    %c0_i32_0 = arith.constant 0 : i32
    %c0_i32_1 = arith.constant 0 : i32
    return %c0_i32, %c0_i32_0 : i32, i32
  }
  func.func @transform_4(%arg0: i32) -> (i32, i32) {
    %c0_i32 = arith.constant 0 : i32
    %c0_i32_0 = arith.constant 0 : i32
    %c0_i32_1 = arith.constant 0 : i32
    return %c0_i32, %c0_i32_0 : i32, i32
  }
  func.func @transform_5(%arg0: i32) -> (i32, i32) {
    %c0_i32 = arith.constant 0 : i32
    %c0_i32_0 = arith.constant 0 : i32
    %c0_i32_1 = arith.constant 0 : i32
    return %c0_i32, %c0_i32_0 : i32, i32
  }
  func.func @transform_6(%arg0: i32) -> (i32, i32) {
    %c0_i32 = arith.constant 0 : i32
    %c0_i32_0 = arith.constant 0 : i32
    return %arg0, %c0_i32 : i32, i32
  }
}

module attributes {stable_mosaic.version = 11 : i64} {
  func.func @_edge_kernel(%arg0: i32, %arg1: i32, %arg2: memref<1x512x1xi32, #tpu.memory_space<vmem>>, %arg3: memref<1x1x512xi32, #tpu.memory_space<vmem>>, %arg4: memref<512x128xbf16, #tpu.memory_space<vmem>>, %arg5: memref<128x128xbf16, #tpu.memory_space<vmem>>, %arg6: memref<128x128xbf16, #tpu.memory_space<vmem>>, %arg7: memref<1x128xf32, #tpu.memory_space<vmem>>, %arg8: memref<128x128xbf16, #tpu.memory_space<vmem>>, %arg9: memref<1x128xf32, #tpu.memory_space<vmem>>, %arg10: memref<1x128x128xf32, #tpu.memory_space<vmem>>) attributes {dimension_semantics = [#tpu.dimension_semantics<parallel>, #tpu.dimension_semantics<arbitrary>], iteration_bounds = array<i64: 2, 1>, scalar_prefetch = 0 : i64, scratch_operands = 0 : i64, tpu.core_type = #tpu.core_type<tc>, window_params = [{transform_indices = @transform_0, window_bounds = array<i64: 1, 512, 1>}, {transform_indices = @transform_1, window_bounds = array<i64: 1, 1, 512>}, {transform_indices = @transform_2, window_bounds = array<i64: 512, 128>}, {pipeline_mode = #tpu.pipeline_mode<synchronous>, transform_indices = @transform_3, window_bounds = array<i64: 128, 128>}, {pipeline_mode = #tpu.pipeline_mode<synchronous>, transform_indices = @transform_4, window_bounds = array<i64: 128, 128>}, {pipeline_mode = #tpu.pipeline_mode<synchronous>, transform_indices = @transform_5, window_bounds = array<i64: 1, 128>}, {pipeline_mode = #tpu.pipeline_mode<synchronous>, transform_indices = @transform_6, window_bounds = array<i64: 128, 128>}, {pipeline_mode = #tpu.pipeline_mode<synchronous>, transform_indices = @transform_7, window_bounds = array<i64: 1, 128>}, {transform_indices = @transform_8, window_bounds = array<i64: 1, 128, 128>}]} {
    %c0_i32 = arith.constant 0 : i32
    %0 = arith.cmpi eq, %arg1, %c0_i32 : i32
    %1 = arith.extui %0 : i1 to i32
    %c0_i32_0 = arith.constant 0 : i32
    %2 = arith.cmpi ne, %1, %c0_i32_0 : i32
    scf.if %2 {
      %cst_35 = arith.constant 0.000000e+00 : f32
      %55 = vector.broadcast %cst_35 : f32 to vector<1x128x128xf32>
      %c0_36 = arith.constant 0 : index
      %c0_37 = arith.constant 0 : index
      %c0_38 = arith.constant 0 : index
      %56 = vector.load %arg10[%c0_36, %c0_37, %c0_38] : memref<1x128x128xf32, #tpu.memory_space<vmem>>, vector<1x128x128xf32>
      tpu.vector_store %arg10[%c0_36, %c0_37, %c0_38], %55 {strides = array<i32>} : memref<1x128x128xf32, #tpu.memory_space<vmem>>, vector<1x128x128xf32>,
    } else {
    }
    %c0 = arith.constant 0 : index
    %c0_1 = arith.constant 0 : index
    %3 = vector.load %arg4[%c0, %c0_1] : memref<512x128xbf16, #tpu.memory_space<vmem>>, vector<512x128xbf16>
    %c0_2 = arith.constant 0 : index
    %c0_3 = arith.constant 0 : index
    %4 = vector.load %arg6[%c0_2, %c0_3] : memref<128x128xbf16, #tpu.memory_space<vmem>>, vector<128x128xbf16>
    %cst = arith.constant dense<0.000000e+00> : vector<512x128xf32>
    %5 = tpu.matmul %3, %4, %cst {dimension_numbers = #tpu.dot_dimension_numbers<[1], [0], [0], [1], [0, 0, 1, 1], [], []>} : vector<512x128xbf16>, vector<128x128xbf16>, vector<512x128xf32> -> vector<512x128xf32>
    %c0_4 = arith.constant 0 : index
    %c0_5 = arith.constant 0 : index
    %6 = vector.load %arg7[%c0_4, %c0_5] : memref<1x128xf32, #tpu.memory_space<vmem>>, vector<1x128xf32>
    %7 = vector.broadcast %6 : vector<1x128xf32> to vector<512x128xf32>
    %8 = arith.addf %5, %7 : vector<512x128xf32>
    %cst_6 = arith.constant 5.000000e-01 : f32
    %9 = vector.broadcast %cst_6 : f32 to vector<512x128xf32>
    %10 = arith.mulf %9, %8 : vector<512x128xf32>
    %cst_7 = arith.constant 1.400000e+01 : f32
    %11 = vector.broadcast %cst_7 : f32 to vector<512x128xf32>
    %12 = arith.minimumf %10, %11 : vector<512x128xf32>
    %13 = math.exp %12 : vector<512x128xf32>
    %14 = math.log1p %13 : vector<512x128xf32>
    %cst_8 = arith.constant 2.000000e+00 : f32
    %15 = vector.broadcast %cst_8 : f32 to vector<512x128xf32>
    %16 = arith.mulf %15, %14 : vector<512x128xf32>
    %cst_9 = arith.constant 1.400000e+01 : f32
    %17 = vector.broadcast %cst_9 : f32 to vector<512x128xf32>
    %18 = arith.cmpf ogt, %10, %17 : vector<512x128xf32>
    %19 = arith.select %18, %8, %16 : vector<512x128xi1>, vector<512x128xf32>
    %20 = arith.truncf %19 : vector<512x128xf32> to vector<512x128xbf16>
    %c0_10 = arith.constant 0 : index
    %c0_11 = arith.constant 0 : index
    %21 = vector.load %arg8[%c0_10, %c0_11] : memref<128x128xbf16, #tpu.memory_space<vmem>>, vector<128x128xbf16>
    %cst_12 = arith.constant dense<0.000000e+00> : vector<512x128xf32>
    %22 = tpu.matmul %20, %21, %cst_12 {dimension_numbers = #tpu.dot_dimension_numbers<[1], [0], [0], [1], [0, 0, 1, 1], [], []>} : vector<512x128xbf16>, vector<128x128xbf16>, vector<512x128xf32> -> vector<512x128xf32>
    %c0_13 = arith.constant 0 : index
    %c0_14 = arith.constant 0 : index
    %23 = vector.load %arg9[%c0_13, %c0_14] : memref<1x128xf32, #tpu.memory_space<vmem>>, vector<1x128xf32>
    %24 = vector.broadcast %23 : vector<1x128xf32> to vector<512x128xf32>
    %25 = arith.addf %22, %24 : vector<512x128xf32>
    %c0_15 = arith.constant 0 : index
    %c0_16 = arith.constant 0 : index
    %c0_17 = arith.constant 0 : index
    %26 = vector.load %arg2[%c0_15, %c0_16, %c0_17] : memref<1x512x1xi32, #tpu.memory_space<vmem>>, vector<1x512x1xi32>
    %27 = vector.shape_cast %26 : vector<1x512x1xi32> to vector<512x1xi32>
    %28 = tpu.iota {dimensions = array<i32: 1>} : vector<512x128xi32>
    %29 = vector.broadcast %27 : vector<512x1xi32> to vector<512x128xi32>
    %30 = arith.cmpi eq, %29, %28 : vector<512x128xi32>
    %cst_18 = arith.constant 1.000000e+00 : f32
    %cst_19 = arith.constant 0.000000e+00 : f32
    %31 = vector.broadcast %cst_18 : f32 to vector<512x128xf32>
    %32 = vector.broadcast %cst_19 : f32 to vector<512x128xf32>
    %33 = arith.select %30, %31, %32 : vector<512x128xi1>, vector<512x128xf32>
    %34 = arith.truncf %33 : vector<512x128xf32> to vector<512x128xbf16>
    %c0_20 = arith.constant 0 : index
    %c0_21 = arith.constant 0 : index
    %35 = vector.load %arg5[%c0_20, %c0_21] : memref<128x128xbf16, #tpu.memory_space<vmem>>, vector<128x128xbf16>
    %cst_22 = arith.constant dense<0.000000e+00> : vector<512x128xf32>
    %36 = tpu.matmul %34, %35, %cst_22 {dimension_numbers = #tpu.dot_dimension_numbers<[1], [0], [0], [1], [0, 0, 1, 1], [], []>} : vector<512x128xbf16>, vector<128x128xbf16>, vector<512x128xf32> -> vector<512x128xf32>
    %37 = arith.mulf %36, %25 : vector<512x128xf32>
    %38 = arith.truncf %37 : vector<512x128xf32> to vector<512x128xbf16>
    %c0_23 = arith.constant 0 : index
    %c0_24 = arith.constant 0 : index
    %c0_25 = arith.constant 0 : index
    %39 = vector.load %arg3[%c0_23, %c0_24, %c0_25] : memref<1x1x512xi32, #tpu.memory_space<vmem>>, vector<1x1x512xi32>
    %40 = vector.shape_cast %39 : vector<1x1x512xi32> to vector<1x512xi32>
    %41 = tpu.iota {dimensions = array<i32: 0>} : vector<128x512xi32>
    %42 = vector.broadcast %40 : vector<1x512xi32> to vector<128x512xi32>
    %43 = arith.cmpi eq, %42, %41 : vector<128x512xi32>
    %cst_26 = arith.constant 1.000000e+00 : f32
    %cst_27 = arith.constant 0.000000e+00 : f32
    %44 = vector.broadcast %cst_26 : f32 to vector<128x512xf32>
    %45 = vector.broadcast %cst_27 : f32 to vector<128x512xf32>
    %46 = arith.select %43, %44, %45 : vector<128x512xi1>, vector<128x512xf32>
    %47 = arith.truncf %46 : vector<128x512xf32> to vector<128x512xbf16>
    %c0_28 = arith.constant 0 : index
    %c0_29 = arith.constant 0 : index
    %c0_30 = arith.constant 0 : index
    %48 = vector.load %arg10[%c0_28, %c0_29, %c0_30] : memref<1x128x128xf32, #tpu.memory_space<vmem>>, vector<1x128x128xf32>
    %49 = vector.shape_cast %48 : vector<1x128x128xf32> to vector<128x128xf32>
    %cst_31 = arith.constant dense<0.000000e+00> : vector<128x128xf32>
    %50 = tpu.matmul %47, %38, %cst_31 {dimension_numbers = #tpu.dot_dimension_numbers<[1], [0], [0], [1], [0, 0, 1, 1], [], []>} : vector<128x512xbf16>, vector<512x128xbf16>, vector<128x128xf32> -> vector<128x128xf32>
    %51 = arith.addf %49, %50 : vector<128x128xf32>
    %c0_32 = arith.constant 0 : index
    %c0_33 = arith.constant 0 : index
    %c0_34 = arith.constant 0 : index
    %52 = vector.load %arg10[%c0_32, %c0_33, %c0_34] : memref<1x128x128xf32, #tpu.memory_space<vmem>>, vector<1x128x128xf32>
    %53 = vector.shape_cast %52 : vector<1x128x128xf32> to vector<128x128xf32>
    %54 = vector.shape_cast %51 : vector<128x128xf32> to vector<1x128x128xf32>
    tpu.vector_store %arg10[%c0_32, %c0_33, %c0_34], %54 {strides = array<i32>} : memref<1x128x128xf32, #tpu.memory_space<vmem>>, vector<1x128x128xf32>,
    return
  }
  func.func @transform_0(%arg0: i32, %arg1: i32) -> (i32, i32, i32) {
    %c1_i32 = arith.constant 1 : i32
    %0 = arith.muli %arg0, %c1_i32 : i32
    %1 = arith.addi %0, %arg1 : i32
    %c0_i32 = arith.constant 0 : i32
    %c0_i32_0 = arith.constant 0 : i32
    %c0_i32_1 = arith.constant 0 : i32
    return %1, %c0_i32, %c0_i32_0 : i32, i32, i32
  }
  func.func @transform_1(%arg0: i32, %arg1: i32) -> (i32, i32, i32) {
    %c1_i32 = arith.constant 1 : i32
    %0 = arith.muli %arg0, %c1_i32 : i32
    %1 = arith.addi %0, %arg1 : i32
    %c0_i32 = arith.constant 0 : i32
    %c0_i32_0 = arith.constant 0 : i32
    %c0_i32_1 = arith.constant 0 : i32
    return %1, %c0_i32, %c0_i32_0 : i32, i32, i32
  }
  func.func @transform_2(%arg0: i32, %arg1: i32) -> (i32, i32) {
    %c1_i32 = arith.constant 1 : i32
    %0 = arith.muli %arg0, %c1_i32 : i32
    %1 = arith.addi %0, %arg1 : i32
    %c0_i32 = arith.constant 0 : i32
    %c0_i32_0 = arith.constant 0 : i32
    return %1, %c0_i32 : i32, i32
  }
  func.func @transform_3(%arg0: i32, %arg1: i32) -> (i32, i32) {
    %c0_i32 = arith.constant 0 : i32
    %c0_i32_0 = arith.constant 0 : i32
    %c0_i32_1 = arith.constant 0 : i32
    return %c0_i32, %c0_i32_0 : i32, i32
  }
  func.func @transform_4(%arg0: i32, %arg1: i32) -> (i32, i32) {
    %c0_i32 = arith.constant 0 : i32
    %c0_i32_0 = arith.constant 0 : i32
    %c0_i32_1 = arith.constant 0 : i32
    return %c0_i32, %c0_i32_0 : i32, i32
  }
  func.func @transform_5(%arg0: i32, %arg1: i32) -> (i32, i32) {
    %c0_i32 = arith.constant 0 : i32
    %c0_i32_0 = arith.constant 0 : i32
    %c0_i32_1 = arith.constant 0 : i32
    return %c0_i32, %c0_i32_0 : i32, i32
  }
  func.func @transform_6(%arg0: i32, %arg1: i32) -> (i32, i32) {
    %c0_i32 = arith.constant 0 : i32
    %c0_i32_0 = arith.constant 0 : i32
    %c0_i32_1 = arith.constant 0 : i32
    return %c0_i32, %c0_i32_0 : i32, i32
  }
  func.func @transform_7(%arg0: i32, %arg1: i32) -> (i32, i32) {
    %c0_i32 = arith.constant 0 : i32
    %c0_i32_0 = arith.constant 0 : i32
    %c0_i32_1 = arith.constant 0 : i32
    return %c0_i32, %c0_i32_0 : i32, i32
  }
  func.func @transform_8(%arg0: i32, %arg1: i32) -> (i32, i32, i32) {
    %c0_i32 = arith.constant 0 : i32
    %c0_i32_0 = arith.constant 0 : i32
    %c0_i32_1 = arith.constant 0 : i32
    return %arg0, %c0_i32, %c0_i32_0 : i32, i32, i32
  }
}

</mosaic_0001>

<bundles_post_ra>
// kernel: interaction_forward.3
= control target key start
LH: loop header
LB: loop body
LE: loop exit
PB: predicated region body
PF: predicated region fallthrough
CT: control target
= control target key end

     0   :  { %s551_s1 = inlined_call_operand.vmem [shape: bf16[128,128], index: 1, kind: input, shape index: {}]   ;;  %s552_s0 = inlined_call_operand.vmem [shape: f32[128,128], index: 0, kind: input, shape index: {}]   ;;  %s553_s2 = inlined_call_operand.vmem [shape: bf16[128,128], index: 2, kind: output, shape index: {}]  }
   0x1   :  { %v432_v0 = vld [vmem:[%s551_s1] sm:$0xff]   ;;  %v433_v1 = vld [vmem:[%s551_s1 + $0x8] sm:$0xff]   ;;  %v434_v2 = vld [vmem:[%s551_s1 + $0x10] sm:$0xff]  }
   0x2   :  { %384 = vmatprep.subr.bf16.mxu0 %v432_v0  ;;  %416 = vmatprep.subr.bf16.mxu1 %v432_v0  ;;  %v435_v3 = vld [vmem:[%s551_s1 + $0x18] sm:$0xff]   ;;  %v12_v4 = vld [vmem:[%s552_s0] sm:$0xff]  ;;  %v13_v5 = vld [vmem:[%s552_s0 + $0x8] sm:$0xff] }
   0x3   :  { %385 = vmatpush3.bf16.msra.mxu0 %v432_v0  ;;  %424 = vmatpush3.bf16.msra.mxu1 %v432_v0  ;;  %v20_v6 = vld [vmem:[%s552_s0 + $0x40] sm:$0xff]  ;;  %v28_v7 = vpack.c.bf16 %v13_v5, %v12_v4  ;;  %v21_v8 = vld [vmem:[%s552_s0 + $0x48] sm:$0xff]  ;;  %v438_v12 = vld [vmem:[%s551_s1 + $0x30] sm:$0xff]  }
   0x4   :  { %386 = vmatprep.subr.bf16.mxu0 %v433_v1  ;;  %417 = vmatprep.subr.bf16.mxu1 %v433_v1  ;;  %v32_v9 = vpack.c.bf16 %v21_v8, %v20_v6  ;;  %v436_v10 = vld [vmem:[%s551_s1 + $0x20] sm:$0xff]   ;;  %v437_v11 = vld [vmem:[%s551_s1 + $0x28] sm:$0xff]   ;;  %v439_v13 = vld [vmem:[%s551_s1 + $0x38] sm:$0xff]  }
   0x5   :  { %400 = vmatprep.mubr.bf16.mxu0 %v28_v7  ;;  %v14_v14 = vld [vmem:[%s552_s0 + $0x10] sm:$0xff]  ;;  %v15_v15 = vld [vmem:[%s552_s0 + $0x18] sm:$0xff]  ;;  %v16_v18 = vld [vmem:[%s552_s0 + $0x20] sm:$0xff] }
   0x6   :  { %408 = vmatprep.mubr.bf16.mxu1 %v32_v9  ;;  %v22_v16 = vld [vmem:[%s552_s0 + $0x50] sm:$0xff]  ;;  %v23_v17 = vld [vmem:[%s552_s0 + $0x58] sm:$0xff]  ;;  %v17_v19 = vld [vmem:[%s552_s0 + $0x28] sm:$0xff]  ;;  %v29_v22 = vpack.c.bf16 %v15_v15, %v14_v14 }
   0x7   :  { %387 = vmatpush3.bf16.msra.mxu0 %v433_v1  ;;  %425 = vmatpush3.bf16.msra.mxu1 %v433_v1  ;;  %v24_v20 = vld [vmem:[%s552_s0 + $0x60] sm:$0xff]  ;;  %v25_v21 = vld [vmem:[%s552_s0 + $0x68] sm:$0xff]  ;;  %v33_v23 = vpack.c.bf16 %v23_v17, %v22_v16  ;;  %v30_v24 = vpack.c.bf16 %v17_v19, %v16_v18  ;;  %v18_v26 = vld [vmem:[%s552_s0 + $0x30] sm:$0xff] }
   0x8   :  { %388 = vmatprep.subr.bf16.mxu0 %v434_v2  ;;  %418 = vmatprep.subr.bf16.mxu1 %v434_v2  ;;  %v34_v25 = vpack.c.bf16 %v25_v21, %v24_v20  ;;  %v19_v27 = vld [vmem:[%s552_s0 + $0x38] sm:$0xff]  ;;  %v26_v28 = vld [vmem:[%s552_s0 + $0x70] sm:$0xff] }
   0x9   :  { %v27_v29 = vld [vmem:[%s552_s0 + $0x78] sm:$0xff]  ;;  %v31_v30 = vpack.c.bf16 %v19_v27, %v18_v26 }
   0xa   :  { %v35_v31 = vpack.c.bf16 %v27_v29, %v26_v28 }
   0xb   :  { %389 = vmatpush3.bf16.msra.mxu0 %v434_v2  ;;  %426 = vmatpush3.bf16.msra.mxu1 %v434_v2 }
   0xc   :  { %390 = vmatprep.subr.bf16.mxu0 %v435_v3  ;;  %419 = vmatprep.subr.bf16.mxu1 %v435_v3 }
   0xf   :  { %391 = vmatpush3.bf16.msra.mxu0 %v435_v3  ;;  %427 = vmatpush3.bf16.msra.mxu1 %v435_v3 }
  0x10   :  { %392 = vmatprep.subr.bf16.mxu0 %v436_v10  ;;  %420 = vmatprep.subr.bf16.mxu1 %v436_v10 }
  0x13   :  { %393 = vmatpush3.bf16.msra.mxu0 %v436_v10  ;;  %428 = vmatpush3.bf16.msra.mxu1 %v436_v10 }
  0x14   :  { %394 = vmatprep.subr.bf16.mxu0 %v437_v11  ;;  %421 = vmatprep.subr.bf16.mxu1 %v437_v11 }
  0x17   :  { %395 = vmatpush3.bf16.msra.mxu0 %v437_v11  ;;  %429 = vmatpush3.bf16.msra.mxu1 %v437_v11 }
  0x18   :  { %396 = vmatprep.subr.bf16.mxu0 %v438_v12  ;;  %422 = vmatprep.subr.bf16.mxu1 %v438_v12 }
  0x1b   :  { %397 = vmatpush3.bf16.msra.mxu0 %v438_v12  ;;  %430 = vmatpush3.bf16.msra.mxu1 %v438_v12 }
  0x1c   :  { %398 = vmatprep.subr.bf16.mxu0 %v439_v13  ;;  %423 = vmatprep.subr.bf16.mxu1 %v439_v13 }
  0x1f   :  { %399 = vmatpush3.bf16.msra.mxu0 %v439_v13  ;;  %431 = vmatpush3.bf16.msra.mxu1 %v439_v13 }
  0x22   :  { %401 = vmatmul.mubr.bf16.vlgmr.msra.gmra.mrb[0].mxu0 %v29_v22  ;;  %409 = vmatmul.mubr.bf16.vlgmr.msra.gmra.mrb[0].mxu1 %v33_v23 }
  0x23   :  { %404 = vmatprep.mubr.bf16.mxu0 %v30_v24  ;;  %412 = vmatprep.mubr.bf16.mxu1 %v34_v25 }
  0x2a   :  { %405 = vmatmul.mubr.bf16.gmra.mrb[4].mxu0 %v31_v30  ;;  %413 = vmatmul.mubr.bf16.gmra.mrb[4].mxu1 %v35_v31 }
  0xf5   :  { %v402_v32 = vpop.f32.mrb[0].mxu0  ;;  %v410_v33 = vpop.f32.mrb[0].mxu1 }
  0xf6   :  { %v134_v34 = vpop.f32.mrb[1].mxu0  ;;  %v166_v35 = vpop.f32.mrb[1].mxu1 }
  0xf7   :  { %v403_v36 = vpop.f32.mrb[2].mxu0  ;;  %v411_v37 = vpop.f32.mrb[2].mxu1 }
  0xf8   :  { %v329_v38 = vpack.c.bf16 %v403_v36, %v402_v32  ;;  %v349_v39 = vpack.c.bf16 %v411_v37, %v410_v33  ;;  %v137_v40 = vpop.f32.mrb[3].mxu0  ;;  %v169_v41 = vpop.f32.mrb[3].mxu1 }
  0xf9   :  { %v324_v42 = vpack.c.bf16 %v137_v40, %v134_v34  ;;  %v344_v43 = vpack.c.bf16 %v169_v41, %v166_v35 }
  0xfa   :  { %361 = vst [vmem:[%s553_s2 + $0x8] sm:$0xff] %v329_v38   ;;  %365 = vst [vmem:[%s553_s2 + $0x28] sm:$0xff] %v349_v39  }
  0xfb   :  { %325 = vst [vmem:[%s553_s2] sm:$0xff] %v324_v42   ;;  %364 = vst [vmem:[%s553_s2 + $0x20] sm:$0xff] %v344_v43  }
  0xfd   :  { %v406_v44 = vpop.f32.mrb[4].mxu0  ;;  %v414_v45 = vpop.f32.mrb[4].mxu1 }
  0xfe   :  { %v150_v46 = vpop.f32.mrb[5].mxu0  ;;  %v182_v47 = vpop.f32.mrb[5].mxu1 }
  0xff   :  { %v407_v48 = vpop.f32.mrb[6].mxu0  ;;  %v415_v49 = vpop.f32.mrb[6].mxu1 }
 0x100   :  { %v339_v50 = vpack.c.bf16 %v407_v48, %v406_v44  ;;  %v359_v51 = vpack.c.bf16 %v415_v49, %v414_v45  ;;  %v153_v52 = vpop.f32.mrb[7].mxu0  ;;  %v185_v53 = vpop.f32.mrb[7].mxu1 }
 0x101   :  { %v334_v54 = vpack.c.bf16 %v153_v52, %v150_v46  ;;  %v354_v55 = vpack.c.bf16 %v185_v53, %v182_v47 }
 0x102   :  { %363 = vst [vmem:[%s553_s2 + $0x18] sm:$0xff] %v339_v50   ;;  %367 = vst [vmem:[%s553_s2 + $0x38] sm:$0xff] %v359_v51  }
 0x103   :  { %362 = vst [vmem:[%s553_s2 + $0x10] sm:$0xff] %v334_v54   ;;  %366 = vst [vmem:[%s553_s2 + $0x30] sm:$0xff] %v354_v55  }

// kernel: interaction_forward.5
= control target key start
LH: loop header
LB: loop body
LE: loop exit
PB: predicated region body
PF: predicated region fallthrough
CT: control target
= control target key end

     0   :  { %s1531_s2 = inlined_call_operand.vmem [shape: bf16[128,128], index: 2, kind: input, shape index: {}]   ;;  %s1532_s1 = inlined_call_operand.vmem [shape: f32[2,128,128], index: 1, kind: input, shape index: {}]   ;;  %s1533_s4 = inlined_call_operand.vmem [shape: bf16[128,128], index: 4, kind: input, shape index: {}]   ;;  %s1534_s3 = inlined_call_operand.vmem [shape: f32[1,128], index: 3, kind: input, shape index: {}]   ;;  %s1535_s5 = inlined_call_operand.vmem [shape: f32[1,128], index: 5, kind: input, shape index: {}]   ;;  %s1536_s0 = inlined_call_operand.vmem [shape: f32[128,128], index: 0, kind: input, shape index: {}]   ;;  %s1537_s6 = inlined_call_operand.vmem [shape: f32[128,128], index: 6, kind: output, shape index: {}]  }
   0x1   :  { %v846_v0 = vld [vmem:[%s1531_s2] sm:$0xff]   ;;  %v847_v1 = vld [vmem:[%s1531_s2 + $0x8] sm:$0xff]   ;;  %v848_v2 = vld [vmem:[%s1531_s2 + $0x10] sm:$0xff]  }
   0x2   :  { %782 = vmatprep.subr.bf16.mxu0 %v846_v0  ;;  %v849_v3 = vld [vmem:[%s1531_s2 + $0x18] sm:$0xff]   ;;  %v24_v4 = vld [vmem:[%s1532_s1] sm:$0xff]  ;;  %v25_v5 = vld [vmem:[%s1532_s1 + $0x8] sm:$0xff] }
   0x3   :  { %783 = vmatpush3.bf16.msra.mxu0 %v846_v0  ;;  %v40_v6 = vld [vmem:[%s1532_s1 + $0x80] sm:$0xff]  ;;  %v41_v7 = vld [vmem:[%s1532_s1 + $0x88] sm:$0xff]  ;;  %v852_v13 = vld [vmem:[%s1531_s2 + $0x30] sm:$0xff]  }
   0x4   :  { %784 = vmatprep.subr.bf16.mxu0 %v847_v1  ;;  %v56_v8 = vadd.f32 %v40_v6, %v24_v4  ;;  %v57_v9 = vadd.f32 %v41_v7, %v25_v5  ;;  %v850_v10 = vld [vmem:[%s1531_s2 + $0x20] sm:$0xff]   ;;  %v851_v12 = vld [vmem:[%s1531_s2 + $0x28] sm:$0xff]   ;;  %v853_v14 = vld [vmem:[%s1531_s2 + $0x38] sm:$0xff]  }
   0x5   :  { %v26_v15 = vld [vmem:[%s1532_s1 + $0x10] sm:$0xff]  ;;  %v27_v16 = vld [vmem:[%s1532_s1 + $0x18] sm:$0xff]  ;;  %v28_v19 = vld [vmem:[%s1532_s1 + $0x20] sm:$0xff] }
   0x6   :  { %v72_v11 = vpack.c.bf16 %v57_v9, %v56_v8  ;;  %v42_v17 = vld [vmem:[%s1532_s1 + $0x90] sm:$0xff]  ;;  %v43_v18 = vld [vmem:[%s1532_s1 + $0x98] sm:$0xff]  ;;  %v29_v20 = vld [vmem:[%s1532_s1 + $0x28] sm:$0xff] }
   0x7   :  { %785 = vmatpush3.bf16.msra.mxu0 %v847_v1  ;;  %v44_v21 = vld [vmem:[%s1532_s1 + $0xa0] sm:$0xff]  ;;  %v45_v22 = vld [vmem:[%s1532_s1 + $0xa8] sm:$0xff]  ;;  %v58_v23 = vadd.f32 %v42_v17, %v26_v15  ;;  %v59_v24 = vadd.f32 %v43_v18, %v27_v16  ;;  %v30_v28 = vld [vmem:[%s1532_s1 + $0x30] sm:$0xff] }
   0x8   :  { %786 = vmatprep.subr.bf16.mxu0 %v848_v2  ;;  %798 = vmatprep.mubr.bf16.mxu0 %v72_v11  ;;  %v60_v25 = vadd.f32 %v44_v21, %v28_v19  ;;  %v61_v26 = vadd.f32 %v45_v22, %v29_v20  ;;  %v31_v29 = vld [vmem:[%s1532_s1 + $0x38] sm:$0xff]  ;;  %v46_v31 = vld [vmem:[%s1532_s1 + $0xb0] sm:$0xff]  ;;  %v32_v33 = vld [vmem:[%s1532_s1 + $0x40] sm:$0xff] }
   0x9   :  { %v73_v27 = vpack.c.bf16 %v59_v24, %v58_v23  ;;  %v47_v32 = vld [vmem:[%s1532_s1 + $0xb8] sm:$0xff]  ;;  %v33_v34 = vld [vmem:[%s1532_s1 + $0x48] sm:$0xff]  ;;  %v48_v35 = vld [vmem:[%s1532_s1 + $0xc0] sm:$0xff]  ;;  %v62_v37 = vadd.f32 %v46_v31, %v30_v28 }
   0xa   :  { %v74_v30 = vpack.c.bf16 %v61_v26, %v60_v25  ;;  %v49_v36 = vld [vmem:[%s1532_s1 + $0xc8] sm:$0xff]  ;;  %v63_v38 = vadd.f32 %v47_v32, %v31_v29  ;;  %v64_v39 = vadd.f32 %v48_v35, %v32_v33  ;;  %v34_v42 = vld [vmem:[%s1532_s1 + $0x50] sm:$0xff]  ;;  %v35_v43 = vld [vmem:[%s1532_s1 + $0x58] sm:$0xff] }
   0xb   :  { %787 = vmatpush3.bf16.msra.mxu0 %v848_v2  ;;  %v65_v40 = vadd.f32 %v49_v36, %v33_v34  ;;  %v50_v45 = vld [vmem:[%s1532_s1 + $0xd0] sm:$0xff]  ;;  %v51_v46 = vld [vmem:[%s1532_s1 + $0xd8] sm:$0xff]  ;;  %v36_v47 = vld [vmem:[%s1532_s1 + $0x60] sm:$0xff] }
   0xc   :  { %788 = vmatprep.subr.bf16.mxu0 %v849_v3  ;;  %v75_v41 = vpack.c.bf16 %v63_v38, %v62_v37  ;;  %v37_v48 = vld [vmem:[%s1532_s1 + $0x68] sm:$0xff]  ;;  %v52_v49 = vld [vmem:[%s1532_s1 + $0xe0] sm:$0xff]  ;;  %v66_v51 = vadd.f32 %v50_v45, %v34_v42  ;;  %v67_v52 = vadd.f32 %v51_v46, %v35_v43  ;;  %v38_v56 = vld [vmem:[%s1532_s1 + $0x70] sm:$0xff] }
   0xd   :  { %v76_v44 = vpack.c.bf16 %v65_v40, %v64_v39  ;;  %v53_v50 = vld [vmem:[%s1532_s1 + $0xe8] sm:$0xff]  ;;  %v68_v53 = vadd.f32 %v52_v49, %v36_v47  ;;  %v39_v58 = vld [vmem:[%s1532_s1 + $0x78] sm:$0xff]  ;;  %v54_v59 = vld [vmem:[%s1532_s1 + $0xf0] sm:$0xff] }
   0xe   :  { %v69_v54 = vadd.f32 %v53_v50, %v37_v48  ;;  %v77_v55 = vpack.c.bf16 %v67_v52, %v66_v51  ;;  %v55_v60 = vld [vmem:[%s1532_s1 + $0xf8] sm:$0xff]  ;;  %v70_v61 = vadd.f32 %v54_v59, %v38_v56  ;;  %v854_v0 = vld [vmem:[%s1533_s4] sm:$0xff]   ;;  %v855_v1 = vld [vmem:[%s1533_s4 + $0x8] sm:$0xff]  }
   0xf   :  { %789 = vmatpush3.bf16.msra.mxu0 %v849_v3  ;;  %v71_v62 = vadd.f32 %v55_v60, %v39_v58  ;;  %814 = vmatprep.subr.bf16.mxu1 %v854_v0  ;;  %v856_v2 = vld [vmem:[%s1533_s4 + $0x10] sm:$0xff]   ;;  %v857_v3 = vld [vmem:[%s1533_s4 + $0x18] sm:$0xff]   ;;  %v858_v4 = vld [vmem:[%s1533_s4 + $0x20] sm:$0xff]  }
  0x10   :  { %790 = vmatprep.subr.bf16.mxu0 %v850_v10  ;;  %v78_v57 = vpack.c.bf16 %v69_v54, %v68_v53  ;;  %815 = vmatpush3.bf16.msra.mxu1 %v854_v0  ;;  %v859_v5 = vld [vmem:[%s1533_s4 + $0x28] sm:$0xff]   ;;  %v860_v6 = vld [vmem:[%s1533_s4 + $0x30] sm:$0xff]   ;;  %v861_v7 = vld [vmem:[%s1533_s4 + $0x38] sm:$0xff]  }
  0x11   :  { %v79_v63 = vpack.c.bf16 %v71_v62, %v70_v61  ;;  %816 = vmatprep.subr.bf16.mxu1 %v855_v1  ;;  %v1108_v8 = vld [vmem:[%s1534_s3] ss:$0 sm:$0xff] }
  0x13   :  { %791 = vmatpush3.bf16.msra.mxu0 %v850_v10 }
  0x14   :  { %792 = vmatprep.subr.bf16.mxu0 %v851_v12  ;;  %817 = vmatpush3.bf16.msra.mxu1 %v855_v1 }
  0x15   :  { %818 = vmatprep.subr.bf16.mxu1 %v856_v2 }
  0x17   :  { %793 = vmatpush3.bf16.msra.mxu0 %v851_v12 }
  0x18   :  { %794 = vmatprep.subr.bf16.mxu0 %v852_v13  ;;  %819 = vmatpush3.bf16.msra.mxu1 %v856_v2 }
  0x19   :  { %820 = vmatprep.subr.bf16.mxu1 %v857_v3 }
  0x1b   :  { %795 = vmatpush3.bf16.msra.mxu0 %v852_v13 }
  0x1c   :  { %796 = vmatprep.subr.bf16.mxu0 %v853_v14  ;;  %821 = vmatpush3.bf16.msra.mxu1 %v857_v3 }
  0x1d   :  { %822 = vmatprep.subr.bf16.mxu1 %v858_v4 }
  0x1f   :  { %797 = vmatpush3.bf16.msra.mxu0 %v853_v14 }
  0x20   :  { %823 = vmatpush3.bf16.msra.mxu1 %v858_v4 }
  0x21   :  { %824 = vmatprep.subr.bf16.mxu1 %v859_v5 }
  0x22   :  { %799 = vmatmul.mubr.bf16.vlgmr.msra.gmra.mrb[0].mxu0 %v73_v27 }
  0x23   :  { %802 = vmatprep.mubr.bf16.mxu0 %v74_v30 }
  0x24   :  { %825 = vmatpush3.bf16.msra.mxu1 %v859_v5 }
  0x25   :  { %826 = vmatprep.subr.bf16.mxu1 %v860_v6 }
  0x28   :  { %827 = vmatpush3.bf16.msra.mxu1 %v860_v6 }
  0x29   :  { %828 = vmatprep.subr.bf16.mxu1 %v861_v7 }
  0x2a   :  { %803 = vmatmul.mubr.bf16.gmra.mrb[4].mxu0 %v75_v41 }
  0x2b   :  { %806 = vmatprep.mubr.bf16.mxu0 %v76_v44 }
  0x2c   :  { %829 = vmatpush3.bf16.msra.mxu1 %v861_v7 }
  0x32   :  { %807 = vmatmul.mubr.bf16.gmra.mrb[8].mxu0 %v77_v55 }
  0x33   :  { %810 = vmatprep.mubr.bf16.mxu0 %v78_v57 }
  0x3a   :  { %811 = vmatmul.mubr.bf16.gmra.mrb[12].mxu0 %v79_v63 }
  0xf5   :  { %v800_v9 = vpop.f32.mrb[0].mxu0 }
  0xf6   :  { %v185_v10 = vpop.f32.mrb[1].mxu0  ;;  %v1114_v13 = vadd.f32 %v800_v9, %v1108_v8 }
  0xf7   :  { %v1111_v11 = vadd.f32 %v1108_v8, %v185_v10  ;;  %v801_v12 = vpop.f32.mrb[2].mxu0 }
  0xf8   :  { %v188_v14 = vpop.f32.mrb[3].mxu0  ;;  %v1120_v16 = vadd.f32 %v801_v12, %v1108_v8  ;;  %v1130_v20 = vmul.f32 0.5, %v1114_v13 }
  0xf9   :  { %v1117_v15 = vmul.f32 0.5, %v1111_v11  ;;  %v1123_v17 = vadd.f32 %v1108_v8, %v188_v14 }
  0xfa   :  { %v1133_v22 = vmul.f32 0.5, %v1120_v16  ;;  %v266_v29 = vmin.f32 %v1130_v20, 14.0  ;;  %vm474_vm5 = vcmp.gt.f32.partialorder %v1130_v20, 14.0 }
  0xfb   :  { %v264_v18 = vmin.f32 %v1117_v15, 14.0  ;;  %v1127_v19 = vmul.f32 0.5, %v1123_v17  ;;  %vm472_vm1 = vcmp.gt.f32.partialorder %v1117_v15, 14.0 }
  0xfc   :  { %v267_v34 = vmin.f32 %v1133_v22, 14.0  ;;  %v284_v40 = vmul.f32 1.442695, %v266_v29  ;;  %vm475_vm7 = vcmp.gt.f32.partialorder %v1133_v22, 14.0 }
  0xfd   :  { %v280_v21 = vmul.f32 1.442695, %v264_v18  ;;  %v265_v23 = vmin.f32 %v1127_v19, 14.0  ;;  %v804_v24 = vpop.f32.mrb[4].mxu0  ;;  %vm473_vm2 = vcmp.gt.f32.partialorder %v1127_v19, 14.0 }
  0xfe   :  { %v1137_v25 = vadd.f32 %v804_v24, %v1108_v8  ;;  %v201_v26 = vpop.f32.mrb[5].mxu0  ;;  %v286_v41 = vmul.f32 1.442695, %v267_v34 }
  0xff   :  { %862 = vpow2.f32 %v280_v21  ;;  %v1140_v27 = vadd.f32 %v1108_v8, %v201_v26  ;;  %v805_v28 = vpop.f32.mrb[6].mxu0  ;;  %v282_v30 = vmul.f32 1.442695, %v265_v23 }
 0x100   :  { %v1144_v31 = vmul.f32 0.5, %v1137_v25  ;;  %v1147_v32 = vadd.f32 %v805_v28, %v1108_v8  ;;  %v204_v33 = vpop.f32.mrb[7].mxu0 }
 0x101   :  { %v1151_v35 = vmul.f32 0.5, %v1140_v27  ;;  %v1154_v36 = vadd.f32 %v1108_v8, %v204_v33  ;;  %864 = vpow2.f32 %v282_v30 }
 0x102   :  { %v1157_v37 = vmul.f32 0.5, %v1147_v32  ;;  %v270_v38 = vmin.f32 %v1144_v31, 14.0  ;;  %866 = vpow2.f32 %v284_v40  ;;  %vm478_vm13 = vcmp.gt.f32.partialorder %v1144_v31, 14.0 }
 0x103   :  { %v1161_v39 = vmul.f32 0.5, %v1154_v36  ;;  %v268_v42 = vmin.f32 %v1151_v35, 14.0  ;;  %868 = vpow2.f32 %v286_v41  ;;  %vm476_vm10 = vcmp.gt.f32.partialorder %v1151_v35, 14.0 }
 0x104   :  { %v271_v44 = vmin.f32 %v1157_v37, 14.0  ;;  %v292_v47 = vmul.f32 1.442695, %v270_v38  ;;  %vm479_vm14 = vcmp.gt.f32.partialorder %v1157_v37, 14.0 }
 0x105   :  { %v808_v43 = vpop.f32.mrb[8].mxu0  ;;  %v269_v48 = vmin.f32 %v1161_v39, 14.0  ;;  %v288_v55 = vmul.f32 1.442695, %v268_v42  ;;  %vm477_vm11 = vcmp.gt.f32.partialorder %v1161_v39, 14.0 }
 0x106   :  { %v1166_v45 = vadd.f32 %v808_v43, %v1108_v8  ;;  %v217_v46 = vpop.f32.mrb[9].mxu0  ;;  %v294_v58 = vmul.f32 1.442695, %v271_v44  ;;  %870 = vpow2.f32 %v292_v47 }
 0x107   :  { %v1170_v49 = vadd.f32 %v1108_v8, %v217_v46  ;;  %v809_v50 = vpop.f32.mrb[10].mxu0  ;;  %v290_v62 = vmul.f32 1.442695, %v269_v48 }
 0x108   :  { %v1173_v51 = vmul.f32 0.5, %v1166_v45  ;;  %v1176_v52 = vadd.f32 %v809_v50, %v1108_v8  ;;  %v220_v53 = vpop.f32.mrb[11].mxu0 }
 0x109   :  { %v1178_v54 = vpop.eup %862  ;;  %v1181_v56 = vmul.f32 0.5, %v1170_v49  ;;  %v1184_v57 = vadd.f32 %v1108_v8, %v220_v53 }
 0x10a   :  { %v274_v59 = vmin.f32 %v1173_v51, 14.0  ;;  %v1188_v60 = vmul.f32 0.5, %v1176_v52  ;;  %v312_v61 = vadd.f32 1.0, %v1178_v54  ;;  %v315_v1 = vmul.f32 -0.5, %v1178_v54 }
 0x10b   :  { %v1192_v63 = vmul.f32 0.5, %v1184_v57  ;;  %v272_v0 = vmin.f32 %v1181_v56, 14.0  ;;  %v1197_v4 = vpop.eup %864  ;;  %v318_v53 = vand.u32 2147483647, %v1178_v54 }
 0x10c   :  { %872 = vlog2.f32 %v312_v61  ;;  %v275_v2 = vmin.f32 %v1188_v60, 14.0  ;;  %v300_v5 = vmul.f32 1.442695, %v274_v59  ;;  %v316_v24 = vadd.f32 1.0, %v315_v1  ;;  %v867_v33 = vpop.eup %866 }
 0x10d   :  { %874 = vpow2.f32 %v288_v55  ;;  %v812_v3 = vpop.f32.mrb[12].mxu0  ;;  %v273_v6 = vmin.f32 %v1192_v63, 14.0  ;;  %v296_v14 = vmul.f32 1.442695, %v272_v0  ;;  %v321_v30 = vadd.f32 1.0, %v1197_v4  ;;  %v1223_v41 = vpop.eup %868 }
 0x10e   :  { %876 = vpow2.f32 %v294_v58  ;;  %v1201_v7 = vadd.f32 %v812_v3, %v1108_v8  ;;  %v233_v9 = vpop.f32.mrb[13].mxu0  ;;  %v302_v26 = vmul.f32 1.442695, %v275_v2  ;;  %v330_v59 = vadd.f32 1.0, %v867_v33 }
 0x10f   :  { %878 = vpow2.f32 %v290_v62  ;;  %v1204_v10 = vadd.f32 %v1108_v8, %v233_v9  ;;  %v813_v12 = vpop.f32.mrb[14].mxu0  ;;  %v298_v34 = vmul.f32 1.442695, %v273_v6  ;;  %v333_v61 = vmul.f32 -0.5, %v867_v33 }
 0x110   :  { %v1207_v18 = vmul.f32 0.5, %v1201_v7  ;;  %v1210_v21 = vadd.f32 %v813_v12, %v1108_v8  ;;  %v236_v23 = vpop.f32.mrb[15].mxu0  ;;  %880 = vpow2.f32 %v300_v5  ;;  %v1231_v47 = vpop.eup %870  ;;  %v317_v1 = vmul.f32 %v1178_v54, %v316_v24 }
 0x111   :  { %v1213_v28 = vmul.f32 0.5, %v1204_v10  ;;  %v1216_v29 = vadd.f32 %v1108_v8, %v236_v23  ;;  %882 = vlog2.f32 %v321_v30  ;;  %v324_v8 = vmul.f32 -0.5, %v1197_v4 }
 0x112   :  { %1539 = vst [vmem:[#allocation2_spill] sm:$0xff] %v1210_v21  ;;  %v278_v38 = vmin.f32 %v1207_v18, 14.0  ;;  %v1221_v40 = vmul.f32 0.5, %v1210_v21  ;;  %884 = vpow2.f32 %v296_v14  ;;  %v327_v6 = vand.u32 2147483647, %v1197_v4 }
 0x113   :  { %v276_v42 = vmin.f32 %v1213_v28, 14.0  ;;  %v1227_v43 = vmul.f32 0.5, %v1216_v29  ;;  %886 = vpow2.f32 %v302_v26  ;;  %v325_v2 = vadd.f32 1.0, %v324_v8 }
 0x114   :  { %v308_v44 = vmul.f32 1.442695, %v278_v38  ;;  %v279_v46 = vmin.f32 %v1221_v40, 14.0  ;;  %888 = vpow2.f32 %v298_v34  ;;  %v339_v9 = vadd.f32 1.0, %v1223_v41 }
 0x115   :  { %v304_v48 = vmul.f32 1.442695, %v276_v42  ;;  %v277_v50 = vmin.f32 %v1227_v43, 14.0  ;;  %vm1244_vm0 = vcmp.lt.f32.partialorder %v318_v53, 0.0004427343  ;;  %v334_v23 = vadd.f32 1.0, %v333_v61 }
 0x116   :  { %v873_v55 = vpop.eup %872  ;;  %v310_v58 = vmul.f32 1.442695, %v279_v46  ;;  %890 = vpow2.f32 %v308_v44  ;;  %v336_v24 = vand.u32 2147483647, %v867_v33  ;;  %v326_v26 = vmul.f32 %v1197_v4, %v325_v2 }
 0x117   :  { %v1235_v62 = vpop.eup %874  ;;  %v314_v0 = vmul.f32 0.6931472, %v873_v55  ;;  %892 = vpow2.f32 %v304_v48  ;;  %v306_v5 = vmul.f32 1.442695, %v277_v50  ;;  %v342_v30 = vmul.f32 -0.5, %v1223_v41 }
 0x118   :  { %v1238_v3 = vpop.eup %876  ;;  %894 = vpow2.f32 %v310_v58  ;;  %v348_v34 = vadd.f32 1.0, %v1235_v62  ;;  %vm1257_vm3 = vcmp.lt.f32.partialorder %v327_v6, 0.0004427343  ;;  %v351_v8 = vmul.f32 -0.5, %v1235_v62 }
 0x119   :  { %v1242_v12 = vpop.eup %878  ;;  %v320_v54 = vsel %vm1244_vm0, %v317_v1, %v314_v0  ;;  %896 = vlog2.f32 %v330_v59  ;;  %v345_v4 = vand.u32 2147483647, %v1223_v41  ;;  %v335_v58 = vmul.f32 %v867_v33, %v334_v23 }
 0x11a   :  { %898 = vlog2.f32 %v339_v9  ;;  %v1255_v38 = vpop.eup %880  ;;  %v357_v44 = vadd.f32 1.0, %v1242_v12  ;;  %v456_v48 = vmul.f32 2.0, %v320_v54  ;;  %v360_v50 = vmul.f32 -0.5, %v1242_v12 }
 0x11b   :  { %900 = vpow2.f32 %v306_v5  ;;  %v883_v46 = vpop.eup %882  ;;  %vm1267_vm4 = vcmp.lt.f32.partialorder %v336_v24, 0.0004427343  ;;  %v343_v0 = vadd.f32 1.0, %v342_v30  ;;  %v354_v1 = vand.u32 2147483647, %v1235_v62 }
 0x11c   :  { %902 = vlog2.f32 %v348_v34  ;;  %v1265_v53 = vpop.eup %884  ;;  %v323_v55 = vmul.f32 0.6931472, %v883_v46  ;;  %v366_v2 = vadd.f32 1.0, %v1231_v47  ;;  %v369_v5 = vmul.f32 -0.5, %v1231_v47 }
 0x11d   :  { %904 = vlog2.f32 %v357_v44  ;;  %v1271_v61 = vpop.eup %886  ;;  %v352_v33 = vadd.f32 1.0, %v351_v8  ;;  %v363_v14 = vand.u32 2147483647, %v1242_v12  ;;  %v375_v54 = vadd.f32 1.0, %v1238_v3 }
 0x11e   :  { %v1276_v6 = vpop.eup %888  ;;  %v329_v9 = vsel %vm1257_vm3, %v326_v26, %v323_v55  ;;  %vm1285_vm6 = vcmp.lt.f32.partialorder %v345_v4, 0.0004427343  ;;  %v361_v34 = vadd.f32 1.0, %v360_v50  ;;  %906 = vlog2.f32 %v366_v2 }
 0x11f   :  { %v457_v24 = vmul.f32 2.0, %v329_v9  ;;  %v488_v26 = vsel %vm472_vm1, %v1111_v11, %v456_v48  ;;  %v372_v42 = vand.u32 2147483647, %v1231_v47  ;;  %908 = vlog2.f32 %v375_v54 }
 0x120   :  { %v1282_v23 = vpop.eup %890  ;;  %v378_v8 = vmul.f32 -0.5, %v1238_v3  ;;  %v344_v50 = vmul.f32 %v1223_v41, %v343_v0  ;;  %v370_v55 = vadd.f32 1.0, %v369_v5  ;;  %v384_v2 = vadd.f32 1.0, %v1265_v53 }
 0x121   :  { %v1289_v44 = vpop.eup %892  ;;  %v489_v4 = vsel %vm473_vm2, %v1123_v17, %v457_v24  ;;  %v353_v11 = vmul.f32 %v1235_v62, %v352_v33  ;;  %vm1305_vm8 = vcmp.lt.f32.partialorder %v354_v1, 0.0004427343  ;;  %vm1309_vm9 = vcmp.lt.f32.partialorder %v363_v14, 0.0004427343 }
 0x122   :  { %v1297_v46 = vpop.eup %894  ;;  %v504_v21 = vpack.c.bf16 %v489_v4, %v488_v26  ;;  %v362_v19 = vmul.f32 %v1242_v12, %v361_v34  ;;  %910 = vlog2.f32 %v384_v2  ;;  %v393_v41 = vadd.f32 1.0, %v1276_v6 }
 0x123   :  { %v897_v9 = vpop.eup %896  ;;  %vm1319_vm12 = vcmp.lt.f32.partialorder %v372_v42, 0.0004427343  ;;  %v379_v5 = vadd.f32 1.0, %v378_v8  ;;  %v387_v33 = vmul.f32 -0.5, %v1265_v53  ;;  %v371_v12 = vmul.f32 %v1231_v47, %v370_v55 }
 0x124   :  { %v899_v54 = vpop.eup %898  ;;  %v332_v17 = vmul.f32 0.6931472, %v897_v9  ;;  %830 = vmatprep.mubr.bf16.mxu1 %v504_v21  ;;  %v381_v34 = vand.u32 2147483647, %v1238_v3  ;;  %912 = vlog2.f32 %v393_v41  ;;  %v390_v2 = vand.u32 2147483647, %v1265_v53 }
 0x125   :  { %v1317_v62 = vpop.eup %900  ;;  %v341_v0 = vmul.f32 0.6931472, %v899_v54  ;;  %v402_v47 = vadd.f32 1.0, %v1255_v38  ;;  %v388_v9 = vadd.f32 1.0, %v387_v33  ;;  %v399_v15 = vand.u32 2147483647, %v1276_v6 }
 0x126   :  { %v903_v14 = vpop.eup %902  ;;  %v338_v24 = vsel %vm1267_vm4, %v335_v58, %v332_v17  ;;  %v396_v58 = vmul.f32 -0.5, %v1276_v6  ;;  %vm382_vm15 = vcmp.lt.f32.partialorder %v381_v34, 0.0004427343  ;;  %vm1357_vm0 = vcmp.lt.f32.partialorder %v390_v2, 0.0004427343 }
 0x127   :  { %v905_v26 = vpop.eup %904  ;;  %v347_v21 = vsel %vm1285_vm6, %v344_v50, %v341_v0  ;;  %v458_v42 = vmul.f32 2.0, %v338_v24  ;;  %v350_v4 = vmul.f32 0.6931472, %v903_v14  ;;  %v380_v50 = vmul.f32 %v1238_v3, %v379_v5 }
 0x128   :  { %v459_v8 = vmul.f32 2.0, %v347_v21  ;;  %v359_v59 = vmul.f32 0.6931472, %v905_v26  ;;  %v907_v54 = vpop.eup %906  ;;  %914 = vlog2.f32 %v402_v47  ;;  %v397_v26 = vadd.f32 1.0, %v396_v58 }
 0x129   :  { %v490_v55 = vsel %vm474_vm5, %v1114_v13, %v458_v42  ;;  %v356_v30 = vsel %vm1305_vm8, %v353_v11, %v350_v4  ;;  %v909_v14 = vpop.eup %908  ;;  %v368_v13 = vmul.f32 0.6931472, %v907_v54  ;;  %v405_v3 = vmul.f32 -0.5, %v1255_v38 }
 0x12a   :  { %v491_v17 = vsel %vm475_vm7, %v1120_v16, %v459_v8  ;;  %v365_v41 = vsel %vm1309_vm9, %v362_v19, %v359_v59  ;;  %v460_v0 = vmul.f32 2.0, %v356_v30  ;;  %v377_v11 = vmul.f32 0.6931472, %v909_v14 }
 0x12b   :  { %v505_v24 = vpack.c.bf16 %v491_v17, %v490_v55  ;;  %v461_v20 = vmul.f32 2.0, %v365_v41  ;;  %v411_v5 = vadd.f32 1.0, %v1271_v61  ;;  %v374_v48 = vsel %vm1319_vm12, %v371_v12, %v368_v13 }
 0x12c   :  { %v492_v16 = vsel %vm476_vm10, %v1140_v27, %v460_v0  ;;  %v911_v19 = vpop.eup %910  ;;  %v383_v21 = vsel %vm382_vm15, %v380_v50, %v377_v11  ;;  %v462_v42 = vmul.f32 2.0, %v374_v48  ;;  %v389_v27 = vmul.f32 %v1265_v53, %v388_v9 }
 0x12d   :  { %831 = vmatmul.mubr.bf16.vlgmr.msra.gmra.mrb[0].mxu1 %v505_v24  ;;  %v493_v22 = vsel %vm477_vm11, %v1154_v36, %v461_v20  ;;  %v463_v8 = vmul.f32 2.0, %v383_v21  ;;  %v386_v59 = vmul.f32 0.6931472, %v911_v19  ;;  %916 = vlog2.f32 %v411_v5 }
 0x12e   :  { %v506_v33 = vpack.c.bf16 %v493_v22, %v492_v16  ;;  %v913_v35 = vpop.eup %912  ;;  %v398_v36 = vmul.f32 %v1276_v6, %v397_v26  ;;  %vm1363_vm1 = vcmp.lt.f32.partialorder %v399_v15, 0.0004427343  ;;  %v406_v1 = vadd.f32 1.0, %v405_v3 }
 0x12f   :  { %v420_v12 = vadd.f32 1.0, %v1289_v44  ;;  %v494_v34 = vsel %vm478_vm13, %v1137_v25, %v462_v42  ;;  %v495_v53 = vsel %vm479_vm14, %v1147_v32, %v463_v8  ;;  %v392_v2 = vsel %vm1357_vm0, %v389_v27, %v386_v59 }
 0x130   :  { %834 = vmatprep.mubr.bf16.mxu1 %v506_v33  ;;  %v395_v58 = vmul.f32 0.6931472, %v913_v35  ;;  %v507_v6 = vpack.c.bf16 %v495_v53, %v494_v34  ;;  %v464_v47 = vmul.f32 2.0, %v392_v2  ;;  %v414_v55 = vmul.f32 -0.5, %v1271_v61 }
 0x131   :  { %918 = vlog2.f32 %v420_v12  ;;  %v408_v50 = vand.u32 2147483647, %v1255_v38  ;;  %v429_v25 = vadd.f32 1.0, %v1317_v62  ;;  %vm480_vm2 = vcmp.gt.f32.partialorder %v1181_v56, 14.0 }
 0x132   :  { %v401_v30 = vsel %vm1363_vm1, %v398_v36, %v395_v58  ;;  %v915_v31 = vpop.eup %914  ;;  %vm481_vm3 = vcmp.gt.f32.partialorder %v1192_v63, 14.0  ;;  %v407_v9 = vmul.f32 %v1255_v38, %v406_v1  ;;  %v423_v54 = vmul.f32 -0.5, %v1289_v44 }
 0x133   :  { %v465_v32 = vmul.f32 2.0, %v401_v30  ;;  %v404_v37 = vmul.f32 0.6931472, %v915_v31  ;;  %920 = vlog2.f32 %v429_v25  ;;  %v496_v17 = vsel %vm480_vm2, %v1170_v49, %v464_v47 }
 0x134   :  { %v415_v0 = vadd.f32 1.0, %v414_v55  ;;  %v438_v14 = vadd.f32 1.0, %v1282_v23  ;;  %vm409_vm4 = vcmp.lt.f32.partialorder %v408_v50, 0.0004427343  ;;  %v417_v56 = vand.u32 2147483647, %v1271_v61 }
 0x135   :  { %835 = vmatmul.mubr.bf16.gmra.mrb[4].mxu1 %v507_v6  ;;  %v497_v41 = vsel %vm481_vm3, %v1184_v57, %v465_v32  ;;  %v410_v63 = vsel %vm409_vm4, %v407_v9, %v404_v37  ;;  %v432_v20 = vmul.f32 -0.5, %v1317_v62  ;;  %v447_v38 = vadd.f32 1.0, %v1297_v46  ;;  %v682_v32 = vld [vmem:[%s1536_s0 + $0x10] sm:$0xff] }
 0x136   :  { %v508_v24 = vpack.c.bf16 %v497_v41, %v496_v17  ;;  %922 = vlog2.f32 %v438_v14  ;;  %v424_v15 = vadd.f32 1.0, %v423_v54  ;;  %v416_v49 = vmul.f32 %v1271_v61, %v415_v0  ;;  %v683_v54 = vld [vmem:[%s1536_s0 + $0x18] sm:$0xff]  ;;  %v681_v14 = vld [vmem:[%s1536_s0 + $0x8] sm:$0xff] }
 0x137   :  { %v917_v13 = vpop.eup %916  ;;  %v426_v57 = vand.u32 2147483647, %v1289_v44  ;;  %924 = vlog2.f32 %v447_v38  ;;  %vm418_vm5 = vcmp.lt.f32.partialorder %v417_v56, 0.0004427343  ;;  %v466_v26 = vmul.f32 2.0, %v410_v63 }
 0x138   :  { %838 = vmatprep.mubr.bf16.mxu1 %v508_v24  ;;  %v413_v11 = vmul.f32 0.6931472, %v917_v13  ;;  %v441_v3 = vmul.f32 -0.5, %v1282_v23  ;;  %v433_v22 = vadd.f32 1.0, %v432_v20  ;;  %v450_v48 = vmul.f32 -0.5, %v1297_v46  ;;  %v686_v13 = vld [vmem:[%s1536_s0 + $0x30] sm:$0xff] }
 0x139   :  { %v425_v21 = vmul.f32 %v1289_v44, %v424_v15  ;;  %v435_v42 = vand.u32 2147483647, %v1317_v62  ;;  %vm482_vm6 = vcmp.gt.f32.partialorder %v1173_v51, 14.0  ;;  %vm483_vm7 = vcmp.gt.f32.partialorder %v1188_v60, 14.0 }
 0x13a   :  { %v419_v16 = vsel %vm418_vm5, %v416_v49, %v413_v11  ;;  %vm427_vm8 = vcmp.lt.f32.partialorder %v426_v57, 0.0004427343  ;;  %v444_v61 = vand.u32 2147483647, %v1282_v23  ;;  %v498_v8 = vsel %vm482_vm6, %v1166_v45, %v466_v26  ;;  %v684_v49 = vld [vmem:[%s1536_s0 + $0x20] sm:$0xff] }
 0x13b   :  { %v919_v5 = vpop.eup %918  ;;  %v467_v19 = vmul.f32 2.0, %v419_v16  ;;  %v442_v35 = vadd.f32 1.0, %v441_v3  ;;  %v434_v44 = vmul.f32 %v1317_v62, %v433_v22  ;;  %v451_v1 = vadd.f32 1.0, %v450_v48  ;;  %v687_v3 = vld [vmem:[%s1536_s0 + $0x38] sm:$0xff]  ;;  %v685_v48 = vld [vmem:[%s1536_s0 + $0x28] sm:$0xff] }
 0x13c   :  { %v422_v33 = vmul.f32 0.6931472, %v919_v5  ;;  %vm436_vm9 = vcmp.lt.f32.partialorder %v435_v42, 0.0004427343  ;;  %v453_v34 = vand.u32 2147483647, %v1297_v46 }
 0x13d   :  { %v921_v4 = vpop.eup %920  ;;  %v499_v59 = vsel %vm483_vm7, %v1176_v52, %v467_v19  ;;  %v443_v45 = vmul.f32 %v1282_v23, %v442_v35  ;;  %vm484_vm10 = vcmp.gt.f32.partialorder %v1213_v28, 14.0  ;;  %vm485_vm11 = vcmp.gt.f32.partialorder %v1227_v43, 14.0  ;;  %v1558_v43 = vld [vmem:[#allocation2_spill] sm:$0xff] }
 0x13e   :  { %v428_v27 = vsel %vm427_vm8, %v425_v21, %v422_v33  ;;  %v509_v36 = vpack.c.bf16 %v499_v59, %v498_v8  ;;  %v431_v39 = vmul.f32 0.6931472, %v921_v4  ;;  %vm445_vm12 = vcmp.lt.f32.partialorder %v444_v61, 0.0004427343  ;;  %v690_v4 = vld [vmem:[%s1536_s0 + $0x50] sm:$0xff] }
 0x13f   :  { %v468_v12 = vmul.f32 2.0, %v428_v27  ;;  %v452_v52 = vmul.f32 %v1297_v46, %v451_v1  ;;  %vm454_vm13 = vcmp.lt.f32.partialorder %v453_v34, 0.0004427343  ;;  %vm486_vm14 = vcmp.gt.f32.partialorder %v1207_v18, 14.0  ;;  %v688_v27 = vld [vmem:[%s1536_s0 + $0x40] sm:$0xff] }
 0x140   :  { %v923_v51 = vpop.eup %922  ;;  %839 = vmatmul.mubr.bf16.gmra.mrb[8].mxu1 %v509_v36  ;;  %v437_v60 = vsel %vm436_vm9, %v434_v44, %v431_v39  ;;  %vm487_vm15 = vcmp.gt.f32.partialorder %v1221_v40, 14.0  ;;  %v691_v39 = vld [vmem:[%s1536_s0 + $0x58] sm:$0xff] }
 0x141   :  { %v469_v53 = vmul.f32 2.0, %v437_v60  ;;  %v440_v2 = vmul.f32 0.6931472, %v923_v51  ;;  %v925_v58 = vpop.eup %924  ;;  %v500_v62 = vsel %vm484_vm10, %v1204_v10, %v468_v12  ;;  %v1417_v10 = vld [vmem:[%s1535_s5] ss:$0 sm:$0xff]  ;;  %v689_v51 = vld [vmem:[%s1536_s0 + $0x48] sm:$0xff] }
 0x142   :  { %v449_v55 = vmul.f32 0.6931472, %v925_v58  ;;  %v694_v58 = vld [vmem:[%s1536_s0 + $0x70] sm:$0xff] }
 0x143   :  { %v501_v6 = vsel %vm485_vm11, %v1216_v29, %v469_v53  ;;  %v446_v47 = vsel %vm445_vm12, %v443_v45, %v440_v2 }
 0x144   :  { %v510_v30 = vpack.c.bf16 %v501_v6, %v500_v62  ;;  %v470_v50 = vmul.f32 2.0, %v446_v47  ;;  %v455_v25 = vsel %vm454_vm13, %v452_v52, %v449_v55  ;;  %v692_v6 = vld [vmem:[%s1536_s0 + $0x60] sm:$0xff] }
 0x145   :  { %v471_v23 = vmul.f32 2.0, %v455_v25 }
 0x146   :  { %842 = vmatprep.mubr.bf16.mxu1 %v510_v30  ;;  %v502_v28 = vsel %vm486_vm14, %v1201_v7, %v470_v50  ;;  %v680_v7 = vld [vmem:[%s1536_s0] sm:$0xff]  ;;  %v695_v30 = vld [vmem:[%s1536_s0 + $0x78] sm:$0xff] }
 0x147   :  { %v503_v46 = vsel %vm487_vm15, %v1558_v43, %v471_v23 }
 0x148   :  { %v511_v31 = vpack.c.bf16 %v503_v46, %v502_v28  ;;  %v693_v28 = vld [vmem:[%s1536_s0 + $0x68] sm:$0xff] }
 0x14a   :  { %843 = vmatmul.mubr.bf16.gmra.mrb[12].mxu1 %v511_v31 }
 0x200   :  { %v832_v29 = vpop.f32.mrb[0].mxu1 }
 0x201   :  { %v626_v18 = vadd.f32 %v832_v29, %v1417_v10  ;;  %v617_v37 = vpop.f32.mrb[1].mxu1 }
 0x202   :  { %v618_v40 = vadd.f32 %v1417_v10, %v617_v37  ;;  %v833_v9 = vpop.f32.mrb[2].mxu1 }
 0x203   :  { %v698_v17 = vadd.f32 %v682_v32, %v626_v18  ;;  %v629_v41 = vadd.f32 %v833_v9, %v1417_v10  ;;  %v620_v0 = vpop.f32.mrb[3].mxu1 }
 0x204   :  { %v696_v24 = vadd.f32 %v680_v7, %v618_v40  ;;  %v621_v56 = vadd.f32 %v1417_v10, %v620_v0 }
 0x205   :  { %714 = vst [vmem:[%s1537_s6 + $0x10] sm:$0xff] %v698_v17  ;;  %v699_v63 = vadd.f32 %v683_v54, %v629_v41 }
 0x206   :  { %712 = vst [vmem:[%s1537_s6] sm:$0xff] %v696_v24  ;;  %v697_v20 = vadd.f32 %v681_v14, %v621_v56 }
 0x207   :  { %715 = vst [vmem:[%s1537_s6 + $0x18] sm:$0xff] %v699_v63 }
 0x208   :  { %713 = vst [vmem:[%s1537_s6 + $0x8] sm:$0xff] %v697_v20  ;;  %v836_v38 = vpop.f32.mrb[4].mxu1 }
 0x209   :  { %v642_v15 = vadd.f32 %v836_v38, %v1417_v10  ;;  %v633_v11 = vpop.f32.mrb[5].mxu1 }
 0x20a   :  { %v634_v57 = vadd.f32 %v1417_v10, %v633_v11  ;;  %v837_v26 = vpop.f32.mrb[6].mxu1 }
 0x20b   :  { %v702_v5 = vadd.f32 %v686_v13, %v642_v15  ;;  %v645_v16 = vadd.f32 %v837_v26, %v1417_v10  ;;  %v636_v22 = vpop.f32.mrb[7].mxu1 }
 0x20c   :  { %v700_v19 = vadd.f32 %v684_v49, %v634_v57  ;;  %v637_v33 = vadd.f32 %v1417_v10, %v636_v22 }
 0x20d   :  { %718 = vst [vmem:[%s1537_s6 + $0x30] sm:$0xff] %v702_v5  ;;  %v703_v21 = vadd.f32 %v687_v3, %v645_v16 }
 0x20e   :  { %716 = vst [vmem:[%s1537_s6 + $0x20] sm:$0xff] %v700_v19  ;;  %v701_v42 = vadd.f32 %v685_v48, %v637_v33 }
 0x20f   :  { %719 = vst [vmem:[%s1537_s6 + $0x38] sm:$0xff] %v703_v21 }
 0x210   :  { %717 = vst [vmem:[%s1537_s6 + $0x28] sm:$0xff] %v701_v42 }
 0x213   :  { %v840_v61 = vpop.f32.mrb[8].mxu1 }
 0x214   :  { %v658_v8 = vadd.f32 %v840_v61, %v1417_v10  ;;  %v649_v59 = vpop.f32.mrb[9].mxu1 }
 0x215   :  { %v650_v35 = vadd.f32 %v1417_v10, %v649_v59  ;;  %v841_v36 = vpop.f32.mrb[10].mxu1 }
 0x216   :  { %v706_v44 = vadd.f32 %v690_v4, %v658_v8  ;;  %v661_v1 = vadd.f32 %v841_v36, %v1417_v10  ;;  %v652_v12 = vpop.f32.mrb[11].mxu1 }
 0x217   :  { %v704_v60 = vadd.f32 %v688_v27, %v650_v35  ;;  %v653_v34 = vadd.f32 %v1417_v10, %v652_v12 }
 0x218   :  { %722 = vst [vmem:[%s1537_s6 + $0x50] sm:$0xff] %v706_v44  ;;  %v707_v53 = vadd.f32 %v691_v39, %v661_v1 }
 0x219   :  { %720 = vst [vmem:[%s1537_s6 + $0x40] sm:$0xff] %v704_v60  ;;  %v705_v2 = vadd.f32 %v689_v51, %v653_v34 }
 0x21a   :  { %723 = vst [vmem:[%s1537_s6 + $0x58] sm:$0xff] %v707_v53 }
 0x21b   :  { %721 = vst [vmem:[%s1537_s6 + $0x48] sm:$0xff] %v705_v2 }
 0x21d   :  { %v844_v45 = vpop.f32.mrb[12].mxu1 }
 0x21e   :  { %v674_v52 = vadd.f32 %v844_v45, %v1417_v10  ;;  %v665_v62 = vpop.f32.mrb[13].mxu1 }
 0x21f   :  { %v666_v47 = vadd.f32 %v1417_v10, %v665_v62  ;;  %v845_v55 = vpop.f32.mrb[14].mxu1 }
 0x220   :  { %v710_v50 = vadd.f32 %v694_v58, %v674_v52  ;;  %v677_v25 = vadd.f32 %v845_v55, %v1417_v10  ;;  %v668_v23 = vpop.f32.mrb[15].mxu1 }
 0x221   :  { %v708_v43 = vadd.f32 %v692_v6, %v666_v47  ;;  %v669_v46 = vadd.f32 %v1417_v10, %v668_v23 }
 0x222   :  { %726 = vst [vmem:[%s1537_s6 + $0x70] sm:$0xff] %v710_v50  ;;  %v711_v31 = vadd.f32 %v695_v30, %v677_v25 }
 0x223   :  { %724 = vst [vmem:[%s1537_s6 + $0x60] sm:$0xff] %v708_v43  ;;  %v709_v29 = vadd.f32 %v693_v28, %v669_v46 }
 0x224   :  { %727 = vst [vmem:[%s1537_s6 + $0x78] sm:$0xff] %v711_v31 }
 0x225   :  { %725 = vst [vmem:[%s1537_s6 + $0x68] sm:$0xff] %v709_v29 }

// kernel: interaction_forward.4
= control target key start
LH: loop header
LB: loop body
LE: loop exit
PB: predicated region body
PF: predicated region fallthrough
CT: control target
= control target key end

     0   :  { %s4924_s27 = smov 0   ;;  %s4926_s28 = smov 0   ;;  %s7484_s0 = inlined_call_operand.vmem [shape: s32[2,512,1], index: 0, kind: input, shape index: {}]   ;;  %s7485_s1 = inlined_call_operand.vmem [shape: s32[2,1,512], index: 1, kind: input, shape index: {}]   ;;  %s7486_s2 = inlined_call_operand.vmem [shape: bf16[1024,128], index: 2, kind: input, shape index: {}]   ;;  %s7487_s3 = inlined_call_operand.vmem [shape: bf16[128,128], index: 3, kind: input, shape index: {}]   ;;  %s7488_s4 = inlined_call_operand.vmem [shape: bf16[128,128], index: 4, kind: input, shape index: {}]   ;;  %s7489_s5 = inlined_call_operand.vmem [shape: f32[1,128], index: 5, kind: input, shape index: {}]   ;;  %s7490_s6 = inlined_call_operand.vmem [shape: bf16[128,128], index: 6, kind: input, shape index: {}]   ;;  %s7491_s7 = inlined_call_operand.vmem [shape: f32[1,128], index: 7, kind: input, shape index: {}]   ;;  %s7492_s8 = inlined_call_operand.vmem [shape: f32[2,128,128], index: 8, kind: output, shape index: {}]  }
   0x1   :  { %s4928_s29 = smov 0  }
   0x2 LB: > { %s30_s30 = sadd.s32 1, %s4871_s28  ;;  %p3825_p0 = scmp.ge.s32.totalorder %s4875_s29, 1  ;;  %s4875_s29 = sphi %s4928_s29, %s18_s29   ;;  %s4871_s28 = sphi %s4926_s28, %s8027_s28   ;;  %s4867_s27 = sphi %s4924_s27, %s8026_s27  }
   0x3   : > { %p32_p1 = scmp.ge.s32.totalorder %s30_s30, 2  ;;  %p306_p2 = scmp.lt.s32.totalorder %s4875_s29, 3 }
   0x5   : > { %s8029_s30 = smov (%p32_p1, %s30_s30), 0  ;;  %p307_p3 = pnand %p3825_p0, %p306_p2 }
   0x7   : > { %310 = sbr.rel (%p307_p3) target bundleno = 1067 (0x42b), region = 52 }
   0xe   : > { %v4540_v0 = vld [vmem:[%s7488_s4] sm:$0xff]   ;;  %v4541_v1 = vld [vmem:[%s7488_s4 + $0x8] sm:$0xff]   ;;  %v4877_v2 = vmov 0   ;;  %p353_p4 = scmp.lt.s32.totalorder %s4867_s27, 1  ;;  %s3829_s13 = sshll.u32 %s4867_s27, 6  ;;  %v4542_v3 = vld [vmem:[%s7488_s4 + $0x10] sm:$0xff]  }
   0xf   : > { %4538 = vset.pattern.permute.xlu0 %v4877_v2  ;;  %4539 = vset.pattern.permute.xlu1 %v4877_v2  ;;  %p367_p5 = scmp.lt.s32.totalorder %s3829_s13, 127  ;;  %v4543_v5 = vld [vmem:[%s7488_s4 + $0x18] sm:$0xff]   ;;  %v4544_v10 = vld [vmem:[%s7488_s4 + $0x20] sm:$0xff]   ;;  %v4545_v13 = vld [vmem:[%s7488_s4 + $0x28] sm:$0xff]  }
  0x10   : > { %4271 = vmatprep.subr.bf16.mxu0 %v4540_v0  ;;  %s8031_s27 = smov (!%p353_p4, %s4867_s27), 1  ;;  %v4546_v16 = vld [vmem:[%s7488_s4 + $0x30] sm:$0xff]   ;;  %v4547_v19 = vld [vmem:[%s7488_s4 + $0x38] sm:$0xff]   ;;  %v4574_v42 = vld [vmem:[%s7487_s3] sm:$0xff]  }
  0x11   : > { %4272 = vmatpush3.bf16.msra.mxu0 %v4540_v0  ;;  %s4021_s16 = sshll.u32 %s8031_s27, 9  ;;  %s8033_s13 = smov (!%p367_p5, %s3829_s13), 127  ;;  %v4575_v43 = vld [vmem:[%s7487_s3 + $0x8] sm:$0xff]   ;;  %v4578_v47 = vld [vmem:[%s7487_s3 + $0x10] sm:$0xff]   ;;  %v4579_v49 = vld [vmem:[%s7487_s3 + $0x18] sm:$0xff]  }
  0x12   : > { %4273 = vmatprep.subr.bf16.mxu0 %v4541_v1  ;;  %s4957_s19 = scalar_lea.vmem %s7484_s0, %s4021_s16  ;;  %s3830_s22 = sshll.u32 %s8033_s13, 2  ;;  %v4582_v54 = vld [vmem:[%s7487_s3 + $0x20] sm:$0xff]   ;;  %v4583_v59 = vld [vmem:[%s7487_s3 + $0x28] sm:$0xff]   ;;  %v4586_v62 = vld [vmem:[%s7487_s3 + $0x30] sm:$0xff]  }
  0x13   : > { %v2431_v4 = vld [vmem:[%s4957_s19] sm:$0xff]  ;;  %v2433_v6 = vld [vmem:[%s4957_s19 + $0x10] sm:$0xff]  ;;  %v2432_v7 = vld [vmem:[%s4957_s19 + $0x8] sm:$0xff]  ;;  %s4968_s25 = scalar_lea.vmem %s7486_s2, %s3830_s22  ;;  %s3828_s21 = sshll.u32 %s8031_s27, 2 }
  0x14   : > { %2498 = vperm.xlu0 %4538, %v2431_v4   ;;  %2504 = vperm.xlu1 %4539, %v2433_v6   ;;  %v2434_v8 = vld [vmem:[%s4957_s19 + $0x18] sm:$0xff]  ;;  %v4548_v9 = vld [vmem:[%s4968_s25] sm:$0xff]   ;;  %v2436_v12 = vld [vmem:[%s4957_s19 + $0x28] sm:$0xff]  ;;  %s363_s23 = scalar_lea.vmem %s7485_s1, %s3828_s21  ;;  %s4022_s24 = sshll.u32 %s8031_s27, 7 }
  0x15   : > { %4274 = vmatpush3.bf16.msra.mxu0 %v4541_v1  ;;  %4287 = vmatprep.mubr.bf16.mxu0 %v4548_v9  ;;  %v2435_v11 = vld [vmem:[%s4957_s19 + $0x20] sm:$0xff]  ;;  %v2437_v14 = vld [vmem:[%s4957_s19 + $0x30] sm:$0xff]  ;;  %v2438_v15 = vld [vmem:[%s4957_s19 + $0x38] sm:$0xff]  ;;  %s7447_s10 = scalar_lea.vmem %s7492_s8, %s4022_s24 }
  0x16   : > { %4275 = vmatprep.subr.bf16.mxu0 %v4542_v3  ;;  %v2439_v17 = vld [vmem:[%s4957_s19 + $0x40] sm:$0xff]  ;;  %v2440_v18 = vld [vmem:[%s4957_s19 + $0x48] sm:$0xff]  ;;  %v2441_v20 = vld [vmem:[%s4957_s19 + $0x50] sm:$0xff] }
  0x17   : > { %v2442_v21 = vld [vmem:[%s4957_s19 + $0x58] sm:$0xff]  ;;  %v2443_v22 = vld [vmem:[%s4957_s19 + $0x60] sm:$0xff]  ;;  %v4549_v23 = vld [vmem:[%s4968_s25 + $0x8] sm:$0xff]  }
  0x18   : > { %2501 = vperm.xlu0 %4538, %v2432_v7   ;;  %2507 = vperm.xlu1 %4539, %v2434_v8   ;;  %v2444_v24 = vld [vmem:[%s4957_s19 + $0x68] sm:$0xff]  ;;  %v4550_v25 = vld [vmem:[%s4968_s25 + $0x10] sm:$0xff]   ;;  %v2446_v27 = vld [vmem:[%s4957_s19 + $0x78] sm:$0xff] }
  0x19   : > { %4276 = vmatpush3.bf16.msra.mxu0 %v4542_v3  ;;  %v2445_v26 = vld [vmem:[%s4957_s19 + $0x70] sm:$0xff]  ;;  %v2447_v28 = vld [vmem:[%s4957_s19 + $0x80] sm:$0xff]  ;;  %v4551_v29 = vld [vmem:[%s4968_s25 + $0x18] sm:$0xff]  }
  0x1a   : > { %4277 = vmatprep.subr.bf16.mxu0 %v4543_v5  ;;  %v2448_v30 = vld [vmem:[%s4957_s19 + $0x88] sm:$0xff]  ;;  %v4552_v31 = vld [vmem:[%s4968_s25 + $0x20] sm:$0xff]   ;;  %v2449_v32 = vld [vmem:[%s4957_s19 + $0x90] sm:$0xff] }
  0x1b   : > { %v2450_v33 = vld [vmem:[%s4957_s19 + $0x98] sm:$0xff]  ;;  %v4553_v34 = vld [vmem:[%s4968_s25 + $0x28] sm:$0xff]   ;;  %v2451_v35 = vld [vmem:[%s4957_s19 + $0xa0] sm:$0xff] }
  0x1c   : > { %2510 = vperm.xlu0 %4538, %v2435_v11   ;;  %2513 = vperm.xlu1 %4539, %v2436_v12   ;;  %v2452_v36 = vld [vmem:[%s4957_s19 + $0xa8] sm:$0xff]  ;;  %v4554_v37 = vld [vmem:[%s4968_s25 + $0x30] sm:$0xff]   ;;  %v2454_v39 = vld [vmem:[%s4957_s19 + $0xb8] sm:$0xff] }
  0x1d   : > { %4278 = vmatpush3.bf16.msra.mxu0 %v4543_v5  ;;  %v2453_v38 = vld [vmem:[%s4957_s19 + $0xb0] sm:$0xff]  ;;  %v4555_v40 = vld [vmem:[%s4968_s25 + $0x38] sm:$0xff]   ;;  %v2455_v41 = vld [vmem:[%s4957_s19 + $0xc0] sm:$0xff] }
  0x1e   : > { %4279 = vmatprep.subr.bf16.mxu0 %v4544_v10  ;;  %v2456_v44 = vld [vmem:[%s4957_s19 + $0xc8] sm:$0xff]  ;;  %v4556_v45 = vld [vmem:[%s4968_s25 + $0x40] sm:$0xff]   ;;  %v2457_v46 = vld [vmem:[%s4957_s19 + $0xd0] sm:$0xff] }
  0x1f   : > { %v2458_v48 = vld [vmem:[%s4957_s19 + $0xd8] sm:$0xff]  ;;  %v4557_v50 = vld [vmem:[%s4968_s25 + $0x48] sm:$0xff]   ;;  %v2459_v51 = vld [vmem:[%s4957_s19 + $0xe0] sm:$0xff] }
  0x20   : > { %2516 = vperm.xlu0 %4538, %v2437_v14   ;;  %2519 = vperm.xlu1 %4539, %v2438_v15   ;;  %v2460_v52 = vld [vmem:[%s4957_s19 + $0xe8] sm:$0xff]  ;;  %v4558_v53 = vld [vmem:[%s4968_s25 + $0x50] sm:$0xff]   ;;  %v2462_v56 = vld [vmem:[%s4957_s19 + $0xf8] sm:$0xff] }
  0x21   : > { %4280 = vmatpush3.bf16.msra.mxu0 %v4544_v10  ;;  %v2461_v55 = vld [vmem:[%s4957_s19 + $0xf0] sm:$0xff]  ;;  %v4559_v57 = vld [vmem:[%s4968_s25 + $0x58] sm:$0xff]   ;;  %v2464_v58 = vld [vmem:[%s4957_s19 + $0x108] sm:$0xff] }
  0x22   : > { %4281 = vmatprep.subr.bf16.mxu0 %v4545_v13  ;;  %v4560_v60 = vld [vmem:[%s4968_s25 + $0x60] sm:$0xff]   ;;  %v2465_v63 = vld [vmem:[%s4957_s19 + $0x110] sm:$0xff]  ;;  %v2466_v0 = vld [vmem:[%s4957_s19 + $0x118] sm:$0xff] }
  0x23   : > { %v2463_v61 = vld [vmem:[%s4957_s19 + $0x100] sm:$0xff]  ;;  %v4587_v1 = vld [vmem:[%s7487_s3 + $0x38] sm:$0xff]   ;;  %v4561_v3 = vld [vmem:[%s4968_s25 + $0x68] sm:$0xff]  }
  0x24   : > { %2522 = vperm.xlu0 %4538, %v2439_v17   ;;  %2525 = vperm.xlu1 %4539, %v2440_v18   ;;  %v2467_v2 = vld [vmem:[%s4957_s19 + $0x120] sm:$0xff]  ;;  %v2468_v4 = vld [vmem:[%s4957_s19 + $0x128] sm:$0xff]  ;;  %v4562_v5 = vld [vmem:[%s4968_s25 + $0x70] sm:$0xff]  }
  0x25   : > { %4282 = vmatpush3.bf16.msra.mxu0 %v4545_v13  ;;  %v2469_v6 = vld [vmem:[%s4957_s19 + $0x130] sm:$0xff]  ;;  %v2470_v7 = vld [vmem:[%s4957_s19 + $0x138] sm:$0xff]  ;;  %v2471_v8 = vld [vmem:[%s4957_s19 + $0x140] sm:$0xff] }
  0x26   : > { %4283 = vmatprep.subr.bf16.mxu0 %v4546_v16  ;;  %v4563_v9 = vld [vmem:[%s4968_s25 + $0x78] sm:$0xff]   ;;  %v2472_v10 = vld [vmem:[%s4957_s19 + $0x148] sm:$0xff]  ;;  %v4564_v11 = vld [vmem:[%s4968_s25 + $0x80] sm:$0xff]  }
  0x27   : > { %v2473_v12 = vld [vmem:[%s4957_s19 + $0x150] sm:$0xff]  ;;  %v2474_v13 = vld [vmem:[%s4957_s19 + $0x158] sm:$0xff]  ;;  %v2475_v14 = vld [vmem:[%s4957_s19 + $0x160] sm:$0xff] }
  0x28   : > { %2528 = vperm.xlu0 %4538, %v2441_v20   ;;  %2531 = vperm.xlu1 %4539, %v2442_v21   ;;  %v4565_v15 = vld [vmem:[%s4968_s25 + $0x88] sm:$0xff]   ;;  %v4566_v17 = vld [vmem:[%s4968_s25 + $0x90] sm:$0xff]   ;;  %v2479_v20 = vld [vmem:[%s4957_s19 + $0x180] sm:$0xff] }
  0x29   : > { %4284 = vmatpush3.bf16.msra.mxu0 %v4546_v16  ;;  %v2476_v16 = vld [vmem:[%s4957_s19 + $0x168] sm:$0xff]  ;;  %v2477_v18 = vld [vmem:[%s4957_s19 + $0x170] sm:$0xff]  ;;  %v4567_v21 = vld [vmem:[%s4968_s25 + $0x98] sm:$0xff]  }
  0x2a   : > { %4285 = vmatprep.subr.bf16.mxu0 %v4547_v19 }
  0x2c   : > { %2534 = vperm.xlu0 %4538, %v2443_v22   ;;  %2537 = vperm.xlu1 %4539, %v2444_v24   ;;  %v2480_v22 = vld [vmem:[%s4957_s19 + $0x188] sm:$0xff]  ;;  %v2481_v24 = vld [vmem:[%s4957_s19 + $0x190] sm:$0xff] }
  0x2d   : > { %4286 = vmatpush3.bf16.msra.mxu0 %v4547_v19  ;;  %v2478_v19 = vld [vmem:[%s4957_s19 + $0x178] sm:$0xff] }
  0x2e   : > { %4431 = vmatprep.subr.bf16.mxu0 %v4574_v42 }
  0x30   : > { %4288 = vmatmul.mubr.bf16.vlgmr.msra.gmra.mrb[0].mxu0 %v4549_v23  ;;  %2540 = vperm.xlu0 %4538, %v2445_v26   ;;  %v4568_v23 = vld [vmem:[%s4968_s25 + $0xa0] sm:$0xff]  }
  0x31   : > { %4291 = vmatprep.mubr.bf16.mxu0 %v4550_v25  ;;  %2543 = vperm.xlu1 %4539, %v2446_v27   ;;  %v2482_v25 = vld [vmem:[%s4957_s19 + $0x198] sm:$0xff]  ;;  %v2483_v26 = vld [vmem:[%s4957_s19 + $0x1a0] sm:$0xff]  ;;  %v4569_v27 = vld [vmem:[%s4968_s25 + $0xa8] sm:$0xff]  }
  0x32   : > { %4432 = vmatpush3.bf16.msra.mxu0 %v4574_v42  ;;  %v4588_v42 = vld [vmem:[%s7490_s6] sm:$0xff]  }
  0x33   : > { %4433 = vmatprep.subr.bf16.mxu0 %v4575_v43  ;;  %4351 = vmatprep.subr.bf16.mxu1 %v4588_v42 }
  0x34   : > { %2546 = vperm.xlu0 %4538, %v2447_v28   ;;  %v2484_v28 = vld [vmem:[%s4957_s19 + $0x1a8] sm:$0xff]  ;;  %4352 = vmatpush3.bf16.msra.mxu1 %v4588_v42 }
  0x35   : > { %2549 = vperm.xlu1 %4539, %v2448_v30   ;;  %v2485_v30 = vld [vmem:[%s4957_s19 + $0x1b0] sm:$0xff] }
  0x36   : > { %4434 = vmatpush3.bf16.msra.mxu0 %v4575_v43  ;;  %v2493_v43 = vld [vmem:[%s4957_s19 + $0x1f0] sm:$0xff] }
  0x37   : > { %4435 = vmatprep.subr.bf16.mxu0 %v4578_v47 }
  0x38   : > { %4292 = vmatmul.mubr.bf16.gmra.mrb[4].mxu0 %v4551_v29  ;;  %2552 = vperm.xlu0 %4538, %v2449_v32   ;;  %v4570_v29 = vld [vmem:[%s4968_s25 + $0xb0] sm:$0xff]   ;;  %v2487_v32 = vld [vmem:[%s4957_s19 + $0x1c0] sm:$0xff] }
  0x39   : > { %4295 = vmatprep.mubr.bf16.mxu0 %v4552_v31  ;;  %2555 = vperm.xlu1 %4539, %v2450_v33   ;;  %v2486_v31 = vld [vmem:[%s4957_s19 + $0x1b8] sm:$0xff] }
  0x3a   : > { %4436 = vmatpush3.bf16.msra.mxu0 %v4578_v47  ;;  %v4571_v33 = vld [vmem:[%s4968_s25 + $0xb8] sm:$0xff]   ;;  %v4580_v47 = vld [vmem:[%s4968_s25 + $0xe0] sm:$0xff]  }
  0x3b   : > { %4437 = vmatprep.subr.bf16.mxu0 %v4579_v49 }
  0x3c   : > { %2558 = vperm.xlu0 %4538, %v2451_v35   ;;  %v4572_v35 = vld [vmem:[%s4968_s25 + $0xc0] sm:$0xff]  }
  0x3d   : > { %2561 = vperm.xlu1 %4539, %v2452_v36   ;;  %v2489_v36 = vld [vmem:[%s4957_s19 + $0x1d0] sm:$0xff] }
  0x3e   : > { %4438 = vmatpush3.bf16.msra.mxu0 %v4579_v49 }
  0x3f   : > { %4439 = vmatprep.subr.bf16.mxu0 %v4582_v54 }
  0x40   : > { %4296 = vmatmul.mubr.bf16.gmra.mrb[8].mxu0 %v4553_v34  ;;  %2564 = vperm.xlu0 %4538, %v2453_v38   ;;  %v2488_v34 = vld [vmem:[%s4957_s19 + $0x1c8] sm:$0xff]  ;;  %v2491_v38 = vld [vmem:[%s4957_s19 + $0x1e0] sm:$0xff] }
  0x41   : > { %4299 = vmatprep.mubr.bf16.mxu0 %v4554_v37  ;;  %2567 = vperm.xlu1 %4539, %v2454_v39   ;;  %v2490_v37 = vld [vmem:[%s4957_s19 + $0x1d8] sm:$0xff]  ;;  %v4573_v39 = vld [vmem:[%s4968_s25 + $0xc8] sm:$0xff]  }
  0x42   : > { %4440 = vmatpush3.bf16.msra.mxu0 %v4582_v54  ;;  %v7495_v54 = vlaneseq }
  0x43   : > { %4441 = vmatprep.subr.bf16.mxu0 %v4583_v59 }
  0x44   : > { %2570 = vperm.xlu0 %4538, %v2455_v41   ;;  %v4576_v41 = vld [vmem:[%s4968_s25 + $0xd0] sm:$0xff]  }
  0x45   : > { %2573 = vperm.xlu1 %4539, %v2456_v44   ;;  %v2494_v44 = vld [vmem:[%s4957_s19 + $0x1f8] sm:$0xff] }
  0x46   : > { %4442 = vmatpush3.bf16.msra.mxu0 %v4583_v59  ;;  %v4592_v59 = vld [vmem:[%s7490_s6 + $0x20] sm:$0xff]  }
  0x47   : > { %4443 = vmatprep.subr.bf16.mxu0 %v4586_v62 }
  0x48   : > { %4300 = vmatmul.mubr.bf16.gmra.mrb[12].mxu0 %v4555_v40  ;;  %2576 = vperm.xlu0 %4538, %v2457_v46   ;;  %v2492_v40 = vld [vmem:[%s4957_s19 + $0x1e8] sm:$0xff]  ;;  %v4577_v46 = vld [vmem:[%s4968_s25 + $0xd8] sm:$0xff]  }
  0x49   : > { %4303 = vmatprep.mubr.bf16.mxu0 %v4556_v45  ;;  %2579 = vperm.xlu1 %4539, %v2458_v48   ;;  %v4589_v45 = vld [vmem:[%s7490_s6 + $0x8] sm:$0xff]  }
  0x4a   : > { %4444 = vmatpush3.bf16.msra.mxu0 %v4586_v62  ;;  %4353 = vmatprep.subr.bf16.mxu1 %v4589_v45 }
  0x4b   : > { %4445 = vmatprep.subr.bf16.mxu0 %v4587_v1  ;;  %4354 = vmatpush3.bf16.msra.mxu1 %v4589_v45 }
  0x4c   : > { %2582 = vperm.xlu0 %4538, %v2459_v51  }
  0x4d   : > { %2585 = vperm.xlu1 %4539, %v2460_v52  }
  0x4e   : > { %4446 = vmatpush3.bf16.msra.mxu0 %v4587_v1 }
  0x50   : > { %4304 = vmatmul.mubr.bf16.gmra.mrb[16].mxu0 %v4557_v50  ;;  %2588 = vperm.xlu0 %4538, %v2461_v55   ;;  %v4590_v50 = vld [vmem:[%s7490_s6 + $0x10] sm:$0xff]   ;;  %v4581_v55 = vld [vmem:[%s4968_s25 + $0xe8] sm:$0xff]  }
  0x51   : > { %4307 = vmatprep.mubr.bf16.mxu0 %v4558_v53  ;;  %2591 = vperm.xlu1 %4539, %v2462_v56   ;;  %v4591_v53 = vld [vmem:[%s7490_s6 + $0x18] sm:$0xff]   ;;  %v4584_v56 = vld [vmem:[%s4968_s25 + $0xf0] sm:$0xff]  }
  0x52   : > { %4355 = vmatprep.subr.bf16.mxu1 %v4590_v50 }
  0x53   : > { %4356 = vmatpush3.bf16.msra.mxu1 %v4590_v50  ;;  %v5198_v50 = vld [vmem:[%s7489_s5] ss:$0 sm:$0xff] }
  0x54   : > { %2594 = vperm.xlu0 %4538, %v2463_v61   ;;  %4357 = vmatprep.subr.bf16.mxu1 %v4591_v53 }
  0x55   : > { %2597 = vperm.xlu1 %4539, %v2464_v58  }
  0x57   : > { %4358 = vmatpush3.bf16.msra.mxu1 %v4591_v53 }
  0x58   : > { %4308 = vmatmul.mubr.bf16.gmra.mrb[20].mxu0 %v4559_v57  ;;  %2600 = vperm.xlu0 %4538, %v2465_v63   ;;  %v4593_v63 = vld [vmem:[%s7490_s6 + $0x28] sm:$0xff]  }
  0x59   : > { %4311 = vmatprep.mubr.bf16.mxu0 %v4560_v60  ;;  %2603 = vperm.xlu1 %4539, %v2466_v0   ;;  %v5114_v60 = vand.u32 127, %v7495_v54  ;;  %v4585_v0 = vld [vmem:[%s4968_s25 + $0xf8] sm:$0xff]  }
  0x5a   : > { %4359 = vmatprep.subr.bf16.mxu1 %v4592_v59 }
  0x5b   : > { %4360 = vmatpush3.bf16.msra.mxu1 %v4592_v59 }
  0x5c   : > { %2606 = vperm.xlu0 %4538, %v2467_v2   ;;  %4361 = vmatprep.subr.bf16.mxu1 %v4593_v63 }
  0x5d   : > { %2609 = vperm.xlu1 %4539, %v2468_v4   ;;  %v7493_v4 = vmov 1.0|1.0  }
  0x5f   : > { %4362 = vmatpush3.bf16.msra.mxu1 %v4593_v63 }
  0x60   : > { %4312 = vmatmul.mubr.bf16.gmra.mrb[24].mxu0 %v4561_v3  ;;  %2612 = vperm.xlu0 %4538, %v2469_v6   ;;  %v4594_v3 = vld [vmem:[%s7490_s6 + $0x30] sm:$0xff]  }
  0x61   : > { %4315 = vmatprep.mubr.bf16.mxu0 %v4562_v5  ;;  %2615 = vperm.xlu1 %4539, %v2470_v7   ;;  %v4595_v7 = vld [vmem:[%s7490_s6 + $0x38] sm:$0xff]  }
  0x62   : > { %4363 = vmatprep.subr.bf16.mxu1 %v4594_v3 }
  0x63   : > { %4364 = vmatpush3.bf16.msra.mxu1 %v4594_v3 }
  0x64   : > { %2618 = vperm.xlu0 %4538, %v2471_v8   ;;  %4365 = vmatprep.subr.bf16.mxu1 %v4595_v7 }
  0x65   : > { %2621 = vperm.xlu1 %4539, %v2472_v10  }
  0x67   : > { %4366 = vmatpush3.bf16.msra.mxu1 %v4595_v7 }
  0x68   : > { %4316 = vmatmul.mubr.bf16.gmra.mrb[28].mxu0 %v4563_v9  ;;  %2624 = vperm.xlu0 %4538, %v2473_v12  }
  0x69   : > { %4319 = vmatprep.mubr.bf16.mxu0 %v4564_v11  ;;  %2627 = vperm.xlu1 %4539, %v2474_v13  }
  0x6c   : > { %2630 = vperm.xlu0 %4538, %v2475_v14  }
  0x6d   : > { %2633 = vperm.xlu1 %4539, %v2476_v16  }
  0x70   : > { %4320 = vmatmul.mubr.bf16.gmra.mrb[32].mxu0 %v4565_v15  ;;  %2636 = vperm.xlu0 %4538, %v2477_v18  }
  0x71   : > { %4323 = vmatprep.mubr.bf16.mxu0 %v4566_v17  ;;  %2639 = vperm.xlu1 %4539, %v2478_v19  }
  0x74   : > { %2642 = vperm.xlu0 %4538, %v2479_v20  }
  0x75   : > { %2645 = vperm.xlu1 %4539, %v2480_v22  }
  0x78   : > { %4324 = vmatmul.mubr.bf16.gmra.mrb[36].mxu0 %v4567_v21  ;;  %2648 = vperm.xlu0 %4538, %v2481_v24  }
  0x79   : > { %4327 = vmatprep.mubr.bf16.mxu0 %v4568_v23  ;;  %2651 = vperm.xlu1 %4539, %v2482_v25  }
  0x7c   : > { %2654 = vperm.xlu0 %4538, %v2483_v26  }
  0x7d   : > { %2657 = vperm.xlu1 %4539, %v2484_v28  }
  0x80   : > { %4328 = vmatmul.mubr.bf16.gmra.mrb[40].mxu0 %v4569_v27  ;;  %2660 = vperm.xlu0 %4538, %v2485_v30  }
  0x81   : > { %4331 = vmatprep.mubr.bf16.mxu0 %v4570_v29  ;;  %2663 = vperm.xlu1 %4539, %v2486_v31  }
  0x84   : > { %2666 = vperm.xlu0 %4538, %v2487_v32  }
  0x85   : > { %2669 = vperm.xlu1 %4539, %v2488_v34  }
  0x88   : > { %4332 = vmatmul.mubr.bf16.gmra.mrb[44].mxu0 %v4571_v33  ;;  %2672 = vperm.xlu0 %4538, %v2489_v36  }
  0x89   : > { %4335 = vmatprep.mubr.bf16.mxu0 %v4572_v35  ;;  %2675 = vperm.xlu1 %4539, %v2490_v37  }
  0x8c   : > { %2678 = vperm.xlu0 %4538, %v2491_v38  }
  0x8d   : > { %2681 = vperm.xlu1 %4539, %v2492_v40  }
  0x90   : > { %4336 = vmatmul.mubr.bf16.gmra.mrb[48].mxu0 %v4573_v39  ;;  %2684 = vperm.xlu0 %4538, %v2493_v43  }
  0x91   : > { %4339 = vmatprep.mubr.bf16.mxu0 %v4576_v41  ;;  %2687 = vperm.xlu1 %4539, %v2494_v44  }
  0x93   : > { %v2499_v48 = vpop.permute.xlu0 %2498  ;;  %v2505_v49 = vpop.permute.xlu1 %2504 }
  0x94   : > { %vm2689_vm0 = vcmp.eq.s32.totalorder %v2499_v48, %v5114_v60  ;;  %vm2691_vm3 = vcmp.eq.s32.totalorder %v2505_v49, %v5114_v60 }
  0x97   : > { %v2502_v51 = vpop.permute.xlu0 %2501  ;;  %v2508_v52 = vpop.permute.xlu1 %2507 }
  0x98   : > { %4340 = vmatmul.mubr.bf16.gmra.mrb[52].mxu0 %v4577_v46  ;;  %vm2690_vm1 = vcmp.eq.s32.totalorder %v2502_v51, %v5114_v60  ;;  %vm2692_vm4 = vcmp.eq.s32.totalorder %v2508_v52, %v5114_v60 }
  0x99   : > { %4343 = vmatprep.mubr.bf16.mxu0 %v4580_v47  ;;  %vm3891_vm2 = vmpackc.low %vm2690_vm1, %vm2689_vm0 }
  0x9a   : > { %vm3893_vm7 = vmpackc.low %vm2692_vm4, %vm2691_vm3 }
  0x9b   : > { %v2511_v57 = vpop.permute.xlu0 %2510  ;;  %v2514_v58 = vpop.permute.xlu1 %2513 }
  0x9c   : > { %vm2694_vm5 = vcmp.eq.s32.totalorder %v2514_v58, %v5114_v60  ;;  %vm2693_vm6 = vcmp.eq.s32.totalorder %v2511_v57, %v5114_v60 }
  0x9d   : > { %vm3895_vm8 = vmpackc.low %vm2694_vm5, %vm2693_vm6 }
  0x9f   : > { %v2517_v61 = vpop.permute.xlu0 %2516  ;;  %v2520_v62 = vpop.permute.xlu1 %2519 }
  0xa0   : > { %4344 = vmatmul.mubr.bf16.gmra.mrb[56].mxu0 %v4581_v55  ;;  %vm2696_vm9 = vcmp.eq.s32.totalorder %v2520_v62, %v5114_v60  ;;  %vm2695_vm10 = vcmp.eq.s32.totalorder %v2517_v61, %v5114_v60 }
  0xa1   : > { %4347 = vmatprep.mubr.bf16.mxu0 %v4584_v56  ;;  %vm3897_vm13 = vmpackc.low %vm2696_vm9, %vm2695_vm10 }
  0xa3   : > { %v2523_v1 = vpop.permute.xlu0 %2522  ;;  %v2526_v2 = vpop.permute.xlu1 %2525 }
  0xa4   : > { %vm2698_vm11 = vcmp.eq.s32.totalorder %v2526_v2, %v5114_v60  ;;  %vm2697_vm12 = vcmp.eq.s32.totalorder %v2523_v1, %v5114_v60 }
  0xa5   : > { %vm3899_vm14 = vmpackc.low %vm2698_vm11, %vm2697_vm12 }
  0xa7   : > { %v2529_v5 = vpop.permute.xlu0 %2528  ;;  %v2532_v6 = vpop.permute.xlu1 %2531 }
  0xa8   : > { %4348 = vmatmul.mubr.bf16.gmra.mrb[60].mxu0 %v4585_v0  ;;  %vm2700_vm15 = vcmp.eq.s32.totalorder %v2532_v6, %v5114_v60  ;;  %vm2699_vm0 = vcmp.eq.s32.totalorder %v2529_v5, %v5114_v60 }
  0xa9   : > { %4447 = vmatprep.mubr.msk.bf16.mxu0 %vm3891_vm2, %v7493_v4  ;;  %vm3901_vm3 = vmpackc.low %vm2700_vm15, %vm2699_vm0 }
  0xab   : > { %v2535_v8 = vpop.permute.xlu0 %2534  ;;  %v2538_v9 = vpop.permute.xlu1 %2537 }
  0xac   : > { %vm2702_vm1 = vcmp.eq.s32.totalorder %v2538_v9, %v5114_v60  ;;  %vm2701_vm2 = vcmp.eq.s32.totalorder %v2535_v8, %v5114_v60 }
  0xad   : > { %vm3903_vm4 = vmpackc.low %vm2702_vm1, %vm2701_vm2 }
  0xaf   : > { %v2541_v10 = vpop.permute.xlu0 %2540 }
  0xb0   : > { %4448 = vmatmul.mubr.msk.bf16.vlgmr.msra.gmra.mrb[64].mxu0 %vm3893_vm7, %v7493_v4  ;;  %v2544_v11 = vpop.permute.xlu1 %2543  ;;  %vm2703_vm6 = vcmp.eq.s32.totalorder %v2541_v10, %v5114_v60 }
  0xb1   : > { %4451 = vmatprep.mubr.msk.bf16.mxu0 %vm3895_vm8, %v7493_v4  ;;  %vm2704_vm5 = vcmp.eq.s32.totalorder %v2544_v11, %v5114_v60 }
  0xb2   : > { %vm3905_vm9 = vmpackc.low %vm2704_vm5, %vm2703_vm6 }
  0xb3   : > { %v2547_v12 = vpop.permute.xlu0 %2546 }
  0xb4   : > { %v2550_v13 = vpop.permute.xlu1 %2549  ;;  %vm2705_vm8 = vcmp.eq.s32.totalorder %v2547_v12, %v5114_v60 }
  0xb5   : > { %vm2706_vm7 = vcmp.eq.s32.totalorder %v2550_v13, %v5114_v60 }
  0xb6   : > { %vm3907_vm10 = vmpackc.low %vm2706_vm7, %vm2705_vm8 }
  0xb7   : > { %v2553_v14 = vpop.permute.xlu0 %2552 }
  0xb8   : > { %4452 = vmatmul.mubr.msk.bf16.gmra.mrb[68].mxu0 %vm3897_vm13, %v7493_v4  ;;  %v2556_v15 = vpop.permute.xlu1 %2555  ;;  %vm2707_vm12 = vcmp.eq.s32.totalorder %v2553_v14, %v5114_v60 }
  0xb9   : > { %4455 = vmatprep.mubr.msk.bf16.mxu0 %vm3899_vm14, %v7493_v4  ;;  %vm2708_vm11 = vcmp.eq.s32.totalorder %v2556_v15, %v5114_v60 }
  0xba   : > { %vm3909_vm15 = vmpackc.low %vm2708_vm11, %vm2707_vm12 }
  0xbb   : > { %v2559_v16 = vpop.permute.xlu0 %2558 }
  0xbc   : > { %v2562_v17 = vpop.permute.xlu1 %2561  ;;  %vm2709_vm14 = vcmp.eq.s32.totalorder %v2559_v16, %v5114_v60 }
  0xbd   : > { %vm2710_vm13 = vcmp.eq.s32.totalorder %v2562_v17, %v5114_v60 }
  0xbe   : > { %vm3911_vm0 = vmpackc.low %vm2710_vm13, %vm2709_vm14 }
  0xbf   : > { %v2565_v18 = vpop.permute.xlu0 %2564 }
  0xc0   : > { %4456 = vmatmul.mubr.msk.bf16.gmra.mrb[72].mxu0 %vm3901_vm3, %v7493_v4  ;;  %v2568_v19 = vpop.permute.xlu1 %2567  ;;  %vm2711_vm2 = vcmp.eq.s32.totalorder %v2565_v18, %v5114_v60 }
  0xc1   : > { %4459 = vmatprep.mubr.msk.bf16.mxu0 %vm3903_vm4, %v7493_v4  ;;  %vm2712_vm1 = vcmp.eq.s32.totalorder %v2568_v19, %v5114_v60 }
  0xc2   : > { %vm3913_vm5 = vmpackc.low %vm2712_vm1, %vm2711_vm2 }
  0xc3   : > { %v2571_v20 = vpop.permute.xlu0 %2570 }
  0xc4   : > { %v2574_v21 = vpop.permute.xlu1 %2573  ;;  %vm2713_vm4 = vcmp.eq.s32.totalorder %v2571_v20, %v5114_v60 }
  0xc5   : > { %vm2714_vm3 = vcmp.eq.s32.totalorder %v2574_v21, %v5114_v60 }
  0xc6   : > { %vm3915_vm6 = vmpackc.low %vm2714_vm3, %vm2713_vm4 }
  0xc7   : > { %v2577_v22 = vpop.permute.xlu0 %2576 }
  0xc8   : > { %4460 = vmatmul.mubr.msk.bf16.gmra.mrb[76].mxu0 %vm3905_vm9, %v7493_v4  ;;  %v2580_v23 = vpop.permute.xlu1 %2579  ;;  %vm2715_vm8 = vcmp.eq.s32.totalorder %v2577_v22, %v5114_v60 }
  0xc9   : > { %4463 = vmatprep.mubr.msk.bf16.mxu0 %vm3907_vm10, %v7493_v4  ;;  %vm2716_vm7 = vcmp.eq.s32.totalorder %v2580_v23, %v5114_v60 }
  0xca   : > { %vm3917_vm11 = vmpackc.low %vm2716_vm7, %vm2715_vm8 }
  0xcb   : > { %v2583_v24 = vpop.permute.xlu0 %2582 }
  0xcc   : > { %v2586_v25 = vpop.permute.xlu1 %2585  ;;  %vm2717_vm10 = vcmp.eq.s32.totalorder %v2583_v24, %v5114_v60 }
  0xcd   : > { %vm2718_vm9 = vcmp.eq.s32.totalorder %v2586_v25, %v5114_v60 }
  0xce   : > { %vm3919_vm12 = vmpackc.low %vm2718_vm9, %vm2717_vm10 }
  0xcf   : > { %v2589_v26 = vpop.permute.xlu0 %2588 }
  0xd0   : > { %4464 = vmatmul.mubr.msk.bf16.gmra.mrb[80].mxu0 %vm3909_vm15, %v7493_v4  ;;  %v2592_v27 = vpop.permute.xlu1 %2591  ;;  %vm2719_vm14 = vcmp.eq.s32.totalorder %v2589_v26, %v5114_v60 }
  0xd1   : > { %4467 = vmatprep.mubr.msk.bf16.mxu0 %vm3911_vm0, %v7493_v4  ;;  %vm2720_vm13 = vcmp.eq.s32.totalorder %v2592_v27, %v5114_v60 }
  0xd2   : > { %vm3921_vm1 = vmpackc.low %vm2720_vm13, %vm2719_vm14 }
  0xd3   : > { %v2595_v28 = vpop.permute.xlu0 %2594 }
  0xd4   : > { %v2598_v29 = vpop.permute.xlu1 %2597  ;;  %vm2721_vm0 = vcmp.eq.s32.totalorder %v2595_v28, %v5114_v60 }
  0xd5   : > { %vm2722_vm15 = vcmp.eq.s32.totalorder %v2598_v29, %v5114_v60 }
  0xd6   : > { %vm3923_vm2 = vmpackc.low %vm2722_vm15, %vm2721_vm0 }
  0xd7   : > { %v2601_v30 = vpop.permute.xlu0 %2600 }
  0xd8   : > { %4468 = vmatmul.mubr.msk.bf16.gmra.mrb[84].mxu0 %vm3913_vm5, %v7493_v4  ;;  %v2604_v31 = vpop.permute.xlu1 %2603  ;;  %vm2723_vm4 = vcmp.eq.s32.totalorder %v2601_v30, %v5114_v60 }
  0xd9   : > { %4471 = vmatprep.mubr.msk.bf16.mxu0 %vm3915_vm6, %v7493_v4  ;;  %vm2724_vm3 = vcmp.eq.s32.totalorder %v2604_v31, %v5114_v60 }
  0xda   : > { %vm3925_vm7 = vmpackc.low %vm2724_vm3, %vm2723_vm4 }
  0xdb   : > { %v2607_v32 = vpop.permute.xlu0 %2606 }
  0xdc   : > { %v2610_v33 = vpop.permute.xlu1 %2609  ;;  %vm2725_vm6 = vcmp.eq.s32.totalorder %v2607_v32, %v5114_v60 }
  0xdd   : > { %vm2726_vm5 = vcmp.eq.s32.totalorder %v2610_v33, %v5114_v60 }
  0xde   : > { %vm3927_vm8 = vmpackc.low %vm2726_vm5, %vm2725_vm6 }
  0xdf   : > { %v2613_v34 = vpop.permute.xlu0 %2612 }
  0xe0   : > { %4472 = vmatmul.mubr.msk.bf16.gmra.mrb[88].mxu0 %vm3917_vm11, %v7493_v4  ;;  %v2616_v35 = vpop.permute.xlu1 %2615  ;;  %vm2727_vm10 = vcmp.eq.s32.totalorder %v2613_v34, %v5114_v60 }
  0xe1   : > { %4475 = vmatprep.mubr.msk.bf16.mxu0 %vm3919_vm12, %v7493_v4  ;;  %vm2728_vm9 = vcmp.eq.s32.totalorder %v2616_v35, %v5114_v60 }
  0xe2   : > { %vm3929_vm13 = vmpackc.low %vm2728_vm9, %vm2727_vm10 }
  0xe3   : > { %v2619_v36 = vpop.permute.xlu0 %2618 }
  0xe4   : > { %v2622_v37 = vpop.permute.xlu1 %2621  ;;  %vm2729_vm12 = vcmp.eq.s32.totalorder %v2619_v36, %v5114_v60 }
  0xe5   : > { %vm2730_vm11 = vcmp.eq.s32.totalorder %v2622_v37, %v5114_v60 }
  0xe6   : > { %vm3931_vm14 = vmpackc.low %vm2730_vm11, %vm2729_vm12 }
  0xe7   : > { %v2625_v38 = vpop.permute.xlu0 %2624 }
  0xe8   : > { %4476 = vmatmul.mubr.msk.bf16.gmra.mrb[92].mxu0 %vm3921_vm1, %v7493_v4  ;;  %v2628_v39 = vpop.permute.xlu1 %2627  ;;  %vm2731_vm0 = vcmp.eq.s32.totalorder %v2625_v38, %v5114_v60 }
  0xe9   : > { %4479 = vmatprep.mubr.msk.bf16.mxu0 %vm3923_vm2, %v7493_v4  ;;  %vm2732_vm15 = vcmp.eq.s32.totalorder %v2628_v39, %v5114_v60 }
  0xea   : > { %vm3933_vm3 = vmpackc.low %vm2732_vm15, %vm2731_vm0 }
  0xeb   : > { %v2631_v40 = vpop.permute.xlu0 %2630 }
  0xec   : > { %v2634_v41 = vpop.permute.xlu1 %2633  ;;  %vm2733_vm2 = vcmp.eq.s32.totalorder %v2631_v40, %v5114_v60 }
  0xed   : > { %vm2734_vm1 = vcmp.eq.s32.totalorder %v2634_v41, %v5114_v60 }
  0xee   : > { %vm3935_vm4 = vmpackc.low %vm2734_vm1, %vm2733_vm2 }
  0xef   : > { %v2637_v42 = vpop.permute.xlu0 %2636 }
  0xf0   : > { %4480 = vmatmul.mubr.msk.bf16.gmra.mrb[96].mxu0 %vm3925_vm7, %v7493_v4  ;;  %v2640_v43 = vpop.permute.xlu1 %2639  ;;  %vm2735_vm6 = vcmp.eq.s32.totalorder %v2637_v42, %v5114_v60 }
  0xf1   : > { %4483 = vmatprep.mubr.msk.bf16.mxu0 %vm3927_vm8, %v7493_v4  ;;  %vm2736_vm5 = vcmp.eq.s32.totalorder %v2640_v43, %v5114_v60 }
  0xf2   : > { %vm3937_vm9 = vmpackc.low %vm2736_vm5, %vm2735_vm6 }
  0xf3   : > { %v2643_v44 = vpop.permute.xlu0 %2642 }
  0xf4   : > { %v2646_v45 = vpop.permute.xlu1 %2645  ;;  %vm2737_vm8 = vcmp.eq.s32.totalorder %v2643_v44, %v5114_v60 }
  0xf5   : > { %vm2738_vm7 = vcmp.eq.s32.totalorder %v2646_v45, %v5114_v60 }
  0xf6   : > { %vm3939_vm10 = vmpackc.low %vm2738_vm7, %vm2737_vm8 }
  0xf7   : > { %v2649_v46 = vpop.permute.xlu0 %2648 }
  0xf8   : > { %4484 = vmatmul.mubr.msk.bf16.gmra.mrb[100].mxu0 %vm3929_vm13, %v7493_v4  ;;  %v2652_v47 = vpop.permute.xlu1 %2651  ;;  %vm2739_vm12 = vcmp.eq.s32.totalorder %v2649_v46, %v5114_v60 }
  0xf9   : > { %4487 = vmatprep.mubr.msk.bf16.mxu0 %vm3931_vm14, %v7493_v4  ;;  %vm2740_vm11 = vcmp.eq.s32.totalorder %v2652_v47, %v5114_v60 }
  0xfa   : > { %vm3941_vm15 = vmpackc.low %vm2740_vm11, %vm2739_vm12 }
  0xfb   : > { %v2655_v48 = vpop.permute.xlu0 %2654 }
  0xfc   : > { %v2658_v49 = vpop.permute.xlu1 %2657  ;;  %vm2741_vm14 = vcmp.eq.s32.totalorder %v2655_v48, %v5114_v60 }
  0xfd   : > { %vm2742_vm13 = vcmp.eq.s32.totalorder %v2658_v49, %v5114_v60 }
  0xfe   : > { %vm3943_vm0 = vmpackc.low %vm2742_vm13, %vm2741_vm14 }
  0xff   : > { %v2661_v57 = vpop.permute.xlu0 %2660 }
 0x100   : > { %4488 = vmatmul.mubr.msk.bf16.gmra.mrb[104].mxu0 %vm3933_vm3, %v7493_v4  ;;  %v2664_v61 = vpop.permute.xlu1 %2663  ;;  %vm2743_vm2 = vcmp.eq.s32.totalorder %v2661_v57, %v5114_v60 }
 0x101   : > { %4491 = vmatprep.mubr.msk.bf16.mxu0 %vm3935_vm4, %v7493_v4  ;;  %vm2744_vm1 = vcmp.eq.s32.totalorder %v2664_v61, %v5114_v60 }
 0x102   : > { %vm3945_vm5 = vmpackc.low %vm2744_vm1, %vm2743_vm2 }
 0x103   : > { %v4289_v51 = vpop.f32.mrb[0].mxu0  ;;  %v2667_v6 = vpop.permute.xlu0 %2666 }
 0x104   : > { %v760_v52 = vpop.f32.mrb[1].mxu0  ;;  %v5225_v3 = vadd.f32 %v4289_v51, %v5198_v50  ;;  %v2670_v8 = vpop.permute.xlu1 %2669  ;;  %vm2745_vm4 = vcmp.eq.s32.totalorder %v2667_v6, %v5114_v60 }
 0x105   : > { %v5205_v53 = vadd.f32 %v5198_v50, %v760_v52  ;;  %v4290_v55 = vpop.f32.mrb[2].mxu0  ;;  %vm2746_vm3 = vcmp.eq.s32.totalorder %v2670_v8, %v5114_v60 }
 0x106   : > { %v763_v56 = vpop.f32.mrb[3].mxu0  ;;  %v5228_v11 = vmul.f32 0.5, %v5225_v3  ;;  %v5231_v12 = vadd.f32 %v4290_v55, %v5198_v50  ;;  %vm3947_vm6 = vmpackc.low %vm2746_vm3, %vm2745_vm4 }
 0x107   : > { %v5208_v58 = vmul.f32 0.5, %v5205_v53  ;;  %v5211_v59 = vadd.f32 %v5198_v50, %v763_v56  ;;  %v2673_v14 = vpop.permute.xlu0 %2672 }
 0x108   : > { %4492 = vmatmul.mubr.msk.bf16.gmra.mrb[108].mxu0 %vm3937_vm9, %v7493_v4  ;;  %v2676_v17 = vpop.permute.xlu1 %2675  ;;  %v1081_v18 = vmin.f32 %v5228_v11, 14.0  ;;  %v5247_v19 = vmul.f32 0.5, %v5231_v12  ;;  %vm2747_vm7 = vcmp.eq.s32.totalorder %v2673_v14, %v5114_v60 }
 0x109   : > { %v1079_v62 = vmin.f32 %v5208_v58, 14.0  ;;  %v5216_v63 = vmul.f32 0.5, %v5211_v59  ;;  %4495 = vmatprep.mubr.msk.bf16.mxu0 %vm3939_vm10, %v7493_v4  ;;  %vm2748_vm8 = vcmp.eq.s32.totalorder %v2676_v17, %v5114_v60 }
 0x10a   : > { %v1147_v27 = vmul.f32 1.442695, %v1081_v18  ;;  %v1082_v28 = vmin.f32 %v5247_v19, 14.0  ;;  %vm3949_vm11 = vmpackc.low %vm2748_vm8, %vm2747_vm7 }
 0x10b   : > { %v1143_v0 = vmul.f32 1.442695, %v1079_v62  ;;  %v1080_v1 = vmin.f32 %v5216_v63, 14.0  ;;  %v4293_v2 = vpop.f32.mrb[4].mxu0  ;;  %v2679_v30 = vpop.permute.xlu0 %2678  ;;  %vm1912_vm1 = vcmp.gt.f32.partialorder %v5216_v63, 14.0 }
 0x10c   : > { %v776_v5 = vpop.f32.mrb[5].mxu0  ;;  %v5236_v13 = vadd.f32 %v4293_v2, %v5198_v50  ;;  %v2682_v33 = vpop.permute.xlu1 %2681  ;;  %vm2749_vm10 = vcmp.eq.s32.totalorder %v2679_v30, %v5114_v60  ;;  %v1149_v39 = vmul.f32 1.442695, %v1082_v28 }
 0x10d   : > { %4596 = vpow2.f32 %v1143_v0  ;;  %v4294_v7 = vpop.f32.mrb[6].mxu0  ;;  %v1145_v9 = vmul.f32 1.442695, %v1080_v1  ;;  %v5241_v15 = vadd.f32 %v5198_v50, %v776_v5  ;;  %vm2750_vm9 = vcmp.eq.s32.totalorder %v2682_v33, %v5114_v60 }
 0x10e   : > { %v779_v10 = vpop.f32.mrb[7].mxu0  ;;  %v5250_v21 = vadd.f32 %v4294_v7, %v5198_v50  ;;  %v5253_v23 = vmul.f32 0.5, %v5236_v13  ;;  %vm3951_vm12 = vmpackc.low %vm2750_vm9, %vm2749_vm10 }
 0x10f   : > { %4598 = vpow2.f32 %v1145_v9  ;;  %v5258_v26 = vmul.f32 0.5, %v5241_v15  ;;  %v5262_v29 = vadd.f32 %v5198_v50, %v779_v10  ;;  %v2685_v49 = vpop.permute.xlu0 %2684 }
 0x110   : > { %4496 = vmatmul.mubr.msk.bf16.gmra.mrb[112].mxu0 %vm3941_vm15, %v7493_v4  ;;  %v5267_v32 = vmul.f32 0.5, %v5250_v21  ;;  %v1085_v34 = vmin.f32 %v5253_v23, 14.0  ;;  %v2688_v55 = vpop.permute.xlu1 %2687  ;;  %vm2751_vm13 = vcmp.eq.s32.totalorder %v2685_v49, %v5114_v60 }
 0x111   : > { %4499 = vmatprep.mubr.msk.bf16.mxu0 %vm3943_vm0, %v7493_v4  ;;  %v1083_v36 = vmin.f32 %v5258_v26, 14.0  ;;  %v5282_v40 = vmul.f32 0.5, %v5262_v29  ;;  %vm2752_vm14 = vcmp.eq.s32.totalorder %v2688_v55, %v5114_v60  ;;  %vm1911_vm0 = vcmp.gt.f32.partialorder %v5208_v58, 14.0 }
 0x112   : > { %v1086_v43 = vmin.f32 %v5267_v32, 14.0  ;;  %v1155_v45 = vmul.f32 1.442695, %v1085_v34  ;;  %vm3953_vm15 = vmpackc.low %vm2752_vm14, %vm2751_vm13  ;;  %vm1915_vm8 = vcmp.gt.f32.partialorder %v5258_v26, 14.0 }
 0x113   : > { %v4297_v16 = vpop.f32.mrb[8].mxu0  ;;  %v1151_v51 = vmul.f32 1.442695, %v1083_v36  ;;  %v1084_v57 = vmin.f32 %v5282_v40, 14.0  ;;  %vm1916_vm9 = vcmp.gt.f32.partialorder %v5282_v40, 14.0 }
 0x114   : > { %v792_v20 = vpop.f32.mrb[9].mxu0  ;;  %v5273_v35 = vadd.f32 %v4297_v16, %v5198_v50  ;;  %v1157_v0 = vmul.f32 1.442695, %v1086_v43 }
 0x115   : > { %v4298_v22 = vpop.f32.mrb[10].mxu0  ;;  %v5285_v41 = vadd.f32 %v5198_v50, %v792_v20  ;;  %v1153_v10 = vmul.f32 1.442695, %v1084_v57 }
 0x116   : > { %v795_v24 = vpop.f32.mrb[11].mxu0  ;;  %v5291_v46 = vmul.f32 0.5, %v5273_v35  ;;  %v5294_v47 = vadd.f32 %v4298_v22, %v5198_v50 }
 0x117   : > { %v5255_v25 = vpop.eup %4596  ;;  %v5299_v52 = vadd.f32 %v5198_v50, %v795_v24  ;;  %v5304_v61 = vmul.f32 0.5, %v5285_v41 }
 0x118   : > { %4500 = vmatmul.mubr.msk.bf16.gmra.mrb[116].mxu0 %vm3945_vm5, %v7493_v4  ;;  %v1271_v31 = vadd.f32 1.0, %v5255_v25  ;;  %v1274_v62 = vmul.f32 -0.5, %v5255_v25  ;;  %v1089_v1 = vmin.f32 %v5291_v46, 14.0  ;;  %v5312_v2 = vmul.f32 0.5, %v5294_v47 }
 0x119   : > { %4503 = vmatprep.mubr.msk.bf16.mxu0 %vm3947_vm6, %v7493_v4  ;;  %v5279_v38 = vpop.eup %4598  ;;  %v5316_v5 = vmul.f32 0.5, %v5299_v52  ;;  %v1087_v14 = vmin.f32 %v5304_v61, 14.0  ;;  %v1277_v24 = vand.u32 2147483647, %v5255_v25  ;;  %vm1913_vm5 = vcmp.gt.f32.partialorder %v5228_v11, 14.0 }
 0x11a   : > { %4600 = vlog2.f32 %v1271_v31  ;;  %v1280_v56 = vadd.f32 1.0, %v5279_v38  ;;  %v1275_v17 = vadd.f32 1.0, %v1274_v62  ;;  %v1283_v18 = vmul.f32 -0.5, %v5279_v38 }
 0x11b   : > { %v4301_v37 = vpop.f32.mrb[12].mxu0  ;;  %4602 = vpow2.f32 %v1147_v27  ;;  %v1163_v28 = vmul.f32 1.442695, %v1089_v1  ;;  %v1090_v30 = vmin.f32 %v5312_v2, 14.0  ;;  %v1088_v36 = vmin.f32 %v5316_v5, 14.0 }
 0x11c   : > { %v808_v42 = vpop.f32.mrb[13].mxu0  ;;  %4604 = vpow2.f32 %v1149_v39  ;;  %v5319_v6 = vadd.f32 %v4301_v37, %v5198_v50  ;;  %v1276_v43 = vmul.f32 %v5255_v25, %v1275_v17  ;;  %vm5357_vm2 = vcmp.lt.f32.partialorder %v1277_v24, 0.0004427343 }
 0x11d   : > { %v4302_v44 = vpop.f32.mrb[14].mxu0  ;;  %4606 = vlog2.f32 %v1280_v56  ;;  %v5322_v7 = vadd.f32 %v5198_v50, %v808_v42  ;;  %v1159_v42 = vmul.f32 1.442695, %v1087_v14  ;;  %v1286_v49 = vand.u32 2147483647, %v5279_v38 }
 0x11e   : > { %v811_v48 = vpop.f32.mrb[15].mxu0  ;;  %4608 = vpow2.f32 %v1155_v45  ;;  %7601 = vst [vmem:[#allocation2_spill] sm:$0xff] %v5319_v6  ;;  %v5327_v20 = vadd.f32 %v4302_v44, %v5198_v50  ;;  %v5342_v37 = vmul.f32 0.5, %v5319_v6  ;;  %v1284_v44 = vadd.f32 1.0, %v1283_v18 }
 0x11f   : > { %4610 = vpow2.f32 %v1151_v51  ;;  %7602 = vst [vmem:[#allocation3_spill] sm:$0xff] %v5322_v7  ;;  %v5338_v31 = vadd.f32 %v5198_v50, %v811_v48  ;;  %v5345_v60 = vmul.f32 0.5, %v5322_v7  ;;  %v1165_v25 = vmul.f32 1.442695, %v1090_v30 }
 0x120   : > { %4504 = vmatmul.mubr.msk.bf16.gmra.mrb[120].mxu0 %vm3949_vm11, %v7493_v4  ;;  %4612 = vpow2.f32 %v1157_v0  ;;  %7603 = vst [vmem:[#allocation4_spill] sm:$0xff] %v5327_v20  ;;  %7605 = vst [vmem:[#allocation6_spill] sm:$0xff] %v5342_v37  ;;  %v5355_v45 = vmul.f32 0.5, %v5327_v20  ;;  %v1161_v0 = vmul.f32 1.442695, %v1088_v36  ;;  %v1093_v1 = vmin.f32 %v5342_v37, 14.0 }
 0x121   : > { %4507 = vmatprep.mubr.msk.bf16.mxu0 %vm3951_vm12, %v7493_v4  ;;  %7604 = vst [vmem:[#allocation5_spill] sm:$0xff] %v5338_v31  ;;  %4614 = vpow2.f32 %v1153_v10  ;;  %v5366_v56 = vmul.f32 0.5, %v5338_v31  ;;  %v1285_v30 = vmul.f32 %v5279_v38, %v1284_v44  ;;  %vm1287_vm3 = vcmp.lt.f32.partialorder %v1286_v49, 0.0004427343 }
 0x122   : > { %7607 = vst [vmem:[#allocation8_spill] sm:$0xff] %v5355_v45  ;;  %4616 = vpow2.f32 %v1163_v28  ;;  %v1094_v36 = vmin.f32 %v5355_v45, 14.0  ;;  %vm1914_vm6 = vcmp.gt.f32.partialorder %v5247_v19, 14.0  ;;  %vm1917_vm11 = vcmp.gt.f32.partialorder %v5253_v23, 14.0 }
 0x123   : > { %v4305_v8 = vpop.f32.mrb[16].mxu0  ;;  %4618 = vpow2.f32 %v1159_v42  ;;  %vm1918_vm12 = vcmp.gt.f32.partialorder %v5267_v32, 14.0 }
 0x124   : > { %v4601_v9 = vpop.eup %4600  ;;  %v824_v16 = vpop.f32.mrb[17].mxu0  ;;  %v5348_v39 = vadd.f32 %v4305_v8, %v5198_v50  ;;  %v1091_v8 = vmin.f32 %v5345_v60, 14.0  ;;  %v1173_v20 = vmul.f32 1.442695, %v1094_v36 }
 0x125   : > { %v4306_v22 = vpop.f32.mrb[18].mxu0  ;;  %v5334_v27 = vpop.eup %4602  ;;  %v1273_v34 = vmul.f32 0.6931472, %v4601_v9  ;;  %v5378_v17 = vadd.f32 %v5198_v50, %v824_v16 }
 0x126   : > { %v827_v33 = vpop.f32.mrb[19].mxu0  ;;  %7606 = vst [vmem:[#allocation7_spill] sm:$0xff] %v5348_v39  ;;  %v1289_v51 = vadd.f32 1.0, %v5334_v27  ;;  %v5363_v55 = vpop.eup %4604  ;;  %v5373_v9 = vmul.f32 0.5, %v5348_v39  ;;  %v5381_v18 = vadd.f32 %v4306_v22, %v5198_v50  ;;  %v1167_v49 = vmul.f32 1.442695, %v1091_v8 }
 0x127   : > { %v1279_v57 = vsel %vm5357_vm2, %v1276_v43, %v1273_v34  ;;  %v4607_v62 = vpop.eup %4606  ;;  %7611 = vst [vmem:[#allocation10_spill] sm:$0xff] %v5378_v17  ;;  %v5389_v16 = vadd.f32 %v5198_v50, %v827_v33 }
 0x128   : > { %4508 = vmatmul.mubr.msk.bf16.gmra.mrb[124].mxu0 %vm3953_vm15, %v7493_v4  ;;  %7610 = vst [vmem:[#allocation9_spill] sm:$0xff] %v5373_v9  ;;  %v5375_v14 = vpop.eup %4608  ;;  %7612 = vst [vmem:[#allocation11_spill] sm:$0xff] %v5381_v18  ;;  %v1282_v28 = vmul.f32 0.6931472, %v4607_v62  ;;  %v1847_v48 = vmul.f32 2.0, %v1279_v57  ;;  %v1092_v4 = vmin.f32 %v5366_v56, 14.0  ;;  %4620 = vlog2.f32 %v1289_v51 }
 0x129   : > { %v5384_v34 = vpop.eup %4610  ;;  %7613 = vst [vmem:[#allocation12_spill] sm:$0xff] %v5389_v16  ;;  %v1171_v62 = vmul.f32 1.442695, %v1093_v1  ;;  %v1097_v38 = vmin.f32 %v5373_v9, 14.0  ;;  %4622 = vpow2.f32 %v1165_v25  ;;  %v5398_v57 = vmul.f32 0.5, %v5378_v17 }
 0x12a   : > { %v1288_v22 = vsel %vm1287_vm3, %v1285_v30, %v1282_v28  ;;  %v5391_v39 = vpop.eup %4612  ;;  %v5401_v33 = vmul.f32 0.5, %v5381_v18  ;;  %v1975_v1 = vsel %vm1911_vm0, %v5205_v53, %v1847_v48  ;;  %4624 = vpow2.f32 %v1161_v0 }
 0x12b   : > { %v4309_v10 = vpop.f32.mrb[20].mxu0  ;;  %v1848_v44 = vmul.f32 2.0, %v1288_v22  ;;  %7615 = vst [vmem:[#allocation14_spill] sm:$0xff] %v5398_v57  ;;  %v5412_v25 = vpop.eup %4614  ;;  %v1169_v8 = vmul.f32 1.442695, %v1092_v4  ;;  %v5415_v28 = vmul.f32 0.5, %v5389_v16  ;;  %4626 = vpow2.f32 %v1171_v62 }
 0x12c   : > { %v840_v24 = vpop.f32.mrb[21].mxu0  ;;  %v5395_v42 = vadd.f32 %v4309_v10, %v5198_v50  ;;  %7616 = vst [vmem:[#allocation15_spill] sm:$0xff] %v5401_v33  ;;  %v1179_v36 = vmul.f32 1.442695, %v1097_v38  ;;  %v5420_v58 = vpop.eup %4616  ;;  %4628 = vpow2.f32 %v1167_v49  ;;  %v1095_v53 = vmin.f32 %v5398_v57, 14.0 }
 0x12d   : > { %v4310_v43 = vpop.f32.mrb[22].mxu0  ;;  %v5404_v51 = vadd.f32 %v5198_v50, %v840_v24  ;;  %v1976_v10 = vsel %vm1912_vm1, %v5211_v59, %v1848_v44  ;;  %7618 = vst [vmem:[#allocation17_spill] sm:$0xff] %v5415_v28  ;;  %v1098_v59 = vmin.f32 %v5401_v33, 14.0  ;;  %v1298_v4 = vadd.f32 1.0, %v5363_v55 }
 0x12e   : > { %v843_v54 = vpop.f32.mrb[23].mxu0  ;;  %7614 = vst [vmem:[#allocation13_spill] sm:$0xff] %v5395_v42  ;;  %v2039_v30 = vpack.c.bf16 %v1976_v10, %v1975_v1  ;;  %v5418_v24 = vmul.f32 0.5, %v5395_v42  ;;  %4630 = vpow2.f32 %v1173_v20  ;;  %v5429_v48 = vadd.f32 %v4310_v43, %v5198_v50  ;;  %v5440_v10 = vpop.eup %4618 }
 0x12f   : > { %7617 = vst [vmem:[#allocation16_spill] sm:$0xff] %v5404_v51  ;;  %v5426_v0 = vmul.f32 0.5, %v5404_v51  ;;  %v1292_v62 = vmul.f32 -0.5, %v5334_v27  ;;  %4632 = vpow2.f32 %v1169_v8  ;;  %v1096_v44 = vmin.f32 %v5415_v28, 14.0 }
 0x130   : > { %7619 = vst [vmem:[#allocation18_spill] sm:$0xff] %v5418_v24  ;;  %4367 = vmatprep.mubr.bf16.mxu1 %v2039_v30  ;;  %7621 = vst [vmem:[#allocation20_spill] sm:$0xff] %v5429_v48  ;;  %v5436_v49 = vadd.f32 %v5198_v50, %v843_v54  ;;  %4634 = vpow2.f32 %v1179_v36  ;;  %v1101_v20 = vmin.f32 %v5418_v24, 14.0  ;;  %v1175_v43 = vmul.f32 1.442695, %v1095_v53 }
 0x131   : > { %7620 = vst [vmem:[#allocation19_spill] sm:$0xff] %v5426_v0  ;;  %v1181_v42 = vmul.f32 1.442695, %v1098_v59  ;;  %4636 = vlog2.f32 %v1298_v4  ;;  %v1099_v51 = vmin.f32 %v5426_v0, 14.0  ;;  %v5445_v8 = vmul.f32 0.5, %v5429_v48 }
 0x132   : > { %7622 = vst [vmem:[#allocation21_spill] sm:$0xff] %v5436_v49  ;;  %v4621_v30 = vpop.eup %4620  ;;  %v1293_v18 = vadd.f32 1.0, %v1292_v62  ;;  %v1307_v54 = vadd.f32 1.0, %v5384_v34  ;;  %v1177_v17 = vmul.f32 1.442695, %v1096_v44  ;;  %v5451_v33 = vmul.f32 0.5, %v5436_v49 }
 0x133   : > { %v4313_v22 = vpop.f32.mrb[24].mxu0  ;;  %7623 = vst [vmem:[#allocation22_spill] sm:$0xff] %v5445_v8  ;;  %v5448_v16 = vpop.eup %4622  ;;  %v1295_v36 = vand.u32 2147483647, %v5334_v27  ;;  %v1301_v53 = vmul.f32 -0.5, %v5363_v55  ;;  %v1316_v62 = vadd.f32 1.0, %v5412_v25 }
 0x134   : > { %v856_v63 = vpop.f32.mrb[25].mxu0  ;;  %7624 = vst [vmem:[#allocation23_spill] sm:$0xff] %v5451_v33  ;;  %v1187_v59 = vmul.f32 1.442695, %v1101_v20  ;;  %v1291_v4 = vmul.f32 0.6931472, %v4621_v30  ;;  %4638 = vlog2.f32 %v1307_v54  ;;  %v5457_v48 = vpop.eup %4624  ;;  %v1294_v9 = vmul.f32 %v5334_v27, %v1293_v18 }
 0x135   : > { %v5432_v38 = vpop.f32.mrb[26].mxu0  ;;  %4640 = vpow2.f32 %v1175_v43  ;;  %v5460_v0 = vpop.eup %4626  ;;  %v1183_v44 = vmul.f32 1.442695, %v1099_v51  ;;  %v1102_v49 = vmin.f32 %v5445_v8, 14.0  ;;  %v1100_v30 = vmin.f32 %v5451_v33, 14.0 }
 0x136   : > { %v5438_v1 = vpop.f32.mrb[27].mxu0  ;;  %4642 = vpow2.f32 %v1181_v42  ;;  %v5466_v20 = vpop.eup %4628  ;;  %vm5469_vm4 = vcmp.lt.f32.partialorder %v1295_v36, 0.0004427343  ;;  %v1302_v43 = vadd.f32 1.0, %v1301_v53  ;;  %v1310_v18 = vmul.f32 -0.5, %v5384_v34 }
 0x137   : > { %4644 = vpow2.f32 %v1177_v17  ;;  %v1297_v27 = vsel %vm5469_vm4, %v1294_v9, %v1291_v4  ;;  %v1304_v51 = vand.u32 2147483647, %v5363_v55  ;;  %v5486_v36 = vadd.f32 %v4313_v22, %v5198_v50 }
 0x138   : > { %v5475_v42 = vpop.eup %4630  ;;  %4646 = vpow2.f32 %v1187_v59  ;;  %v1189_v59 = vmul.f32 1.442695, %v1102_v49  ;;  %v5493_v9 = vadd.f32 %v5198_v50, %v856_v63  ;;  %v1325_v4 = vadd.f32 1.0, %v5375_v14 }
 0x139   : > { %v5481_v17 = vpop.eup %4632  ;;  %7627 = vst [vmem:[#allocation24_spill] sm:$0xff] %v5486_v36  ;;  %4648 = vlog2.f32 %v1316_v62  ;;  %v1185_v33 = vmul.f32 1.442695, %v1100_v30  ;;  %v1303_v6 = vmul.f32 %v5363_v55, %v1302_v43  ;;  %v1849_v31 = vmul.f32 2.0, %v1297_v27 }
 0x13a   : > { %v5490_v8 = vpop.eup %4634  ;;  %4650 = vpow2.f32 %v1183_v44  ;;  %7629 = vst [vmem:[#allocation26_spill] sm:$0xff] %v5493_v9  ;;  %v1334_v22 = vadd.f32 1.0, %v5391_v39  ;;  %v1311_v62 = vadd.f32 1.0, %v1310_v18  ;;  %v1319_v45 = vmul.f32 -0.5, %v5412_v25 }
 0x13b   : > { %v5455_v24 = vpop.f32.mrb[28].mxu0  ;;  %7628 = vst [vmem:[#allocation25_spill] sm:$0xff] %v5490_v8  ;;  %v4637_v54 = vpop.eup %4636  ;;  %4652 = vlog2.f32 %v1325_v4  ;;  %vm1305_vm7 = vcmp.lt.f32.partialorder %v1304_v51, 0.0004427343  ;;  %v5502_v63 = vmul.f32 0.5, %v5486_v36  ;;  %v5508_v43 = vmul.f32 0.5, %v5493_v9 }
 0x13c   : > { %v5464_v28 = vpop.f32.mrb[29].mxu0  ;;  %v1300_v7 = vmul.f32 0.6931472, %v4637_v54  ;;  %v1313_v49 = vand.u32 2147483647, %v5384_v34  ;;  %4654 = vlog2.f32 %v1334_v22  ;;  %v5512_v27 = vadd.f32 %v5432_v38, %v5198_v50 }
 0x13d   : > { %v5473_v57 = vpop.f32.mrb[30].mxu0  ;;  %7630 = vst [vmem:[#allocation27_spill] sm:$0xff] %v5502_v63  ;;  %4656 = vpow2.f32 %v1189_v59  ;;  %7631 = vst [vmem:[#allocation28_spill] sm:$0xff] %v5508_v43  ;;  %v5520_v54 = vadd.f32 %v5198_v50, %v5438_v1  ;;  %v1328_v59 = vmul.f32 -0.5, %v5375_v14  ;;  %v1312_v38 = vmul.f32 %v5384_v34, %v1311_v62 }
 0x13e   : > { %v5488_v53 = vpop.f32.mrb[31].mxu0  ;;  %v4639_v55 = vpop.eup %4638  ;;  %v1306_v30 = vsel %vm1305_vm7, %v1303_v6, %v1300_v7  ;;  %7632 = vst [vmem:[#allocation29_spill] sm:$0xff] %v5512_v27  ;;  %v1977_v7 = vsel %vm1913_vm5, %v5225_v3, %v1849_v31  ;;  %v1337_v36 = vmul.f32 -0.5, %v5391_v39  ;;  %vm5540_vm10 = vcmp.lt.f32.partialorder %v1313_v49, 0.0004427343 }
 0x13f   : > { %v5516_v51 = vpop.eup %4640  ;;  %v1850_v4 = vmul.f32 2.0, %v1306_v30  ;;  %7633 = vst [vmem:[#allocation30_spill] sm:$0xff] %v5520_v54  ;;  %v1309_v22 = vmul.f32 0.6931472, %v4639_v55  ;;  %v1320_v30 = vadd.f32 1.0, %v1319_v45  ;;  %v5548_v45 = vmul.f32 0.5, %v5512_v27 }
 0x140   : > { %v5523_v6 = vpop.eup %4642  ;;  %v1322_v3 = vand.u32 2147483647, %v5412_v25  ;;  %v1331_v19 = vand.u32 2147483647, %v5375_v14  ;;  %v1103_v62 = vmin.f32 %v5508_v43, 14.0  ;;  %v5555_v49 = vmul.f32 0.5, %v5520_v54 }
 0x141   : > { %7634 = vst [vmem:[#allocation31_spill] sm:$0xff] %v5523_v6  ;;  %v5534_v55 = vpop.eup %4644  ;;  %v1978_v9 = vsel %vm1914_vm6, %v5231_v12, %v1850_v4  ;;  %v1105_v6 = vmin.f32 %v5502_v63, 14.0  ;;  %v1315_v34 = vsel %vm5540_vm10, %v1312_v38, %v1309_v22  ;;  %v1329_v4 = vadd.f32 1.0, %v1328_v59 }
 0x142   : > { %7635 = vst [vmem:[#allocation32_spill] sm:$0xff] %v5534_v55  ;;  %v5545_v11 = vpop.eup %4646  ;;  %v2040_v31 = vpack.c.bf16 %v1978_v9, %v1977_v7  ;;  %v1343_v63 = vadd.f32 1.0, %v5440_v10  ;;  %v1321_v9 = vmul.f32 %v5412_v25, %v1320_v30  ;;  %v1338_v22 = vadd.f32 1.0, %v1337_v36 }
 0x143   : > { %v5499_v8 = vpop.f32.mrb[32].mxu0  ;;  %7638 = vst [vmem:[#allocation33_spill] sm:$0xff] %v5545_v11  ;;  %v4649_v12 = vpop.eup %4648  ;;  %v1340_v7 = vand.u32 2147483647, %v5391_v39  ;;  %4658 = vpow2.f32 %v1185_v33  ;;  %v1195_v27 = vmul.f32 1.442695, %v1105_v6  ;;  %v5575_v25 = vadd.f32 %v5455_v24, %v5198_v50 }
 0x144   : > { %v5505_v44 = vpop.f32.mrb[33].mxu0  ;;  %v5558_v55 = vpop.eup %4650  ;;  %4368 = vmatmul.mubr.bf16.vlgmr.msra.gmra.mrb[0].mxu1 %v2040_v31  ;;  %v1318_v37 = vmul.f32 0.6931472, %v4649_v12  ;;  %vm1323_vm13 = vcmp.lt.f32.partialorder %v1322_v3, 0.0004427343  ;;  %v1851_v59 = vmul.f32 2.0, %v1315_v34  ;;  %v1330_v3 = vmul.f32 %v5375_v14, %v1329_v4 }
 0x145   : > { %v5514_v18 = vpop.f32.mrb[34].mxu0  ;;  %7639 = vst [vmem:[#allocation34_spill] sm:$0xff] %v5558_v55  ;;  %v4653_v43 = vpop.eup %4652  ;;  %v1106_v11 = vmin.f32 %v5548_v45, 14.0  ;;  %vm5569_vm14 = vcmp.lt.f32.partialorder %v1331_v19, 0.0004427343  ;;  %7642 = vst [vmem:[#allocation35_spill] sm:$0xff] %v5575_v25  ;;  %4660 = vlog2.f32 %v1343_v63  ;;  %v5587_v24 = vadd.f32 %v5198_v50, %v5464_v28 }
 0x146   : > { %v5532_v1 = vpop.f32.mrb[35].mxu0  ;;  %v1324_v55 = vsel %vm1323_vm13, %v1321_v9, %v1318_v37  ;;  %v4655_v33 = vpop.eup %4654  ;;  %v1327_v30 = vmul.f32 0.6931472, %v4653_v43  ;;  %v1339_v37 = vmul.f32 %v5391_v39, %v1338_v22  ;;  %vm1341_vm15 = vcmp.lt.f32.partialorder %v1340_v7, 0.0004427343 }
 0x147   : > { %v1852_v6 = vmul.f32 2.0, %v1324_v55  ;;  %v5582_v12 = vpop.eup %4656  ;;  %v1336_v19 = vmul.f32 0.6931472, %v4655_v33  ;;  %7643 = vst [vmem:[#allocation36_spill] sm:$0xff] %v5587_v24  ;;  %v1979_v55 = vsel %vm1915_vm8, %v5241_v15, %v1851_v59  ;;  %v1352_v43 = vadd.f32 1.0, %v5457_v48 }
 0x148   : > { %v1333_v63 = vsel %vm5569_vm14, %v1330_v3, %v1327_v30  ;;  %v1346_v22 = vmul.f32 -0.5, %v5440_v10  ;;  %v1191_v28 = vmul.f32 1.442695, %v1103_v62  ;;  %v1104_v7 = vmin.f32 %v5555_v49, 14.0 }
 0x149   : > { %v1980_v14 = vsel %vm1916_vm9, %v5262_v29, %v1852_v6  ;;  %v1342_v39 = vsel %vm1341_vm15, %v1339_v37, %v1336_v19  ;;  %v1853_v9 = vmul.f32 2.0, %v1333_v63  ;;  %4662 = vlog2.f32 %v1352_v43 }
 0x14a   : > { %v2041_v4 = vpack.c.bf16 %v1980_v14, %v1979_v55  ;;  %v1854_v33 = vmul.f32 2.0, %v1342_v39  ;;  %4664 = vpow2.f32 %v1195_v27  ;;  %v1197_v15 = vmul.f32 1.442695, %v1106_v11 }
 0x14b   : > { %v5564_v38 = vpop.f32.mrb[36].mxu0  ;;  %v5601_v26 = vmul.f32 0.5, %v5575_v25  ;;  %v1361_v29 = vadd.f32 1.0, %v5420_v58  ;;  %v1981_v59 = vsel %vm1917_vm11, %v5236_v13, %v1853_v9  ;;  %v1355_v31 = vmul.f32 -0.5, %v5457_v48 }
 0x14c   : > { %v5566_v54 = vpop.f32.mrb[37].mxu0  ;;  %4371 = vmatprep.mubr.bf16.mxu1 %v2041_v4  ;;  %v1982_v62 = vsel %vm1918_vm12, %v5250_v21, %v1854_v33  ;;  %v1370_v27 = vadd.f32 1.0, %v5448_v16  ;;  %v5617_v30 = vmul.f32 0.5, %v5587_v24  ;;  %v1347_v3 = vadd.f32 1.0, %v1346_v22 }
 0x14d   : > { %v5577_v36 = vpop.f32.mrb[38].mxu0  ;;  %v2042_v6 = vpack.c.bf16 %v1982_v62, %v1981_v59  ;;  %4666 = vlog2.f32 %v1361_v29  ;;  %v5621_v23 = vpop.eup %4658  ;;  %v5625_v13 = vadd.f32 %v5473_v57, %v5198_v50  ;;  %v5629_v21 = vadd.f32 %v5198_v50, %v5488_v53 }
 0x14e   : > { %v5580_v34 = vpop.f32.mrb[39].mxu0  ;;  %v1349_v32 = vand.u32 2147483647, %v5440_v10  ;;  %4668 = vlog2.f32 %v1370_v27  ;;  %v1193_v55 = vmul.f32 1.442695, %v1104_v7  ;;  %v1364_v14 = vmul.f32 -0.5, %v5420_v58 }
 0x14f   : > { %7644 = vst [vmem:[#allocation37_spill] sm:$0xff] %v5625_v13  ;;  %7645 = vst [vmem:[#allocation38_spill] sm:$0xff] %v5629_v21  ;;  %4670 = vpow2.f32 %v1191_v28  ;;  %4372 = vmatmul.mubr.bf16.gmra.mrb[4].mxu1 %v2042_v6  ;;  %v4661_v63 = vpop.eup %4660  ;;  %vm1919_vm0 = vcmp.gt.f32.partialorder %v5304_v61, 14.0  ;;  %v1109_v57 = vmin.f32 %v5601_v26, 14.0  ;;  %v1356_v43 = vadd.f32 1.0, %v1355_v31 }
 0x150   : > { %4672 = vpow2.f32 %v1197_v15  ;;  %v1379_v53 = vadd.f32 1.0, %v5466_v20  ;;  %vm1920_vm1 = vcmp.gt.f32.partialorder %v5316_v5, 14.0  ;;  %v1107_v4 = vmin.f32 %v5617_v30, 14.0 }
 0x151   : > { %v1345_v39 = vmul.f32 0.6931472, %v4661_v63  ;;  %v1348_v9 = vmul.f32 %v5440_v10, %v1347_v3  ;;  %v1373_v22 = vmul.f32 -0.5, %v5448_v16  ;;  %v5643_v28 = vmul.f32 0.5, %v5625_v13 }
 0x152   : > { %v5646_v7 = vmul.f32 0.5, %v5629_v21  ;;  %vm5648_vm2 = vcmp.lt.f32.partialorder %v1349_v32, 0.0004427343  ;;  %v1358_v15 = vand.u32 2147483647, %v5457_v48  ;;  %v1365_v59 = vadd.f32 1.0, %v1364_v14 }
 0x153   : > { %v5604_v40 = vpop.f32.mrb[40].mxu0  ;;  %v1351_v29 = vsel %vm5648_vm2, %v1348_v9, %v1345_v39  ;;  %v1367_v10 = vand.u32 2147483647, %v5420_v58  ;;  %4674 = vlog2.f32 %v1379_v53  ;;  %v4663_v31 = vpop.eup %4662  ;;  %v1203_v27 = vmul.f32 1.442695, %v1109_v57 }
 0x154   : > { %v5614_v11 = vpop.f32.mrb[41].mxu0  ;;  %v1357_v6 = vmul.f32 %v5457_v48, %v1356_v43  ;;  %v1376_v3 = vand.u32 2147483647, %v5448_v16  ;;  %v5662_v32 = vadd.f32 %v5499_v8, %v5198_v50  ;;  %v5666_v33 = vpop.eup %4664  ;;  %vm1921_vm3 = vcmp.gt.f32.partialorder %v5291_v46, 14.0 }
 0x155   : > { %v5619_v19 = vpop.f32.mrb[42].mxu0  ;;  %vm1922_vm4 = vcmp.gt.f32.partialorder %v5312_v2, 14.0  ;;  %v1354_v14 = vmul.f32 0.6931472, %v4663_v31  ;;  %v1855_v53 = vmul.f32 2.0, %v1351_v29  ;;  %v1374_v39 = vadd.f32 1.0, %v1373_v22 }
 0x156   : > { %v5632_v37 = vpop.f32.mrb[43].mxu0  ;;  %7648 = vst [vmem:[#allocation39_spill] sm:$0xff] %v5662_v32  ;;  %v5672_v48 = vadd.f32 %v5198_v50, %v5505_v44  ;;  %4676 = vpow2.f32 %v1193_v55  ;;  %v1199_v57 = vmul.f32 1.442695, %v1107_v4  ;;  %v1110_v8 = vmin.f32 %v5643_v28, 14.0 }
 0x157   : > { %vm1359_vm5 = vcmp.lt.f32.partialorder %v1358_v15, 0.0004427343  ;;  %v4667_v9 = vpop.eup %4666  ;;  %v1108_v13 = vmin.f32 %v5646_v7, 14.0  ;;  %v1366_v21 = vmul.f32 %v5420_v58, %v1365_v59  ;;  %vm5679_vm6 = vcmp.lt.f32.partialorder %v1367_v10, 0.0004427343 }
 0x158   : > { %7649 = vst [vmem:[#allocation40_spill] sm:$0xff] %v5672_v48  ;;  %v1360_v25 = vsel %vm1359_vm5, %v1357_v6, %v1354_v14  ;;  %v4669_v44 = vpop.eup %4668  ;;  %v1363_v4 = vmul.f32 0.6931472, %v4667_v9  ;;  %vm5685_vm7 = vcmp.lt.f32.partialorder %v1376_v3, 0.0004427343  ;;  %v5690_v15 = vmul.f32 0.5, %v5662_v32 }
 0x159   : > { %v1856_v55 = vmul.f32 2.0, %v1360_v25  ;;  %v5692_v24 = vpop.eup %4670  ;;  %v1983_v58 = vsel %vm1919_vm0, %v5285_v41, %v1855_v53  ;;  %v1372_v59 = vmul.f32 0.6931472, %v4669_v44  ;;  %v1375_v10 = vmul.f32 %v5448_v16, %v1374_v39 }
 0x15a   : > { %7654 = vst [vmem:[#allocation41_spill] sm:$0xff] %v5690_v15  ;;  %v5699_v6 = vmul.f32 0.5, %v5672_v48  ;;  %v5701_v25 = vpop.eup %4672  ;;  %v1369_v14 = vsel %vm5679_vm6, %v1366_v21, %v1363_v4  ;;  %v1382_v9 = vmul.f32 -0.5, %v5466_v20  ;;  %v1388_v61 = vadd.f32 1.0, %v5481_v17 }
 0x15b   : > { %v5656_v62 = vpop.f32.mrb[44].mxu0  ;;  %v1984_v3 = vsel %vm1920_vm1, %v5299_v52, %v1856_v55  ;;  %4678 = vpow2.f32 %v1203_v27  ;;  %v1378_v16 = vsel %vm5685_vm7, %v1375_v10, %v1372_v59  ;;  %v1857_v53 = vmul.f32 2.0, %v1369_v14 }
 0x15c   : > { %v5664_v63 = vpop.f32.mrb[45].mxu0  ;;  %7655 = vst [vmem:[#allocation42_spill] sm:$0xff] %v5699_v6  ;;  %v2043_v41 = vpack.c.bf16 %v1984_v3, %v1983_v58  ;;  %v1205_v44 = vmul.f32 1.442695, %v1110_v8  ;;  %v1858_v32 = vmul.f32 2.0, %v1378_v16  ;;  %v5716_v52 = vadd.f32 %v5514_v18, %v5198_v50 }
 0x15d   : > { %v5675_v43 = vpop.f32.mrb[46].mxu0  ;;  %4680 = vlog2.f32 %v1388_v61  ;;  %v4675_v21 = vpop.eup %4674  ;;  %v1201_v29 = vmul.f32 1.442695, %v1108_v13  ;;  %v1113_v27 = vmin.f32 %v5690_v15, 14.0  ;;  %v5723_v55 = vadd.f32 %v5198_v50, %v5532_v1 }
 0x15e   : > { %v5683_v22 = vpop.f32.mrb[47].mxu0  ;;  %7656 = vst [vmem:[#allocation43_spill] sm:$0xff] %v5716_v52  ;;  %4375 = vmatprep.mubr.bf16.mxu1 %v2043_v41  ;;  %v1397_v4 = vadd.f32 1.0, %v5460_v0  ;;  %v1985_v18 = vsel %vm1921_vm3, %v5273_v35, %v1857_v53  ;;  %v1986_v31 = vsel %vm1922_vm4, %v5294_v47, %v1858_v32  ;;  %v1111_v13 = vmin.f32 %v5699_v6, 14.0 }
 0x15f   : > { %7657 = vst [vmem:[#allocation44_spill] sm:$0xff] %v5723_v55  ;;  %v1383_v58 = vadd.f32 1.0, %v1382_v9  ;;  %v2044_v10 = vpack.c.bf16 %v1986_v31, %v1985_v18  ;;  %v1385_v1 = vand.u32 2147483647, %v5466_v20  ;;  %v1391_v3 = vmul.f32 -0.5, %v5481_v17 }
 0x160   : > { %4682 = vlog2.f32 %v1397_v4  ;;  %v5739_v14 = vpop.eup %4676  ;;  %v5742_v35 = vmul.f32 0.5, %v5716_v52  ;;  %v1381_v46 = vmul.f32 0.6931472, %v4675_v21  ;;  %v1406_v47 = vadd.f32 1.0, %v5475_v42  ;;  %v7665_v52 = vld [vmem:[#allocation6_spill] sm:$0xff] }
 0x161   : > { %4684 = vpow2.f32 %v1199_v57  ;;  %4376 = vmatmul.mubr.bf16.gmra.mrb[8].mxu1 %v2044_v10  ;;  %v1211_v2 = vmul.f32 1.442695, %v1113_v27  ;;  %v1400_v32 = vmul.f32 -0.5, %v5460_v0  ;;  %v1207_v9 = vmul.f32 1.442695, %v1111_v13 }
 0x162   : > { %7658 = vst [vmem:[#allocation45_spill] sm:$0xff] %v5742_v35  ;;  %4686 = vpow2.f32 %v1205_v44  ;;  %v1384_v61 = vmul.f32 %v5466_v20, %v1383_v58  ;;  %v5748_v41 = vmul.f32 0.5, %v5723_v55  ;;  %vm5750_vm8 = vcmp.lt.f32.partialorder %v1385_v1, 0.0004427343 }
 0x163   : > { %v5712_v39 = vpop.f32.mrb[48].mxu0  ;;  %4688 = vlog2.f32 %v1406_v47  ;;  %v1392_v16 = vadd.f32 1.0, %v1391_v3  ;;  %v1114_v44 = vmin.f32 %v5742_v35, 14.0  ;;  %v1394_v27 = vand.u32 2147483647, %v5481_v17  ;;  %v7669_v35 = vld [vmem:[#allocation3_spill] sm:$0xff] }
 0x164   : > { %v5718_v5 = vpop.f32.mrb[49].mxu0  ;;  %4690 = vpow2.f32 %v1201_v29  ;;  %7659 = vst [vmem:[#allocation46_spill] sm:$0xff] %v5748_v41  ;;  %v1387_v21 = vsel %vm5750_vm8, %v1384_v61, %v1381_v46  ;;  %v1415_v20 = vadd.f32 1.0, %v5516_v51  ;;  %v1401_v18 = vadd.f32 1.0, %v1400_v32 }
 0x165   : > { %v5726_v8 = vpop.f32.mrb[50].mxu0  ;;  %v5763_v4 = vpop.eup %4678  ;;  %4692 = vpow2.f32 %v1211_v2  ;;  %v1409_v31 = vmul.f32 -0.5, %v5475_v42  ;;  %vm1923_vm9 = vcmp.gt.f32.partialorder %v5345_v60, 14.0  ;;  %vm1924_vm10 = vcmp.gt.f32.partialorder %v5366_v56, 14.0  ;;  %v7674_v60 = vld [vmem:[#allocation5_spill] sm:$0xff] }
 0x166   : > { %v5735_v59 = vpop.f32.mrb[51].mxu0  ;;  %4694 = vpow2.f32 %v1207_v9  ;;  %v5772_v10 = vadd.f32 %v5564_v38, %v5198_v50  ;;  %v1393_v46 = vmul.f32 %v5481_v17, %v1392_v16  ;;  %v1859_v47 = vmul.f32 2.0, %v1387_v21  ;;  %v7666_v9 = vld [vmem:[#allocation8_spill] sm:$0xff] }
 0x167   : > { %v4681_v58 = vpop.eup %4680  ;;  %v1403_v2 = vand.u32 2147483647, %v5460_v0  ;;  %v1213_v32 = vmul.f32 1.442695, %v1114_v44  ;;  %v1112_v61 = vmin.f32 %v5748_v41, 14.0  ;;  %4696 = vlog2.f32 %v1415_v20 }
 0x168   : > { %7663 = vst [vmem:[#allocation48_spill] sm:$0xff] %v5772_v10  ;;  %v1390_v3 = vmul.f32 0.6931472, %v4681_v58  ;;  %vm1395_vm11 = vcmp.lt.f32.partialorder %v1394_v27, 0.0004427343  ;;  %vm1925_vm12 = vcmp.gt.f32.partialorder %v7665_v52, 14.0  ;;  %v1402_v38 = vmul.f32 %v5460_v0, %v1401_v18 }
 0x169   : > { %vm1926_vm13 = vcmp.gt.f32.partialorder %v7666_v9, 14.0  ;;  %v1410_v55 = vadd.f32 1.0, %v1409_v31  ;;  %v1412_v58 = vand.u32 2147483647, %v5475_v42  ;;  %v5786_v44 = vmul.f32 0.5, %v5772_v10  ;;  %v7668_v27 = vld [vmem:[#allocation32_spill] sm:$0xff] }
 0x16a   : > { %v4683_v57 = vpop.eup %4682  ;;  %v1396_v50 = vsel %vm1395_vm11, %v1393_v46, %v1390_v3  ;;  %v1424_v20 = vadd.f32 1.0, %v7668_v27  ;;  %v1987_v3 = vsel %vm1923_vm9, %v7669_v35, %v1859_v47  ;;  %vm5794_vm14 = vcmp.lt.f32.partialorder %v1403_v2, 0.0004427343  ;;  %v5801_v18 = vld [vmem:[%s7489_s5] ss:$0 sm:$0xff]  ;;  %v7675_v2 = vld [vmem:[#allocation25_spill] sm:$0xff] }
 0x16b   : > { %v5754_v53 = vpop.f32.mrb[52].mxu0  ;;  %v5783_v17 = vpop.eup %4684  ;;  %v1860_v16 = vmul.f32 2.0, %v1396_v50  ;;  %v1399_v21 = vmul.f32 0.6931472, %v4683_v57  ;;  %7667 = vst [vmem:[#allocation6_spill] sm:$0xff] %v5786_v44  ;;  %v5805_v31 = vadd.f32 %v5801_v18, %v5566_v54  ;;  %v1418_v46 = vmul.f32 -0.5, %v5516_v51 }
 0x16c   : > { %v5761_v29 = vpop.f32.mrb[53].mxu0  ;;  %v5789_v48 = vpop.eup %4686  ;;  %4698 = vlog2.f32 %v1424_v20  ;;  %v1433_v10 = vadd.f32 1.0, %v7675_v2  ;;  %vm1413_vm15 = vcmp.lt.f32.partialorder %v1412_v58, 0.0004427343  ;;  %v1117_v56 = vmin.f32 %v5786_v44, 14.0  ;;  %v7686_v44 = vld [vmem:[#allocation17_spill] sm:$0xff] }
 0x16d   : > { %v5766_v13 = vpop.f32.mrb[54].mxu0  ;;  %7672 = vst [vmem:[#allocation8_spill] sm:$0xff] %v5805_v31  ;;  %v4689_v50 = vpop.eup %4688  ;;  %v1988_v35 = vsel %vm1924_vm10, %v7674_v60, %v1860_v16  ;;  %v1405_v47 = vsel %vm5794_vm14, %v1402_v38, %v1399_v21  ;;  %v1427_v16 = vmul.f32 -0.5, %v7668_v27  ;;  %v1209_v20 = vmul.f32 1.442695, %v1112_v61 }
 0x16e   : > { %7662 = vst [vmem:[#allocation47_spill] sm:$0xff] %v5766_v13  ;;  %v5774_v1 = vpop.f32.mrb[55].mxu0  ;;  %v5818_v41 = vpop.eup %4690  ;;  %v2045_v54 = vpack.c.bf16 %v1988_v35, %v1987_v3  ;;  %v1408_v6 = vmul.f32 0.6931472, %v4689_v50  ;;  %v1861_v13 = vmul.f32 2.0, %v1405_v47  ;;  %4700 = vlog2.f32 %v1433_v10  ;;  %v7679_v50 = vld [vmem:[#allocation31_spill] sm:$0xff] }
 0x16f   : > { %7664 = vst [vmem:[#allocation49_spill] sm:$0xff] %v5774_v1  ;;  %v1411_v1 = vmul.f32 %v5475_v42, %v1410_v55  ;;  %v5827_v21 = vpop.eup %4692  ;;  %v1419_v3 = vadd.f32 1.0, %v1418_v46  ;;  %v1442_v60 = vadd.f32 1.0, %v7679_v50  ;;  %4702 = vpow2.f32 %v1213_v32  ;;  %v7683_v46 = vld [vmem:[#allocation2_spill] sm:$0xff]  ;;  %v7684_v47 = vld [vmem:[#allocation4_spill] sm:$0xff] }
 0x170   : > { %4379 = vmatprep.mubr.bf16.mxu1 %v2045_v54  ;;  %v5830_v42 = vpop.eup %4694  ;;  %v5834_v58 = vadd.f32 %v5801_v18, %v5577_v36  ;;  %v1421_v10 = vand.u32 2147483647, %v5516_v51  ;;  %v5838_v35 = vmul.f32 0.5, %v5805_v31  ;;  %v5842_v61 = vadd.f32 %v5801_v18, %v5580_v34  ;;  %v7685_v31 = vld [vmem:[#allocation14_spill] sm:$0xff] }
 0x171   : > { %v1414_v0 = vsel %vm1413_vm15, %v1411_v1, %v1408_v6  ;;  %v1436_v6 = vmul.f32 -0.5, %v7675_v2  ;;  %4704 = vlog2.f32 %v1442_v60  ;;  %v4697_v1 = vpop.eup %4696  ;;  %v1989_v32 = vsel %vm1925_vm12, %v7683_v46, %v1861_v13 }
 0x172   : > { %v1862_v55 = vmul.f32 2.0, %v1414_v0  ;;  %7680 = vst [vmem:[#allocation31_spill] sm:$0xff] %v5834_v58  ;;  %7681 = vst [vmem:[#allocation50_spill] sm:$0xff] %v5838_v35  ;;  %v1219_v54 = vmul.f32 1.442695, %v1117_v56  ;;  %v1428_v0 = vadd.f32 1.0, %v1427_v16  ;;  %4706 = vpow2.f32 %v1209_v20 }
 0x173   : > { %v5808_v57 = vpop.f32.mrb[56].mxu0  ;;  %7682 = vst [vmem:[#allocation51_spill] sm:$0xff] %v5842_v61  ;;  %vm1927_vm0 = vcmp.gt.f32.partialorder %v7685_v31, 14.0  ;;  %vm1928_vm1 = vcmp.gt.f32.partialorder %v7686_v44, 14.0  ;;  %v1445_v60 = vmul.f32 -0.5, %v7679_v50  ;;  %v5858_v52 = vmul.f32 0.5, %v5834_v58 }
 0x174   : > { %7673 = vst [vmem:[#allocation32_spill] sm:$0xff] %v5808_v57  ;;  %v5816_v15 = vpop.f32.mrb[57].mxu0  ;;  %v1990_v36 = vsel %vm1926_vm13, %v7684_v47, %v1862_v55  ;;  %vm5860_vm2 = vcmp.lt.f32.partialorder %v1421_v10, 0.0004427343  ;;  %v1430_v9 = vand.u32 2147483647, %v7668_v27 }
 0x175   : > { %7676 = vst [vmem:[#allocation3_spill] sm:$0xff] %v5816_v15  ;;  %v5821_v57 = vpop.f32.mrb[58].mxu0  ;;  %v2046_v34 = vpack.c.bf16 %v1990_v36, %v1989_v32  ;;  %v1115_v16 = vmin.f32 %v5838_v35, 14.0  ;;  %v7690_v55 = vld [vmem:[#allocation34_spill] sm:$0xff]  ;;  %v5874_v10 = vmul.f32 0.5, %v5842_v61  ;;  %v1429_v32 = vmul.f32 %v7668_v27, %v1428_v0  ;;  %v7695_v58 = vld [vmem:[#allocation9_spill] sm:$0xff] }
 0x176   : > { %7677 = vst [vmem:[#allocation5_spill] sm:$0xff] %v5821_v57  ;;  %v5825_v38 = vpop.f32.mrb[59].mxu0  ;;  %v1420_v57 = vmul.f32 %v5516_v51, %v1419_v3  ;;  %v1437_v3 = vadd.f32 1.0, %v1436_v6  ;;  %v1451_v20 = vadd.f32 1.0, %v7690_v55  ;;  %v4699_v46 = vpop.eup %4698  ;;  %v1439_v47 = vand.u32 2147483647, %v7675_v2 }
 0x177   : > { %7678 = vst [vmem:[#allocation25_spill] sm:$0xff] %v5825_v38  ;;  %v1417_v38 = vmul.f32 0.6931472, %v4697_v1  ;;  %4380 = vmatmul.mubr.bf16.gmra.mrb[12].mxu1 %v2046_v34  ;;  %v5880_v36 = vadd.f32 %v5801_v18, %v5604_v40  ;;  %v5886_v6 = vadd.f32 %v5801_v18, %v5614_v11  ;;  %vm1929_vm3 = vcmp.gt.f32.partialorder %v7695_v58, 14.0  ;;  %v7696_v61 = vld [vmem:[#allocation15_spill] sm:$0xff] }
 0x178   : > { %4708 = vlog2.f32 %v1451_v20  ;;  %v4701_v13 = vpop.eup %4700  ;;  %vm1930_vm4 = vcmp.gt.f32.partialorder %v7696_v61, 14.0  ;;  %v1118_v27 = vmin.f32 %v5858_v52, 14.0  ;;  %vm1431_vm5 = vcmp.lt.f32.partialorder %v1430_v9, 0.0004427343 }
 0x179   : > { %v1423_v51 = vsel %vm5860_vm2, %v1420_v57, %v1417_v38  ;;  %7692 = vst [vmem:[#allocation14_spill] sm:$0xff] %v5880_v36  ;;  %v1426_v57 = vmul.f32 0.6931472, %v4699_v46  ;;  %v1446_v38 = vadd.f32 1.0, %v1445_v60  ;;  %7694 = vst [vmem:[#allocation34_spill] sm:$0xff] %v5886_v6  ;;  %4710 = vpow2.f32 %v1219_v54 }
 0x17a   : > { %v1863_v40 = vmul.f32 2.0, %v1423_v51  ;;  %v1438_v46 = vmul.f32 %v7675_v2, %v1437_v3  ;;  %v1448_v60 = vand.u32 2147483647, %v7679_v50  ;;  %v1116_v11 = vmin.f32 %v5874_v10, 14.0  ;;  %v7699_v3 = vld [vmem:[#allocation10_spill] sm:$0xff] }
 0x17b   : > { %v5855_v15 = vpop.f32.mrb[60].mxu0  ;;  %v1432_v0 = vsel %vm1431_vm5, %v1429_v32, %v1426_v57  ;;  %vm1440_vm6 = vcmp.lt.f32.partialorder %v1439_v47, 0.0004427343  ;;  %v1447_v9 = vmul.f32 %v7679_v50, %v1446_v38  ;;  %v5901_v51 = vmul.f32 0.5, %v5886_v6  ;;  %v7700_v57 = vld [vmem:[#allocation12_spill] sm:$0xff] }
 0x17c   : > { %v5865_v56 = vpop.f32.mrb[61].mxu0  ;;  %v1864_v20 = vmul.f32 2.0, %v1432_v0  ;;  %v5905_v2 = vadd.f32 %v5801_v18, %v5619_v19  ;;  %v1991_v32 = vsel %vm1927_vm0, %v7699_v3, %v1863_v40  ;;  %v1215_v50 = vmul.f32 1.442695, %v1115_v16 }
 0x17d   : > { %7689 = vst [vmem:[#allocation2_spill] sm:$0xff] %v5865_v56  ;;  %v5871_v1 = vpop.f32.mrb[62].mxu0  ;;  %v5897_v56 = vmul.f32 0.5, %v5880_v36  ;;  %vm1449_vm7 = vcmp.lt.f32.partialorder %v1448_v60, 0.0004427343  ;;  %v1454_v31 = vmul.f32 -0.5, %v7690_v55 }
 0x17e   : > { %7691 = vst [vmem:[#allocation4_spill] sm:$0xff] %v5871_v1  ;;  %v5882_v34 = vpop.f32.mrb[63].mxu0  ;;  %v1435_v1 = vmul.f32 0.6931472, %v4701_v13  ;;  %7698 = vst [vmem:[#allocation15_spill] sm:$0xff] %v5905_v2  ;;  %v1992_v47 = vsel %vm1928_vm1, %v7700_v57, %v1864_v20  ;;  %v1460_v40 = vadd.f32 1.0, %v5621_v23 }
 0x17f   : > { %7693 = vst [vmem:[#allocation17_spill] sm:$0xff] %v5882_v34  ;;  %v5893_v34 = vpop.eup %4702  ;;  %7697 = vst [vmem:[#allocation9_spill] sm:$0xff] %v5897_v56  ;;  %v2047_v38 = vpack.c.bf16 %v1992_v47, %v1991_v32  ;;  %v1221_v19 = vmul.f32 1.442695, %v1118_v27  ;;  %v1217_v3 = vmul.f32 1.442695, %v1116_v11 }
 0x180   : > { %v4705_v54 = vpop.eup %4704  ;;  %v1441_v35 = vsel %vm1440_vm6, %v1438_v46, %v1435_v1  ;;  %v5915_v1 = vadd.f32 %v5801_v18, %v5632_v37  ;;  %v1121_v20 = vmin.f32 %v5897_v56, 14.0  ;;  %v1119_v16 = vmin.f32 %v5901_v51, 14.0  ;;  %v7705_v32 = vld [vmem:[#allocation11_spill] sm:$0xff] }
 0x181   : > { %v1444_v13 = vmul.f32 0.6931472, %v4705_v54  ;;  %v1865_v0 = vmul.f32 2.0, %v1441_v35  ;;  %v5917_v46 = vpop.eup %4706  ;;  %4383 = vmatprep.mubr.bf16.mxu1 %v2047_v38  ;;  %v7702_v54 = vld [vmem:[#allocation33_spill] sm:$0xff]  ;;  %v5925_v60 = vmul.f32 0.5, %v5905_v2  ;;  %4712 = vlog2.f32 %v1460_v40 }
 0x182   : > { %7701 = vst [vmem:[#allocation10_spill] sm:$0xff] %v5915_v1  ;;  %v1469_v37 = vadd.f32 1.0, %v7702_v54  ;;  %v5928_v35 = vmul.f32 0.5, %v5915_v1  ;;  %v4709_v27 = vpop.eup %4708  ;;  %v1478_v57 = vadd.f32 1.0, %v5582_v12  ;;  %v1455_v38 = vadd.f32 1.0, %v1454_v31 }
 0x183   : > { %v1450_v36 = vsel %vm1449_vm7, %v1447_v9, %v1444_v13  ;;  %7703 = vst [vmem:[#allocation12_spill] sm:$0xff] %v5925_v60  ;;  %v7704_v9 = vld [vmem:[#allocation7_spill] sm:$0xff]  ;;  %v5937_v47 = vpop.eup %4710  ;;  %v1463_v2 = vmul.f32 -0.5, %v5621_v23  ;;  %v1227_v40 = vmul.f32 1.442695, %v1121_v20  ;;  %v1472_v58 = vmul.f32 -0.5, %v7702_v54 }
 0x184   : > { %v1866_v44 = vmul.f32 2.0, %v1450_v36  ;;  %v1993_v11 = vsel %vm1929_vm3, %v7704_v9, %v1865_v0  ;;  %4714 = vlog2.f32 %v1469_v37  ;;  %v1457_v1 = vand.u32 2147483647, %v7690_v55 }
 0x185   : > { %4716 = vpow2.f32 %v1215_v50  ;;  %v1223_v61 = vmul.f32 1.442695, %v1119_v16  ;;  %v1453_v0 = vmul.f32 0.6931472, %v4709_v27  ;;  %v1120_v37 = vmin.f32 %v5928_v35, 14.0  ;;  %v7708_v27 = vld [vmem:[#allocation19_spill] sm:$0xff] }
 0x186   : > { %v1994_v36 = vsel %vm1930_vm4, %v7705_v32, %v1866_v44  ;;  %4718 = vlog2.f32 %v1478_v57  ;;  %v1122_v44 = vmin.f32 %v5925_v60, 14.0  ;;  %v1481_v50 = vmul.f32 -0.5, %v5582_v12  ;;  %v7709_v32 = vld [vmem:[#allocation23_spill] sm:$0xff] }
 0x187   : > { %v2048_v13 = vpack.c.bf16 %v1994_v36, %v1993_v11  ;;  %4720 = vpow2.f32 %v1221_v19  ;;  %v1456_v31 = vmul.f32 %v7690_v55, %v1455_v38  ;;  %v1464_v9 = vadd.f32 1.0, %v1463_v2  ;;  %v7712_v38 = vld [vmem:[#allocation22_spill] sm:$0xff] }
 0x188   : > { %4722 = vpow2.f32 %v1217_v3  ;;  %v1466_v20 = vand.u32 2147483647, %v5621_v23  ;;  %v1487_v11 = vadd.f32 1.0, %v5692_v24  ;;  %vm5948_vm8 = vcmp.lt.f32.partialorder %v1457_v1, 0.0004427343 }
 0x189   : > { %4384 = vmatmul.mubr.bf16.gmra.mrb[16].mxu1 %v2048_v13  ;;  %4724 = vpow2.f32 %v1227_v40  ;;  %v1473_v16 = vadd.f32 1.0, %v1472_v58  ;;  %v1475_v3 = vand.u32 2147483647, %v7702_v54  ;;  %vm1931_vm9 = vcmp.gt.f32.partialorder %v7708_v27, 14.0  ;;  %v7711_v13 = vld [vmem:[#allocation18_spill] sm:$0xff] }
 0x18a   : > { %vm1932_vm10 = vcmp.gt.f32.partialorder %v7709_v32, 14.0  ;;  %4726 = vpow2.f32 %v1223_v61  ;;  %v1459_v55 = vsel %vm5948_vm8, %v1456_v31, %v1453_v0  ;;  %v1482_v2 = vadd.f32 1.0, %v1481_v50 }
 0x18b   : > { %v5959_v36 = vadd.f32 %v5801_v18, %v5656_v62  ;;  %v5963_v1 = vadd.f32 %v5801_v18, %v5664_v63  ;;  %4728 = vlog2.f32 %v1487_v11  ;;  %v4713_v57 = vpop.eup %4712  ;;  %vm1933_vm11 = vcmp.gt.f32.partialorder %v7711_v13, 14.0  ;;  %v7722_v13 = vld [vmem:[#allocation28_spill] sm:$0xff] }
 0x18c   : > { %vm1934_vm12 = vcmp.gt.f32.partialorder %v7712_v38, 14.0  ;;  %v1229_v40 = vmul.f32 1.442695, %v1122_v44  ;;  %v1225_v58 = vmul.f32 1.442695, %v1120_v37  ;;  %v1465_v61 = vmul.f32 %v5621_v23, %v1464_v9 }
 0x18d   : > { %7710 = vst [vmem:[#allocation33_spill] sm:$0xff] %v5959_v36  ;;  %vm5968_vm13 = vcmp.lt.f32.partialorder %v1466_v20, 0.0004427343  ;;  %v1462_v50 = vmul.f32 0.6931472, %v4713_v57  ;;  %v1474_v31 = vmul.f32 %v7702_v54, %v1473_v16  ;;  %v1867_v44 = vmul.f32 2.0, %v1459_v55 }
 0x18e   : > { %v4715_v62 = vpop.eup %4714  ;;  %vm5973_vm14 = vcmp.lt.f32.partialorder %v1475_v3, 0.0004427343  ;;  %v1484_v11 = vand.u32 2147483647, %v5582_v12  ;;  %v5982_v23 = vadd.f32 %v5801_v18, %v5675_v43  ;;  %v1496_v9 = vadd.f32 1.0, %v5739_v14 }
 0x18f   : > { %v5978_v19 = vpop.eup %4716  ;;  %v1471_v37 = vmul.f32 0.6931472, %v4715_v62  ;;  %v1468_v54 = vsel %vm5968_vm13, %v1465_v61, %v1462_v50  ;;  %v1483_v16 = vmul.f32 %v5582_v12, %v1482_v2  ;;  %v5989_v3 = vmul.f32 0.5, %v5959_v36  ;;  %v7718_v61 = vld [vmem:[#allocation16_spill] sm:$0xff]  ;;  %v7719_v50 = vld [vmem:[#allocation21_spill] sm:$0xff] }
 0x190   : > { %7717 = vst [vmem:[#allocation7_spill] sm:$0xff] %v5982_v23  ;;  %v4719_v20 = vpop.eup %4718  ;;  %v5992_v57 = vmul.f32 0.5, %v5963_v1  ;;  %v1868_v62 = vmul.f32 2.0, %v1468_v54  ;;  %v1490_v60 = vmul.f32 -0.5, %v5692_v24  ;;  %4730 = vpow2.f32 %v1229_v40 }
 0x191   : > { %v5994_v55 = vpop.eup %4720  ;;  %v1477_v43 = vsel %vm5973_vm14, %v1474_v31, %v1471_v37  ;;  %v1480_v6 = vmul.f32 0.6931472, %v4719_v20  ;;  %vm1485_vm15 = vcmp.lt.f32.partialorder %v1484_v11, 0.0004427343  ;;  %v6003_v2 = vadd.f32 %v5801_v18, %v5683_v22 }
 0x192   : > { %v5999_v56 = vpop.eup %4722  ;;  %v1869_v12 = vmul.f32 2.0, %v1477_v43  ;;  %v1995_v0 = vsel %vm1931_vm9, %v7718_v61, %v1867_v44  ;;  %v1996_v31 = vsel %vm1932_vm10, %v7719_v50, %v1868_v62  ;;  %4732 = vlog2.f32 %v1496_v9  ;;  %v7720_v9 = vld [vmem:[#allocation13_spill] sm:$0xff]  ;;  %v7721_v62 = vld [vmem:[#allocation20_spill] sm:$0xff] }
 0x193   : > { %v1486_v63 = vsel %vm1485_vm15, %v1483_v16, %v1480_v6  ;;  %v6011_v37 = vpop.eup %4724  ;;  %v2049_v20 = vpack.c.bf16 %v1996_v31, %v1995_v0  ;;  %v1125_v11 = vmin.f32 %v5989_v3, 14.0  ;;  %v6015_v54 = vmul.f32 0.5, %v5982_v23 }
 0x194   : > { %v1870_v40 = vmul.f32 2.0, %v1486_v63  ;;  %v6017_v22 = vpop.eup %4726  ;;  %v1123_v27 = vmin.f32 %v5992_v57, 14.0  ;;  %v1491_v44 = vadd.f32 1.0, %v1490_v60  ;;  %v1499_v43 = vmul.f32 -0.5, %v5739_v14 }
 0x195   : > { %v1505_v32 = vadd.f32 1.0, %v5666_v33  ;;  %v4729_v6 = vpop.eup %4728  ;;  %4387 = vmatprep.mubr.bf16.mxu1 %v2049_v20  ;;  %v1997_v16 = vsel %vm1933_vm11, %v7720_v9, %v1869_v12  ;;  %v1493_v0 = vand.u32 2147483647, %v5692_v24  ;;  %v1514_v50 = vadd.f32 1.0, %v5701_v25 }
 0x196   : > { %v1998_v61 = vsel %vm1934_vm12, %v7721_v62, %v1870_v40  ;;  %v1489_v60 = vmul.f32 0.6931472, %v4729_v6  ;;  %v1235_v63 = vmul.f32 1.442695, %v1125_v11  ;;  %v1126_v23 = vmin.f32 %v6015_v54, 14.0 }
 0x197   : > { %v2050_v31 = vpack.c.bf16 %v1998_v61, %v1997_v16  ;;  %4734 = vlog2.f32 %v1505_v32  ;;  %v6032_v20 = vmul.f32 0.5, %v6003_v2  ;;  %vm1935_vm0 = vcmp.gt.f32.partialorder %v7722_v13, 14.0 }
 0x198   : > { %4736 = vlog2.f32 %v1514_v50  ;;  %v1231_v12 = vmul.f32 1.442695, %v1123_v27  ;;  %v1492_v38 = vmul.f32 %v5692_v24, %v1491_v44  ;;  %v1500_v40 = vadd.f32 1.0, %v1499_v43 }
 0x199   : > { %4388 = vmatmul.mubr.bf16.gmra.mrb[20].mxu1 %v2050_v31  ;;  %v1508_v9 = vmul.f32 -0.5, %v5666_v33  ;;  %vm1936_vm1 = vcmp.gt.f32.partialorder %v5555_v49, 14.0  ;;  %4738 = vpow2.f32 %v1225_v58  ;;  %vm6038_vm2 = vcmp.lt.f32.partialorder %v1493_v0, 0.0004427343 }
 0x19a   : > { %v1517_v32 = vmul.f32 -0.5, %v5701_v25  ;;  %v1495_v6 = vsel %vm6038_vm2, %v1492_v38, %v1489_v60  ;;  %v1502_v16 = vand.u32 2147483647, %v5739_v14  ;;  %v6048_v24 = vadd.f32 %v5801_v18, %v5712_v39  ;;  %v6051_v44 = vpop.eup %4730 }
 0x19b   : > { %v1523_v27 = vadd.f32 1.0, %v5783_v17  ;;  %4740 = vpow2.f32 %v1235_v63  ;;  %v6053_v58 = vmul.f32 1.442695, %v1126_v23  ;;  %v1124_v43 = vmin.f32 %v6032_v20, 14.0  ;;  %v7728_v63 = vld [vmem:[#allocation27_spill] sm:$0xff] }
 0x19c   : > { %7725 = vst [vmem:[#allocation11_spill] sm:$0xff] %v6048_v24  ;;  %v1511_v62 = vand.u32 2147483647, %v5666_v33  ;;  %v4733_v61 = vpop.eup %4732  ;;  %4742 = vpow2.f32 %v1231_v12  ;;  %v1501_v0 = vmul.f32 %v5739_v14, %v1500_v40  ;;  %v1509_v50 = vadd.f32 1.0, %v1508_v9 }
 0x19d   : > { %v6060_v39 = vadd.f32 %v5801_v18, %v5718_v5  ;;  %v1498_v31 = vmul.f32 0.6931472, %v4733_v61  ;;  %v1871_v60 = vmul.f32 2.0, %v1495_v6  ;;  %v1518_v38 = vadd.f32 1.0, %v1517_v32 }
 0x19e   : > { %v6064_v23 = vadd.f32 %v5801_v18, %v5726_v8  ;;  %vm1937_vm3 = vcmp.gt.f32.partialorder %v7728_v63, 14.0  ;;  %vm1938_vm4 = vcmp.gt.f32.partialorder %v5548_v45, 14.0  ;;  %vm1503_vm5 = vcmp.lt.f32.partialorder %v1502_v16, 0.0004427343 }
 0x19f   : > { %7726 = vst [vmem:[#allocation19_spill] sm:$0xff] %v6060_v39  ;;  %v6069_v12 = vmul.f32 0.5, %v6048_v24  ;;  %v6073_v14 = vadd.f32 %v5801_v18, %v5735_v59  ;;  %4744 = vlog2.f32 %v1523_v27  ;;  %v1233_v5 = vmul.f32 1.442695, %v1124_v43  ;;  %v7733_v24 = vld [vmem:[#allocation26_spill] sm:$0xff] }
 0x1a0   : > { %7727 = vst [vmem:[#allocation23_spill] sm:$0xff] %v6064_v23  ;;  %v1504_v40 = vsel %vm1503_vm5, %v1501_v0, %v1498_v31  ;;  %vm6075_vm6 = vcmp.lt.f32.partialorder %v1511_v62, 0.0004427343  ;;  %v1520_v8 = vand.u32 2147483647, %v5701_v25  ;;  %v1510_v6 = vmul.f32 %v5666_v33, %v1509_v50  ;;  %v7735_v31 = vld [vmem:[#allocation30_spill] sm:$0xff] }
 0x1a1   : > { %7729 = vst [vmem:[#allocation18_spill] sm:$0xff] %v6069_v12  ;;  %7730 = vst [vmem:[#allocation22_spill] sm:$0xff] %v6073_v14  ;;  %v4735_v11 = vpop.eup %4734  ;;  %v1872_v32 = vmul.f32 2.0, %v1504_v40  ;;  %v6082_v16 = vmul.f32 0.5, %v6060_v39  ;;  %v1532_v61 = vadd.f32 1.0, %v5818_v41  ;;  %v1999_v27 = vsel %vm1935_vm0, %v7733_v24, %v1871_v60 }
 0x1a2   : > { %v4737_v59 = vpop.eup %4736  ;;  %v1507_v43 = vmul.f32 0.6931472, %v4735_v11  ;;  %v1519_v62 = vmul.f32 %v5701_v25, %v1518_v38  ;;  %v6090_v0 = vmul.f32 0.5, %v6064_v23  ;;  %v1129_v40 = vmin.f32 %v6069_v12, 14.0 }
 0x1a3   : > { %v2000_v33 = vsel %vm1936_vm1, %v7735_v31, %v1872_v32  ;;  %v1516_v50 = vmul.f32 0.6931472, %v4737_v59  ;;  %v6097_v39 = vmul.f32 0.5, %v6073_v14  ;;  %v6099_v36 = vpop.eup %4738  ;;  %vm1521_vm7 = vcmp.lt.f32.partialorder %v1520_v8, 0.0004427343 }
 0x1a4   : > { %7734 = vst [vmem:[#allocation16_spill] sm:$0xff] %v6090_v0  ;;  %v2051_v13 = vpack.c.bf16 %v2000_v33, %v1999_v27  ;;  %v1513_v24 = vsel %vm6075_vm6, %v1510_v6, %v1507_v43  ;;  %v1526_v25 = vmul.f32 -0.5, %v5783_v17  ;;  %v1127_v49 = vmin.f32 %v6082_v16, 14.0 }
 0x1a5   : > { %v1522_v60 = vsel %vm1521_vm7, %v1519_v62, %v1516_v50  ;;  %v1873_v38 = vmul.f32 2.0, %v1513_v24  ;;  %4746 = vlog2.f32 %v1532_v61  ;;  %v6105_v11 = vpop.eup %4740  ;;  %v1130_v59 = vmin.f32 %v6090_v0, 14.0  ;;  %v7736_v61 = vld [vmem:[#allocation24_spill] sm:$0xff]  ;;  %v7737_v50 = vld [vmem:[#allocation29_spill] sm:$0xff] }
 0x1a6   : > { %4391 = vmatprep.mubr.bf16.mxu1 %v2051_v13  ;;  %v1874_v32 = vmul.f32 2.0, %v1522_v60  ;;  %v1529_v31 = vand.u32 2147483647, %v5783_v17  ;;  %v1541_v27 = vadd.f32 1.0, %v5763_v4  ;;  %v6110_v9 = vpop.eup %4742  ;;  %v1243_v8 = vmul.f32 1.442695, %v1129_v40 }
 0x1a7   : > { %v1128_v6 = vmin.f32 %v6097_v39, 14.0  ;;  %v1535_v43 = vmul.f32 -0.5, %v5818_v41  ;;  %v1550_v62 = vadd.f32 1.0, %v5789_v48  ;;  %v2001_v33 = vsel %vm1937_vm3, %v7736_v61, %v1873_v38  ;;  %v6121_v60 = vpop.f32.mrb[64].mxu0 }
 0x1a8   : > { %v2002_v13 = vsel %vm1938_vm4, %v7737_v50, %v1874_v32  ;;  %v1527_v24 = vadd.f32 1.0, %v1526_v25  ;;  %4748 = vlog2.f32 %v1541_v27  ;;  %7738 = vst [vmem:[#allocation21_spill] sm:$0xff] %v6121_v60  ;;  %v1239_v14 = vmul.f32 1.442695, %v1127_v49  ;;  %v6124_v12 = vpop.f32.mrb[65].mxu0 }
 0x1a9   : > { %v4745_v23 = vpop.eup %4744  ;;  %v2052_v40 = vpack.c.bf16 %v2002_v13, %v2001_v33  ;;  %v1544_v0 = vmul.f32 -0.5, %v5763_v4  ;;  %4750 = vlog2.f32 %v1550_v62  ;;  %7739 = vst [vmem:[#allocation13_spill] sm:$0xff] %v6124_v12  ;;  %v1245_v63 = vmul.f32 1.442695, %v1130_v59  ;;  %v6128_v45 = vpop.f32.mrb[66].mxu0 }
 0x1aa   : > { %4752 = vpow2.f32 %v6053_v58  ;;  %v1525_v38 = vmul.f32 0.6931472, %v4745_v23  ;;  %v1553_v61 = vmul.f32 -0.5, %v5789_v48  ;;  %7740 = vst [vmem:[#allocation20_spill] sm:$0xff] %v6128_v45  ;;  %v1241_v25 = vmul.f32 1.442695, %v1128_v6 }
 0x1ab   : > { %4754 = vpow2.f32 %v1233_v5  ;;  %4392 = vmatmul.mubr.bf16.gmra.mrb[24].mxu1 %v2052_v40  ;;  %v1536_v32 = vadd.f32 1.0, %v1535_v43  ;;  %v1538_v27 = vand.u32 2147483647, %v5818_v41  ;;  %v6131_v49 = vpop.f32.mrb[67].mxu0  ;;  %vm1939_vm8 = vcmp.gt.f32.partialorder %v5617_v30, 14.0 }
 0x1ac   : > { %7741 = vst [vmem:[#allocation28_spill] sm:$0xff] %v6131_v49  ;;  %vm1940_vm9 = vcmp.gt.f32.partialorder %v5646_v7, 14.0  ;;  %4756 = vpow2.f32 %v1243_v8  ;;  %v1528_v58 = vmul.f32 %v5783_v17, %v1527_v24  ;;  %v6138_v23 = vadd.f32 %v5801_v18, %v5754_v53  ;;  %v6141_v59 = vpop.f32.mrb[68].mxu0 }
 0x1ad   : > { %v1559_v5 = vadd.f32 1.0, %v5830_v42  ;;  %7743 = vst [vmem:[#allocation26_spill] sm:$0xff] %v6141_v59  ;;  %4758 = vpow2.f32 %v1239_v14  ;;  %vm6143_vm10 = vcmp.lt.f32.partialorder %v1529_v31, 0.0004427343  ;;  %v1545_v43 = vadd.f32 1.0, %v1544_v0  ;;  %v6148_v33 = vpop.f32.mrb[69].mxu0 }
 0x1ae   : > { %7742 = vst [vmem:[#allocation27_spill] sm:$0xff] %v6138_v23  ;;  %v1547_v62 = vand.u32 2147483647, %v5763_v4  ;;  %7746 = vst [vmem:[#allocation30_spill] sm:$0xff] %v6148_v33  ;;  %v1531_v17 = vsel %vm6143_vm10, %v1528_v58, %v1525_v38  ;;  %v1554_v8 = vadd.f32 1.0, %v1553_v61  ;;  %v6153_v50 = vpop.f32.mrb[70].mxu0  ;;  %v1537_v14 = vmul.f32 %v5818_v41, %v1536_v32 }
 0x1af   : > { %v1556_v53 = vand.u32 2147483647, %v5789_v48  ;;  %4760 = vlog2.f32 %v1559_v5  ;;  %7747 = vst [vmem:[#allocation24_spill] sm:$0xff] %v6153_v50  ;;  %v4747_v13 = vpop.eup %4746  ;;  %vm6156_vm11 = vcmp.lt.f32.partialorder %v1538_v27, 0.0004427343  ;;  %v6162_v0 = vadd.f32 %v5801_v18, %v5761_v29  ;;  %v6164_v24 = vpop.f32.mrb[71].mxu0 }
 0x1b0   : > { %4762 = vpow2.f32 %v1245_v63  ;;  %7751 = vst [vmem:[#allocation52_spill] sm:$0xff] %v6164_v24  ;;  %vm1941_vm12 = vcmp.gt.f32.partialorder %v5601_v26, 14.0  ;;  %vm1942_vm13 = vcmp.gt.f32.partialorder %v5643_v28, 14.0  ;;  %v1534_v40 = vmul.f32 0.6931472, %v4747_v13  ;;  %v7752_v63 = vld [vmem:[#allocation47_spill] sm:$0xff] }
 0x1b1   : > { %7750 = vst [vmem:[#allocation29_spill] sm:$0xff] %v6162_v0  ;;  %v6169_v38 = vmul.f32 0.5, %v6138_v23  ;;  %v6173_v41 = vadd.f32 %v5801_v18, %v7752_v63  ;;  %v7754_v61 = vld [vmem:[#allocation49_spill] sm:$0xff]  ;;  %4764 = vpow2.f32 %v1241_v25  ;;  %v1875_v29 = vmul.f32 2.0, %v1531_v17  ;;  %v6184_v5 = vpop.f32.mrb[72].mxu0 }
 0x1b2   : > { %v6177_v32 = vadd.f32 %v5801_v18, %v7754_v61  ;;  %vm6179_vm14 = vcmp.lt.f32.partialorder %v1547_v62, 0.0004427343  ;;  %v1562_v58 = vmul.f32 -0.5, %v5830_v42  ;;  %7758 = vst [vmem:[#allocation53_spill] sm:$0xff] %v6184_v5  ;;  %v4749_v6 = vpop.eup %4748  ;;  %v1540_v13 = vsel %vm6156_vm11, %v1537_v14, %v1534_v40  ;;  %v6194_v25 = vpop.f32.mrb[73].mxu0  ;;  %v7789_v28 = vld [vmem:[#allocation25_spill] sm:$0xff] }
 0x1b3   : > { %7753 = vst [vmem:[#allocation47_spill] sm:$0xff] %v6173_v41  ;;  %v1546_v63 = vmul.f32 %v5763_v4, %v1545_v43  ;;  %v1555_v24 = vmul.f32 %v5789_v48, %v1554_v8  ;;  %vm6190_vm15 = vcmp.lt.f32.partialorder %v1556_v53, 0.0004427343  ;;  %7761 = vst [vmem:[#allocation54_spill] sm:$0xff] %v6194_v25  ;;  %v4751_v62 = vpop.eup %4750  ;;  %v1876_v17 = vmul.f32 2.0, %v1540_v13  ;;  %v6200_v31 = vpop.f32.mrb[74].mxu0 }
 0x1b4   : > { %7755 = vst [vmem:[#allocation49_spill] sm:$0xff] %v6177_v32  ;;  %v1543_v50 = vmul.f32 0.6931472, %v4749_v6  ;;  %v6197_v33 = vmul.f32 0.5, %v6162_v0  ;;  %v1568_v5 = vadd.f32 1.0, %v5917_v46  ;;  %7762 = vst [vmem:[#allocation55_spill] sm:$0xff] %v6200_v31  ;;  %v6202_v14 = vpop.eup %4752 }
 0x1b5   : > { %v1552_v4 = vmul.f32 0.6931472, %v4751_v62  ;;  %v1133_v48 = vmin.f32 %v6169_v38, 14.0  ;;  %v6206_v43 = vmul.f32 0.5, %v6173_v41  ;;  %v6209_v8 = vmul.f32 0.5, %v6177_v32  ;;  %v6211_v53 = vpop.f32.mrb[75].mxu0  ;;  %v6213_v40 = vpop.eup %4754 }
 0x1b6   : > { %7764 = vst [vmem:[#allocation57_spill] sm:$0xff] %v6211_v53  ;;  %v7765_v6 = vld [vmem:[#allocation36_spill] sm:$0xff]  ;;  %v7766_v31 = vld [vmem:[#allocation38_spill] sm:$0xff]  ;;  %v1549_v25 = vsel %vm6179_vm14, %v1546_v63, %v1543_v50  ;;  %v1563_v59 = vadd.f32 1.0, %v1562_v58  ;;  %v6223_v49 = vpop.f32.mrb[76].mxu0  ;;  %v6225_v45 = vpop.eup %4756  ;;  %4766 = vlog2.f32 %v1568_v5  ;;  %v1577_v27 = vadd.f32 1.0, %v5827_v21 }
 0x1b7   : > { %7763 = vst [vmem:[#allocation56_spill] sm:$0xff] %v6206_v43  ;;  %v2003_v13 = vsel %vm1939_vm8, %v7765_v6, %v1875_v29  ;;  %v2004_v62 = vsel %vm1940_vm9, %v7766_v31, %v1876_v17  ;;  %7767 = vst [vmem:[#allocation36_spill] sm:$0xff] %v6223_v49  ;;  %v1558_v53 = vsel %vm6190_vm15, %v1555_v24, %v1552_v4  ;;  %v1877_v60 = vmul.f32 2.0, %v1549_v25  ;;  %v6229_v30 = vpop.f32.mrb[77].mxu0  ;;  %v6231_v29 = vpop.eup %4758 }
 0x1b8   : > { %v2053_v12 = vpack.c.bf16 %v2004_v62, %v2003_v13  ;;  %7768 = vst [vmem:[#allocation38_spill] sm:$0xff] %v6229_v30  ;;  %v1878_v7 = vmul.f32 2.0, %v1558_v53  ;;  %v1131_v17 = vmin.f32 %v6197_v33, 14.0  ;;  %v1565_v50 = vand.u32 2147483647, %v5830_v42  ;;  %v6236_v58 = vpop.f32.mrb[78].mxu0 }
 0x1b9   : > { %7769 = vst [vmem:[#allocation58_spill] sm:$0xff] %v6236_v58  ;;  %v4761_v63 = vpop.eup %4760  ;;  %v1251_v31 = vmul.f32 1.442695, %v1133_v48  ;;  %v1134_v24 = vmin.f32 %v6206_v43, 14.0  ;;  %v1571_v5 = vmul.f32 -0.5, %v5917_v46  ;;  %v1586_v61 = vadd.f32 1.0, %v5893_v34 }
 0x1ba   : > { %4395 = vmatprep.mubr.bf16.mxu1 %v2053_v12  ;;  %v6241_v25 = vpop.f32.mrb[79].mxu0  ;;  %v6243_v4 = vpop.eup %4762  ;;  %v7771_v53 = vld [vmem:[#allocation35_spill] sm:$0xff]  ;;  %v7772_v13 = vld [vmem:[#allocation37_spill] sm:$0xff]  ;;  %v1561_v12 = vmul.f32 0.6931472, %v4761_v63  ;;  %4768 = vlog2.f32 %v1577_v27  ;;  %v7774_v58 = vld [vmem:[#allocation42_spill] sm:$0xff] }
 0x1bb   : > { %7770 = vst [vmem:[#allocation59_spill] sm:$0xff] %v6241_v25  ;;  %v2005_v6 = vsel %vm1941_vm12, %v7771_v53, %v1877_v60  ;;  %v2006_v62 = vsel %vm1942_vm13, %v7772_v13, %v1878_v7  ;;  %v6251_v48 = vpop.f32.mrb[80].mxu0  ;;  %vm1943_vm0 = vcmp.gt.f32.partialorder %v7774_v58, 14.0  ;;  %v1132_v49 = vmin.f32 %v6209_v8, 14.0  ;;  %v6258_v26 = vpop.eup %4764  ;;  %v7778_v27 = vld [vmem:[#allocation32_spill] sm:$0xff]  ;;  %v7795_v43 = vld [vmem:[#allocation45_spill] sm:$0xff] }
 0x1bc   : > { %7773 = vst [vmem:[#allocation35_spill] sm:$0xff] %v6251_v48  ;;  %v2054_v30 = vpack.c.bf16 %v2006_v62, %v2005_v6  ;;  %v1564_v25 = vmul.f32 %v5830_v42, %v1563_v59  ;;  %4770 = vlog2.f32 %v1586_v61  ;;  %v6256_v41 = vpop.f32.mrb[81].mxu0  ;;  %v1247_v60 = vmul.f32 1.442695, %v1131_v17  ;;  %v7782_v61 = vld [vmem:[#allocation46_spill] sm:$0xff] }
 0x1bd   : > { %7775 = vst [vmem:[#allocation37_spill] sm:$0xff] %v6256_v41  ;;  %vm6260_vm1 = vcmp.lt.f32.partialorder %v1565_v50, 0.0004427343  ;;  %v1580_v7 = vmul.f32 -0.5, %v5827_v21  ;;  %v6267_v63 = vadd.f32 %v5801_v18, %v7778_v27  ;;  %v6269_v53 = vpop.f32.mrb[82].mxu0  ;;  %4772 = vpow2.f32 %v1251_v31  ;;  %v7784_v27 = vld [vmem:[#allocation3_spill] sm:$0xff] }
 0x1be   : > { %7780 = vst [vmem:[#allocation32_spill] sm:$0xff] %v6269_v53  ;;  %4396 = vmatmul.mubr.bf16.gmra.mrb[28].mxu1 %v2054_v30  ;;  %v1253_v42 = vmul.f32 1.442695, %v1134_v24  ;;  %v1567_v59 = vsel %vm6260_vm1, %v1564_v25, %v1561_v12  ;;  %v1589_v17 = vmul.f32 -0.5, %v5893_v34  ;;  %v6274_v50 = vpop.f32.mrb[83].mxu0  ;;  %vm1944_vm2 = vcmp.gt.f32.partialorder %v7782_v61, 14.0 }
 0x1bf   : > { %7779 = vst [vmem:[#allocation42_spill] sm:$0xff] %v6267_v63  ;;  %7781 = vst [vmem:[#allocation60_spill] sm:$0xff] %v6274_v50  ;;  %v1572_v6 = vadd.f32 1.0, %v1571_v5  ;;  %v1574_v13 = vand.u32 2147483647, %v5917_v46  ;;  %v6279_v62 = vmul.f32 0.5, %v6267_v63  ;;  %v6283_v30 = vadd.f32 %v5801_v18, %v7784_v27 }
 0x1c0   : > { %v6285_v31 = vpop.f32.mrb[84].mxu0  ;;  %v1583_v24 = vand.u32 2147483647, %v5827_v21  ;;  %v7787_v25 = vld [vmem:[#allocation5_spill] sm:$0xff]  ;;  %v6294_v5 = vadd.f32 %v5801_v18, %v7789_v28  ;;  %v1595_v50 = vadd.f32 1.0, %v5978_v19  ;;  %4774 = vpow2.f32 %v1247_v60  ;;  %v4767_v63 = vpop.eup %4766 }
 0x1c1   : > { %7783 = vst [vmem:[#allocation46_spill] sm:$0xff] %v6279_v62  ;;  %7785 = vst [vmem:[#allocation3_spill] sm:$0xff] %v6283_v30  ;;  %v6290_v12 = vadd.f32 %v5801_v18, %v7787_v25  ;;  %v6297_v53 = vpop.f32.mrb[85].mxu0  ;;  %v1879_v41 = vmul.f32 2.0, %v1567_v59  ;;  %v1581_v27 = vadd.f32 1.0, %v1580_v7  ;;  %4776 = vpow2.f32 %v1253_v42  ;;  %v7794_v28 = vld [vmem:[#allocation41_spill] sm:$0xff] }
 0x1c2   : > { %7786 = vst [vmem:[#allocation61_spill] sm:$0xff] %v6285_v31  ;;  %7790 = vst [vmem:[#allocation25_spill] sm:$0xff] %v6294_v5  ;;  %v1592_v48 = vand.u32 2147483647, %v5893_v34  ;;  %v6300_v31 = vpop.f32.mrb[86].mxu0  ;;  %v1590_v25 = vadd.f32 1.0, %v1589_v17  ;;  %v1573_v60 = vmul.f32 %v5917_v46, %v1572_v6  ;;  %4778 = vlog2.f32 %v1595_v50 }
 0x1c3   : > { %7788 = vst [vmem:[#allocation5_spill] sm:$0xff] %v6290_v12  ;;  %7791 = vst [vmem:[#allocation62_spill] sm:$0xff] %v6297_v53  ;;  %v1249_v23 = vmul.f32 1.442695, %v1132_v49  ;;  %v1137_v32 = vmin.f32 %v6279_v62, 14.0  ;;  %v6303_v0 = vpop.f32.mrb[87].mxu0 }
 0x1c4   : > { %7792 = vst [vmem:[#allocation63_spill] sm:$0xff] %v6300_v31  ;;  %7793 = vst [vmem:[#allocation64_spill] sm:$0xff] %v6303_v0  ;;  %vm1945_vm3 = vcmp.gt.f32.partialorder %v7794_v28, 14.0  ;;  %vm1946_vm4 = vcmp.gt.f32.partialorder %v7795_v43, 14.0  ;;  %v1570_v53 = vmul.f32 0.6931472, %v4767_v63  ;;  %v4769_v63 = vpop.eup %4768  ;;  %v1591_v50 = vmul.f32 %v5893_v34, %v1590_v25 }
 0x1c5   : > { %vm1575_vm5 = vcmp.lt.f32.partialorder %v1574_v13, 0.0004427343  ;;  %v6309_v7 = vmul.f32 0.5, %v6283_v30  ;;  %vm6311_vm6 = vcmp.lt.f32.partialorder %v1583_v24, 0.0004427343  ;;  %v6316_v49 = vmul.f32 0.5, %v6290_v12 }
 0x1c6   : > { %v6319_v42 = vmul.f32 0.5, %v6294_v5  ;;  %v6321_v17 = vpop.f32.mrb[88].mxu0  ;;  %v1576_v0 = vsel %vm1575_vm5, %v1573_v60, %v1570_v53  ;;  %v7799_v46 = vld [vmem:[#allocation40_spill] sm:$0xff]  ;;  %v1582_v13 = vmul.f32 %v5827_v21, %v1581_v27  ;;  %vm6327_vm7 = vcmp.lt.f32.partialorder %v1592_v48, 0.0004427343  ;;  %v4771_v12 = vpop.eup %4770 }
 0x1c7   : > { %7798 = vst [vmem:[#allocation41_spill] sm:$0xff] %v6321_v17  ;;  %v2007_v6 = vsel %vm1943_vm0, %v7799_v46, %v1879_v41  ;;  %v6331_v31 = vpop.f32.mrb[89].mxu0  ;;  %v1880_v62 = vmul.f32 2.0, %v1576_v0  ;;  %v1579_v5 = vmul.f32 0.6931472, %v4769_v63  ;;  %v1135_v58 = vmin.f32 %v6309_v7, 14.0  ;;  %v6341_v27 = vpop.eup %4772 }
 0x1c8   : > { %7802 = vst [vmem:[#allocation45_spill] sm:$0xff] %v6331_v31  ;;  %v1259_v17 = vmul.f32 1.442695, %v1137_v32  ;;  %v6334_v30 = vpop.f32.mrb[90].mxu0  ;;  %v1588_v53 = vmul.f32 0.6931472, %v4771_v12 }
 0x1c9   : > { %7803 = vst [vmem:[#allocation40_spill] sm:$0xff] %v6334_v30  ;;  %v1598_v41 = vmul.f32 -0.5, %v5978_v19  ;;  %v1604_v21 = vadd.f32 1.0, %v5999_v56  ;;  %v6339_v48 = vpop.f32.mrb[91].mxu0  ;;  %v7805_v60 = vld [vmem:[#allocation44_spill] sm:$0xff]  ;;  %v1585_v34 = vsel %vm6311_vm6, %v1582_v13, %v1579_v5  ;;  %v1138_v32 = vmin.f32 %v6316_v49, 14.0 }
 0x1ca   : > { %7804 = vst [vmem:[#allocation65_spill] sm:$0xff] %v6339_v48  ;;  %v2008_v0 = vsel %vm1944_vm2, %v7805_v60, %v1880_v62  ;;  %v1136_v12 = vmin.f32 %v6319_v42, 14.0  ;;  %v6350_v25 = vpop.f32.mrb[92].mxu0  ;;  %v1594_v46 = vsel %vm6327_vm7, %v1591_v50, %v1588_v53  ;;  %v1881_v48 = vmul.f32 2.0, %v1585_v34  ;;  %v6360_v13 = vpop.eup %4774 }
 0x1cb   : > { %7806 = vst [vmem:[#allocation44_spill] sm:$0xff] %v6350_v25  ;;  %v2055_v63 = vpack.c.bf16 %v2008_v0, %v2007_v6  ;;  %4780 = vlog2.f32 %v1604_v21  ;;  %v6354_v30 = vpop.f32.mrb[93].mxu0  ;;  %v1882_v61 = vmul.f32 2.0, %v1594_v46  ;;  %v1601_v62 = vand.u32 2147483647, %v5978_v19  ;;  %v6365_v53 = vpop.eup %4776  ;;  %v7811_v0 = vld [vmem:[#allocation43_spill] sm:$0xff] }
 0x1cc   : > { %7807 = vst [vmem:[#allocation66_spill] sm:$0xff] %v6354_v30  ;;  %4782 = vpow2.f32 %v1249_v23  ;;  %v1613_v5 = vadd.f32 1.0, %v5937_v47  ;;  %v6358_v59 = vpop.f32.mrb[94].mxu0  ;;  %v1255_v6 = vmul.f32 1.442695, %v1135_v58  ;;  %v1599_v60 = vadd.f32 1.0, %v1598_v41 }
 0x1cd   : > { %7808 = vst [vmem:[#allocation67_spill] sm:$0xff] %v6358_v59  ;;  %4399 = vmatprep.mubr.bf16.mxu1 %v2055_v63  ;;  %4784 = vpow2.f32 %v1259_v17  ;;  %v1622_v24 = vadd.f32 1.0, %v5994_v55  ;;  %v6363_v50 = vpop.f32.mrb[95].mxu0  ;;  %v7810_v23 = vld [vmem:[#allocation39_spill] sm:$0xff]  ;;  %v2010_v34 = vsel %vm1946_vm4, %v7811_v0, %v1882_v61  ;;  %v1607_v46 = vmul.f32 -0.5, %v5999_v56  ;;  %v4779_v59 = vpop.eup %4778 }
 0x1ce   : > { %7809 = vst [vmem:[#allocation68_spill] sm:$0xff] %v6363_v50  ;;  %v2009_v21 = vsel %vm1945_vm3, %v7810_v23, %v1881_v48  ;;  %4786 = vlog2.f32 %v1613_v5  ;;  %v6374_v17 = vpop.f32.mrb[96].mxu0  ;;  %v1261_v41 = vmul.f32 1.442695, %v1138_v32  ;;  %v1257_v63 = vmul.f32 1.442695, %v1136_v12 }
 0x1cf   : > { %7812 = vst [vmem:[#allocation39_spill] sm:$0xff] %v6374_v17  ;;  %v2056_v58 = vpack.c.bf16 %v2010_v34, %v2009_v21  ;;  %4788 = vlog2.f32 %v1622_v24  ;;  %v6376_v50 = vpop.f32.mrb[97].mxu0  ;;  %vm6378_vm8 = vcmp.lt.f32.partialorder %v1601_v62, 0.0004427343  ;;  %v1616_v28 = vmul.f32 -0.5, %v5937_v47  ;;  %v7818_v32 = vld [vmem:[#allocation50_spill] sm:$0xff] }
 0x1d0   : > { %7813 = vst [vmem:[#allocation43_spill] sm:$0xff] %v6376_v50  ;;  %v1625_v43 = vmul.f32 -0.5, %v5994_v55  ;;  %v6386_v48 = vadd.f32 %v5801_v18, %v5855_v15  ;;  %v6388_v61 = vpop.f32.mrb[98].mxu0  ;;  %vm1947_vm9 = vcmp.gt.f32.partialorder %v7818_v32, 14.0  ;;  %v1597_v12 = vmul.f32 0.6931472, %v4779_v59 }
 0x1d1   : > { %7817 = vst [vmem:[#allocation70_spill] sm:$0xff] %v6388_v61  ;;  %4400 = vmatmul.mubr.bf16.gmra.mrb[32].mxu1 %v2056_v58  ;;  %v1600_v5 = vmul.f32 %v5978_v19, %v1599_v60  ;;  %v7819_v62 = vld [vmem:[#allocation2_spill] sm:$0xff]  ;;  %v7821_v23 = vld [vmem:[#allocation4_spill] sm:$0xff]  ;;  %v6400_v0 = vpop.f32.mrb[99].mxu0  ;;  %4790 = vpow2.f32 %v1255_v6  ;;  %v1608_v15 = vadd.f32 1.0, %v1607_v46  ;;  %v7826_v58 = vld [vmem:[#allocation17_spill] sm:$0xff] }
 0x1d2   : > { %7816 = vst [vmem:[#allocation69_spill] sm:$0xff] %v6386_v48  ;;  %v6394_v24 = vadd.f32 %v5801_v18, %v7819_v62  ;;  %v6398_v21 = vadd.f32 %v5801_v18, %v7821_v23  ;;  %7823 = vst [vmem:[#allocation4_spill] sm:$0xff] %v6400_v0  ;;  %v1610_v34 = vand.u32 2147483647, %v5999_v56  ;;  %v6404_v61 = vmul.f32 0.5, %v6386_v48  ;;  %v6406_v59 = vpop.f32.mrb[100].mxu0 }
 0x1d3   : > { %7825 = vst [vmem:[#allocation72_spill] sm:$0xff] %v6406_v59  ;;  %v1603_v19 = vsel %vm6378_vm8, %v1600_v5, %v1597_v12  ;;  %v1619_v60 = vand.u32 2147483647, %v5937_v47  ;;  %v6413_v62 = vadd.f32 %v5801_v18, %v7826_v58  ;;  %v1631_v23 = vadd.f32 1.0, %v6017_v22  ;;  %v6416_v6 = vpop.f32.mrb[101].mxu0 }
 0x1d4   : > { %7820 = vst [vmem:[#allocation50_spill] sm:$0xff] %v6394_v24  ;;  %7822 = vst [vmem:[#allocation2_spill] sm:$0xff] %v6398_v21  ;;  %4792 = vpow2.f32 %v1261_v41  ;;  %v1617_v46 = vadd.f32 1.0, %v1616_v28  ;;  %v1626_v0 = vadd.f32 1.0, %v1625_v43  ;;  %v1628_v50 = vand.u32 2147483647, %v5994_v55 }
 0x1d5   : > { %7824 = vst [vmem:[#allocation71_spill] sm:$0xff] %v6404_v61  ;;  %7827 = vst [vmem:[#allocation17_spill] sm:$0xff] %v6413_v62  ;;  %v6419_v17 = vpop.f32.mrb[102].mxu0  ;;  %v4781_v59 = vpop.eup %4780  ;;  %vm1948_vm10 = vcmp.gt.f32.partialorder %v5874_v10, 14.0  ;;  %4794 = vpow2.f32 %v1257_v63  ;;  %v6423_v30 = vmul.f32 0.5, %v6394_v24  ;;  %v6426_v18 = vmul.f32 0.5, %v6398_v21 }
 0x1d6   : > { %7828 = vst [vmem:[#allocation73_spill] sm:$0xff] %v6416_v6  ;;  %7829 = vst [vmem:[#allocation74_spill] sm:$0xff] %v6419_v17  ;;  %v6428_v12 = vpop.f32.mrb[103].mxu0  ;;  %v6430_v5 = vpop.eup %4782  ;;  %v7832_v41 = vld [vmem:[#allocation6_spill] sm:$0xff]  ;;  %vm1950_vm12 = vcmp.gt.f32.partialorder %v5858_v52, 14.0  ;;  %v1609_v43 = vmul.f32 %v5999_v56, %v1608_v15  ;;  %v1883_v58 = vmul.f32 2.0, %v1603_v19  ;;  %4796 = vlog2.f32 %v1631_v23 }
 0x1d7   : > { %7830 = vst [vmem:[#allocation75_spill] sm:$0xff] %v6426_v18  ;;  %7831 = vst [vmem:[#allocation76_spill] sm:$0xff] %v6428_v12  ;;  %vm1949_vm11 = vcmp.gt.f32.partialorder %v7832_v41, 14.0  ;;  %v1606_v28 = vmul.f32 0.6931472, %v4781_v59  ;;  %v1141_v63 = vmin.f32 %v6404_v61, 14.0  ;;  %v6438_v6 = vpop.eup %4784  ;;  %v1618_v15 = vmul.f32 %v5937_v47, %v1617_v46 }
 0x1d8   : > { %v6436_v17 = vpop.f32.mrb[104].mxu0  ;;  %vm1611_vm13 = vcmp.lt.f32.partialorder %v1610_v34, 0.0004427343  ;;  %vm6440_vm14 = vcmp.lt.f32.partialorder %v1619_v60, 0.0004427343  ;;  %v6445_v12 = vmul.f32 0.5, %v6413_v62  ;;  %v4787_v59 = vpop.eup %4786  ;;  %v1627_v19 = vmul.f32 %v5994_v55, %v1626_v0 }
 0x1d9   : > { %7833 = vst [vmem:[#allocation6_spill] sm:$0xff] %v6436_v17  ;;  %v6447_v31 = vpop.f32.mrb[105].mxu0  ;;  %v1612_v56 = vsel %vm1611_vm13, %v1609_v43, %v1606_v28  ;;  %vm6451_vm15 = vcmp.lt.f32.partialorder %v1628_v50, 0.0004427343  ;;  %v4789_v60 = vpop.eup %4788  ;;  %v1615_v48 = vmul.f32 0.6931472, %v4787_v59 }
 0x1da   : > { %7836 = vst [vmem:[#allocation77_spill] sm:$0xff] %v6447_v31  ;;  %v6455_v34 = vpop.f32.mrb[106].mxu0  ;;  %v1884_v21 = vmul.f32 2.0, %v1612_v56  ;;  %v1139_v61 = vmin.f32 %v6423_v30, 14.0  ;;  %v1142_v23 = vmin.f32 %v6426_v18, 14.0  ;;  %v7841_v28 = vld [vmem:[#allocation8_spill] sm:$0xff] }
 0x1db   : > { %7839 = vst [vmem:[#allocation78_spill] sm:$0xff] %v6455_v34  ;;  %v6459_v31 = vpop.f32.mrb[107].mxu0  ;;  %v2011_v47 = vsel %vm1947_vm9, %v7841_v28, %v1883_v58  ;;  %v1624_v55 = vmul.f32 0.6931472, %v4789_v60  ;;  %v1267_v50 = vmul.f32 1.442695, %v1141_v63  ;;  %v1621_v59 = vsel %vm6440_vm14, %v1618_v15, %v1615_v48  ;;  %v6474_v18 = vpop.eup %4790 }
 0x1dc   : > { %7840 = vst [vmem:[#allocation79_spill] sm:$0xff] %v6459_v31  ;;  %v1634_v0 = vmul.f32 -0.5, %v6017_v22  ;;  %v7842_v46 = vld [vmem:[#allocation51_spill] sm:$0xff]  ;;  %v1140_v56 = vmin.f32 %v6445_v12, 14.0  ;;  %v1640_v34 = vadd.f32 1.0, %v6099_v36  ;;  %v6472_v31 = vpop.f32.mrb[108].mxu0 }
 0x1dd   : > { %v2012_v43 = vsel %vm1948_vm10, %v7842_v46, %v1884_v21  ;;  %7843 = vst [vmem:[#allocation8_spill] sm:$0xff] %v6472_v31  ;;  %v1630_v58 = vsel %vm6451_vm15, %v1627_v19, %v1624_v55  ;;  %v1885_v63 = vmul.f32 2.0, %v1621_v59  ;;  %v1637_v60 = vand.u32 2147483647, %v6017_v22  ;;  %v6479_v10 = vpop.f32.mrb[109].mxu0 }
 0x1de   : > { %v2057_v32 = vpack.c.bf16 %v2012_v43, %v2011_v47  ;;  %7844 = vst [vmem:[#allocation51_spill] sm:$0xff] %v6479_v10  ;;  %v1886_v21 = vmul.f32 2.0, %v1630_v58  ;;  %v1263_v25 = vmul.f32 1.442695, %v1139_v61  ;;  %4798 = vlog2.f32 %v1640_v34  ;;  %v6482_v15 = vpop.f32.mrb[110].mxu0  ;;  %v6484_v28 = vpop.eup %4792  ;;  %v7847_v43 = vld [vmem:[#allocation48_spill] sm:$0xff] }
 0x1df   : > { %v1643_v48 = vmul.f32 -0.5, %v6099_v36  ;;  %7845 = vst [vmem:[#allocation80_spill] sm:$0xff] %v6482_v15  ;;  %4800 = vpow2.f32 %v1267_v50  ;;  %v1269_v47 = vmul.f32 1.442695, %v1142_v23  ;;  %v1635_v46 = vadd.f32 1.0, %v1634_v0  ;;  %v6487_v19 = vpop.f32.mrb[111].mxu0  ;;  %v6489_v55 = vpop.eup %4794 }
 0x1e0   : > { %4403 = vmatprep.mubr.bf16.mxu1 %v2057_v32  ;;  %v1649_v17 = vadd.f32 1.0, %v6011_v37  ;;  %7846 = vst [vmem:[#allocation81_spill] sm:$0xff] %v6487_v19  ;;  %v2013_v61 = vsel %vm1949_vm11, %v7847_v43, %v1885_v63  ;;  %v7848_v34 = vld [vmem:[#allocation31_spill] sm:$0xff]  ;;  %v1652_v58 = vmul.f32 -0.5, %v6011_v37  ;;  %v1658_v50 = vadd.f32 1.0, %v6051_v44  ;;  %v4797_v19 = vpop.eup %4796 }
 0x1e1   : > { %v2014_v59 = vsel %vm1950_vm12, %v7848_v34, %v1886_v21  ;;  %v6499_v0 = vmul.f32 1.442695, %v1140_v56  ;;  %vm6501_vm0 = vcmp.lt.f32.partialorder %v1637_v60, 0.0004427343  ;;  %v1644_v15 = vadd.f32 1.0, %v1643_v48 }
 0x1e2   : > { %v2058_v23 = vpack.c.bf16 %v2014_v59, %v2013_v61  ;;  %4802 = vlog2.f32 %v1649_v17  ;;  %v1646_v41 = vand.u32 2147483647, %v6099_v36  ;;  %v1661_v52 = vmul.f32 -0.5, %v6051_v44 }
 0x1e3   : > { %4804 = vlog2.f32 %v1658_v50  ;;  %vm1951_vm1 = vcmp.gt.f32.partialorder %v5901_v51, 14.0  ;;  %v1633_v63 = vmul.f32 0.6931472, %v4797_v19  ;;  %v1636_v21 = vmul.f32 %v6017_v22, %v1635_v46  ;;  %v6511_v43 = vpop.f32.mrb[112].mxu0  ;;  %v7868_v51 = vld [vmem:[#allocation10_spill] sm:$0xff] }
 0x1e4   : > { %4404 = vmatmul.mubr.bf16.gmra.mrb[36].mxu1 %v2058_v23  ;;  %v1655_v56 = vand.u32 2147483647, %v6011_v37  ;;  %v1667_v60 = vadd.f32 1.0, %v6110_v9  ;;  %7851 = vst [vmem:[#allocation48_spill] sm:$0xff] %v6511_v43  ;;  %4806 = vpow2.f32 %v1263_v25  ;;  %v1653_v17 = vadd.f32 1.0, %v1652_v58  ;;  %v6515_v34 = vpop.f32.mrb[113].mxu0 }
 0x1e5   : > { %v1664_v48 = vand.u32 2147483647, %v6051_v44  ;;  %v1676_v61 = vadd.f32 1.0, %v6213_v40  ;;  %7852 = vst [vmem:[#allocation31_spill] sm:$0xff] %v6515_v34  ;;  %v1639_v59 = vsel %vm6501_vm0, %v1636_v21, %v1633_v63  ;;  %v1662_v19 = vadd.f32 1.0, %v1661_v52  ;;  %v6520_v46 = vpop.f32.mrb[114].mxu0 }
 0x1e6   : > { %4808 = vlog2.f32 %v1667_v60  ;;  %v1670_v22 = vmul.f32 -0.5, %v6110_v9  ;;  %7853 = vst [vmem:[#allocation82_spill] sm:$0xff] %v6520_v46  ;;  %vm1952_vm2 = vcmp.gt.f32.partialorder %v5928_v35, 14.0  ;;  %vm6523_vm3 = vcmp.lt.f32.partialorder %v1646_v41, 0.0004427343  ;;  %v6528_v50 = vpop.f32.mrb[115].mxu0 }
 0x1e7   : > { %4810 = vpow2.f32 %v1269_v47  ;;  %v1673_v58 = vand.u32 2147483647, %v6110_v9  ;;  %7856 = vst [vmem:[#allocation83_spill] sm:$0xff] %v6528_v50  ;;  %v1645_v23 = vmul.f32 %v6099_v36, %v1644_v15  ;;  %v1679_v32 = vmul.f32 -0.5, %v6213_v40  ;;  %v7857_v21 = vld [vmem:[#allocation9_spill] sm:$0xff]  ;;  %v7862_v15 = vld [vmem:[#allocation12_spill] sm:$0xff] }
 0x1e8   : > { %4812 = vlog2.f32 %v1676_v61  ;;  %v1685_v52 = vadd.f32 1.0, %v6105_v11  ;;  %v4799_v63 = vpop.eup %4798  ;;  %vm1953_vm4 = vcmp.gt.f32.partialorder %v7857_v21, 14.0  ;;  %v1887_v60 = vmul.f32 2.0, %v1639_v59 }
 0x1e9   : > { %v1654_v47 = vmul.f32 %v6011_v37, %v1653_v17  ;;  %vm6535_vm5 = vcmp.lt.f32.partialorder %v1655_v56, 0.0004427343  ;;  %vm6539_vm6 = vcmp.lt.f32.partialorder %v1664_v48, 0.0004427343  ;;  %v6543_v36 = vpop.eup %4800  ;;  %vm1954_vm7 = vcmp.gt.f32.partialorder %v7862_v15, 14.0 }
 0x1ea   : > { %v1642_v61 = vmul.f32 0.6931472, %v4799_v63  ;;  %v1663_v50 = vmul.f32 %v6051_v44, %v1662_v19  ;;  %v1671_v34 = vadd.f32 1.0, %v1670_v22  ;;  %4814 = vlog2.f32 %v1685_v52  ;;  %v7866_v52 = vld [vmem:[#allocation34_spill] sm:$0xff] }
 0x1eb   : > { %vm6547_vm8 = vcmp.lt.f32.partialorder %v1673_v58, 0.0004427343  ;;  %v1682_v37 = vand.u32 2147483647, %v6213_v40  ;;  %v1688_v56 = vmul.f32 -0.5, %v6105_v11  ;;  %v1694_v17 = vadd.f32 1.0, %v6202_v14 }
 0x1ec   : > { %v4803_v48 = vpop.eup %4802  ;;  %v1648_v43 = vsel %vm6523_vm3, %v1645_v23, %v1642_v61  ;;  %v1680_v10 = vadd.f32 1.0, %v1679_v32  ;;  %v1691_v63 = vand.u32 2147483647, %v6105_v11  ;;  %v1703_v44 = vadd.f32 1.0, %v6231_v29  ;;  %v6558_v19 = vpop.f32.mrb[116].mxu0 }
 0x1ed   : > { %7865 = vst [vmem:[#allocation9_spill] sm:$0xff] %v6558_v19  ;;  %v4805_v22 = vpop.eup %4804  ;;  %v1888_v58 = vmul.f32 2.0, %v1648_v43  ;;  %v2015_v31 = vsel %vm1951_vm1, %v7866_v52, %v1887_v60  ;;  %v1651_v62 = vmul.f32 0.6931472, %v4803_v48  ;;  %4816 = vlog2.f32 %v1694_v17  ;;  %v6563_v24 = vpop.f32.mrb[117].mxu0 }
 0x1ee   : > { %vm1955_vm9 = vcmp.gt.f32.partialorder %v5992_v57, 14.0  ;;  %v1660_v25 = vmul.f32 0.6931472, %v4805_v22  ;;  %v1672_v23 = vmul.f32 %v6110_v9, %v1671_v34  ;;  %v1697_v32 = vmul.f32 -0.5, %v6202_v14  ;;  %v6568_v61 = vpop.f32.mrb[118].mxu0  ;;  %v6570_v19 = vpop.eup %4806 }
 0x1ef   : > { %4818 = vlog2.f32 %v1703_v44  ;;  %7867 = vst [vmem:[#allocation12_spill] sm:$0xff] %v6568_v61  ;;  %vm1956_vm10 = vcmp.gt.f32.partialorder %v6032_v20, 14.0  ;;  %v2016_v43 = vsel %vm1952_vm2, %v7868_v51, %v1888_v58  ;;  %v1657_v60 = vsel %vm6535_vm5, %v1654_v47, %v1651_v62  ;;  %v6582_v34 = vpop.f32.mrb[119].mxu0  ;;  %v7873_v58 = vld [vmem:[#allocation14_spill] sm:$0xff] }
 0x1f0   : > { %vm6578_vm11 = vcmp.lt.f32.partialorder %v1682_v37, 0.0004427343  ;;  %v1689_v9 = vadd.f32 1.0, %v1688_v56  ;;  %v4809_v48 = vpop.eup %4808  ;;  %v2059_v44 = vpack.c.bf16 %v2016_v43, %v2015_v31  ;;  %v1666_v22 = vsel %vm6539_vm6, %v1663_v50, %v1660_v25  ;;  %v7874_v25 = vld [vmem:[#allocation15_spill] sm:$0xff] }
 0x1f1   : > { %v1889_v52 = vmul.f32 2.0, %v1657_v60  ;;  %vm6586_vm12 = vcmp.lt.f32.partialorder %v1691_v63, 0.0004427343  ;;  %v6590_v35 = vpop.eup %4810  ;;  %v1890_v62 = vmul.f32 2.0, %v1666_v22  ;;  %v1669_v47 = vmul.f32 0.6931472, %v4809_v48 }
 0x1f2   : > { %v1681_v41 = vmul.f32 %v6213_v40, %v1680_v10  ;;  %v1700_v37 = vand.u32 2147483647, %v6202_v14  ;;  %v4813_v56 = vpop.eup %4812  ;;  %4407 = vmatprep.mubr.bf16.mxu1 %v2059_v44  ;;  %v1698_v46 = vadd.f32 1.0, %v1697_v32  ;;  %v1706_v50 = vmul.f32 -0.5, %v6231_v29 }
 0x1f3   : > { %v2017_v31 = vsel %vm1953_vm4, %v7873_v58, %v1889_v52  ;;  %v1712_v63 = vadd.f32 1.0, %v6258_v26  ;;  %vm1957_vm13 = vcmp.gt.f32.partialorder %v5989_v3, 14.0  ;;  %v2018_v51 = vsel %vm1954_vm7, %v7874_v25, %v1890_v62  ;;  %v6608_v44 = vpop.f32.mrb[120].mxu0 }
 0x1f4   : > { %v1675_v40 = vsel %vm6547_vm8, %v1672_v23, %v1669_v47  ;;  %v1678_v10 = vmul.f32 0.6931472, %v4813_v56  ;;  %v1721_v43 = vadd.f32 1.0, %v6225_v45  ;;  %v4815_v60 = vpop.eup %4814  ;;  %vm1958_vm14 = vcmp.gt.f32.partialorder %v6015_v54, 14.0  ;;  %v6616_v23 = vpop.f32.mrb[121].mxu0 }
 0x1f5   : > { %v2060_v21 = vpack.c.bf16 %v2018_v51, %v2017_v31  ;;  %v1891_v32 = vmul.f32 2.0, %v1675_v40  ;;  %v1690_v48 = vmul.f32 %v6105_v11, %v1689_v9  ;;  %4820 = vlog2.f32 %v1712_v63  ;;  %v6620_v9 = vpop.f32.mrb[122].mxu0 }
 0x1f6   : > { %v1684_v15 = vsel %vm6578_vm11, %v1681_v41, %v1678_v10  ;;  %v1687_v22 = vmul.f32 0.6931472, %v4815_v60  ;;  %vm6612_vm15 = vcmp.lt.f32.partialorder %v1700_v37, 0.0004427343  ;;  %4822 = vlog2.f32 %v1721_v43  ;;  %v6629_v31 = vpop.f32.mrb[123].mxu0 }
 0x1f7   : > { %4408 = vmatmul.mubr.bf16.gmra.mrb[40].mxu1 %v2060_v21  ;;  %v1892_v52 = vmul.f32 2.0, %v1684_v15  ;;  %v1707_v62 = vadd.f32 1.0, %v1706_v50  ;;  %v1709_v47 = vand.u32 2147483647, %v6231_v29  ;;  %v1715_v11 = vmul.f32 -0.5, %v6258_v26  ;;  %v4817_v56 = vpop.eup %4816  ;;  %v7879_v21 = vld [vmem:[#allocation33_spill] sm:$0xff] }
 0x1f8   : > { %v2019_v17 = vsel %vm1955_vm9, %v5963_v1, %v1891_v32  ;;  %v1693_v41 = vsel %vm6586_vm12, %v1690_v48, %v1687_v22  ;;  %v1699_v37 = vmul.f32 %v6202_v14, %v1698_v46  ;;  %v1730_v58 = vadd.f32 1.0, %v6243_v4 }
 0x1f9   : > { %v4819_v50 = vpop.eup %4818  ;;  %v2020_v63 = vsel %vm1956_vm10, %v6003_v2, %v1892_v52  ;;  %v1696_v25 = vmul.f32 0.6931472, %v4817_v56  ;;  %v1893_v51 = vmul.f32 2.0, %v1693_v41  ;;  %v1724_v40 = vmul.f32 -0.5, %v6225_v45 }
 0x1fa   : > { %v2061_v57 = vpack.c.bf16 %v2020_v63, %v2019_v17  ;;  %v1705_v1 = vmul.f32 0.6931472, %v4819_v50  ;;  %4824 = vlog2.f32 %v1730_v58  ;;  %v1733_v61 = vmul.f32 -0.5, %v6243_v4  ;;  %v7883_v58 = vld [vmem:[#allocation18_spill] sm:$0xff] }
 0x1fb   : > { %vm1959_vm0 = vcmp.gt.f32.partialorder %v6082_v16, 14.0  ;;  %v1702_v14 = vsel %vm6612_vm15, %v1699_v37, %v1696_v25  ;;  %v1708_v46 = vmul.f32 %v6231_v29, %v1707_v62  ;;  %v1716_v10 = vadd.f32 1.0, %v1715_v11  ;;  %v6654_v22 = vpop.f32.mrb[124].mxu0 }
 0x1fc   : > { %v1718_v20 = vand.u32 2147483647, %v6258_v26  ;;  %vm1960_vm1 = vcmp.gt.f32.partialorder %v6097_v39, 14.0  ;;  %4826 = vpow2.f32 %v6499_v0  ;;  %4411 = vmatprep.mubr.bf16.mxu1 %v2061_v57  ;;  %v1894_v2 = vmul.f32 2.0, %v1702_v14  ;;  %v7880_v0 = vld [vmem:[#allocation7_spill] sm:$0xff] }
 0x1fd   : > { %vm6643_vm2 = vcmp.lt.f32.partialorder %v1709_v47, 0.0004427343  ;;  %v1739_v60 = vadd.f32 1.0, %v6360_v13  ;;  %v2021_v32 = vsel %vm1957_vm13, %v7879_v21, %v1893_v51  ;;  %v1725_v48 = vadd.f32 1.0, %v1724_v40  ;;  %v6660_v47 = vpop.f32.mrb[125].mxu0  ;;  %v7884_v40 = vld [vmem:[#allocation16_spill] sm:$0xff] }
 0x1fe   : > { %v1711_v29 = vsel %vm6643_vm2, %v1708_v46, %v1705_v1  ;;  %v1727_v15 = vand.u32 2147483647, %v6225_v45  ;;  %v2022_v59 = vsel %vm1958_vm14, %v7880_v0, %v1894_v2  ;;  %v1734_v52 = vadd.f32 1.0, %v1733_v61  ;;  %v6668_v37 = vpop.f32.mrb[126].mxu0  ;;  %v7885_v21 = vld [vmem:[#allocation19_spill] sm:$0xff] }
 0x1ff   : > { %4828 = vlog2.f32 %v1739_v60  ;;  %v1748_v62 = vadd.f32 1.0, %v6430_v5  ;;  %v4821_v3 = vpop.eup %4820  ;;  %v2062_v11 = vpack.c.bf16 %v2022_v59, %v2021_v32  ;;  %v1717_v56 = vmul.f32 %v6258_v26, %v1716_v10  ;;  %v6672_v51 = vpop.f32.mrb[127].mxu0 }
 0x200   : > { %vm6663_vm3 = vcmp.lt.f32.partialorder %v1718_v20, 0.0004427343  ;;  %v1742_v41 = vmul.f32 -0.5, %v6360_v13  ;;  %v4823_v54 = vpop.eup %4822  ;;  %vm1961_vm4 = vcmp.gt.f32.partialorder %v7883_v58, 14.0  ;;  %v1714_v50 = vmul.f32 0.6931472, %v4821_v3 }
 0x201   : > { %v1895_v63 = vmul.f32 2.0, %v1711_v29  ;;  %v1736_v25 = vand.u32 2147483647, %v6243_v4  ;;  %4830 = vlog2.f32 %v1748_v62  ;;  %vm1962_vm5 = vcmp.gt.f32.partialorder %v7884_v40, 14.0  ;;  %4412 = vmatmul.mubr.bf16.gmra.mrb[44].mxu1 %v2062_v11 }
 0x202   : > { %v1723_v26 = vmul.f32 0.6931472, %v4823_v54  ;;  %v1726_v57 = vmul.f32 %v6225_v45, %v1725_v48  ;;  %v1751_v1 = vmul.f32 -0.5, %v6430_v5  ;;  %v1757_v61 = vadd.f32 1.0, %v6341_v27 }
 0x203   : > { %v1720_v14 = vsel %vm6663_vm3, %v1717_v56, %v1714_v50  ;;  %vm1728_vm6 = vcmp.lt.f32.partialorder %v1727_v15, 0.0004427343  ;;  %v1735_v46 = vmul.f32 %v6243_v4, %v1734_v52  ;;  %v1745_v10 = vand.u32 2147483647, %v6360_v13  ;;  %v7888_v4 = vld [vmem:[#allocation22_spill] sm:$0xff] }
 0x204   : > { %v1896_v20 = vmul.f32 2.0, %v1720_v14  ;;  %v1729_v2 = vsel %vm1728_vm6, %v1726_v57, %v1723_v26  ;;  %v1743_v43 = vadd.f32 1.0, %v1742_v41  ;;  %4832 = vlog2.f32 %v1757_v61  ;;  %v4825_v60 = vpop.eup %4824  ;;  %v7891_v57 = vld [vmem:[#allocation11_spill] sm:$0xff] }
 0x205   : > { %v2023_v45 = vsel %vm1959_vm0, %v7885_v21, %v1895_v63  ;;  %vm6685_vm7 = vcmp.lt.f32.partialorder %v1736_v25, 0.0004427343  ;;  %v1760_v29 = vmul.f32 -0.5, %v6341_v27  ;;  %v1766_v48 = vadd.f32 1.0, %v6365_v53 }
 0x206   : > { %v2024_v15 = vsel %vm1960_vm1, %v7888_v4, %v1896_v20  ;;  %v1732_v0 = vmul.f32 0.6931472, %v4825_v60  ;;  %v1897_v59 = vmul.f32 2.0, %v1729_v2  ;;  %v1752_v52 = vadd.f32 1.0, %v1751_v1  ;;  %v6694_v62 = vpop.eup %4826 }
 0x207   : > { %v2063_v3 = vpack.c.bf16 %v2024_v15, %v2023_v45  ;;  %vm6696_vm8 = vcmp.lt.f32.partialorder %v1745_v10, 0.0004427343  ;;  %4834 = vlog2.f32 %v1766_v48  ;;  %v1769_v11 = vmul.f32 -0.5, %v6365_v53 }
 0x208   : > { %vm1963_vm9 = vcmp.gt.f32.partialorder %v6197_v33, 14.0  ;;  %vm1964_vm10 = vcmp.gt.f32.partialorder %v6209_v8, 14.0  ;;  %v1738_v39 = vsel %vm6685_vm7, %v1735_v46, %v1732_v0  ;;  %v1744_v56 = vmul.f32 %v6360_v13, %v1743_v43  ;;  %v7892_v46 = vld [vmem:[#allocation23_spill] sm:$0xff] }
 0x209   : > { %v1754_v17 = vand.u32 2147483647, %v6430_v5  ;;  %v1775_v41 = vadd.f32 1.0, %v6474_v18  ;;  %v4829_v54 = vpop.eup %4828  ;;  %4415 = vmatprep.mubr.bf16.mxu1 %v2063_v3  ;;  %v1898_v50 = vmul.f32 2.0, %v1738_v39  ;;  %v1761_v63 = vadd.f32 1.0, %v1760_v29  ;;  %v7895_v29 = vld [vmem:[#allocation56_spill] sm:$0xff] }
 0x20a   : > { %v1763_v25 = vand.u32 2147483647, %v6341_v27  ;;  %v1784_v26 = vadd.f32 1.0, %v6489_v55  ;;  %v2025_v1 = vsel %vm1961_vm4, %v7891_v57, %v1897_v59  ;;  %v1741_v61 = vmul.f32 0.6931472, %v4829_v54  ;;  %v7897_v54 = vld [vmem:[#allocation49_spill] sm:$0xff] }
 0x20b   : > { %v1753_v14 = vmul.f32 %v6430_v5, %v1752_v52  ;;  %4836 = vlog2.f32 %v1775_v41  ;;  %v4831_v13 = vpop.eup %4830  ;;  %v2026_v10 = vsel %vm1962_vm5, %v7892_v46, %v1898_v50  ;;  %v1770_v20 = vadd.f32 1.0, %v1769_v11  ;;  %v7896_v41 = vld [vmem:[#allocation29_spill] sm:$0xff]  ;;  %v7900_v5 = vld [vmem:[#allocation27_spill] sm:$0xff] }
 0x20c   : > { %v1778_v2 = vmul.f32 -0.5, %v6474_v18  ;;  %4838 = vlog2.f32 %v1784_v26  ;;  %v2064_v43 = vpack.c.bf16 %v2026_v10, %v2025_v1  ;;  %v1747_v60 = vsel %vm6696_vm8, %v1744_v56, %v1741_v61  ;;  %v7906_v1 = vld [vmem:[#allocation46_spill] sm:$0xff] }
 0x20d   : > { %v1750_v21 = vmul.f32 0.6931472, %v4831_v13  ;;  %v1787_v58 = vmul.f32 -0.5, %v6489_v55  ;;  %vm1755_vm11 = vcmp.lt.f32.partialorder %v1754_v17, 0.0004427343  ;;  %v1899_v45 = vmul.f32 2.0, %v1747_v60 }
 0x20e   : > { %vm6721_vm12 = vcmp.lt.f32.partialorder %v1763_v25, 0.0004427343  ;;  %v1793_v40 = vadd.f32 1.0, %v6438_v6  ;;  %v4833_v32 = vpop.eup %4832  ;;  %vm1965_vm13 = vcmp.gt.f32.partialorder %v6169_v38, 14.0  ;;  %vm1966_vm14 = vcmp.gt.f32.partialorder %v7895_v29, 14.0  ;;  %4416 = vmatmul.mubr.bf16.gmra.mrb[48].mxu1 %v2064_v43 }
 0x20f   : > { %v1756_v48 = vsel %vm1755_vm11, %v1753_v14, %v1750_v21  ;;  %v1762_v4 = vmul.f32 %v6341_v27, %v1761_v63  ;;  %v1772_v15 = vand.u32 2147483647, %v6365_v53  ;;  %v1802_v0 = vadd.f32 1.0, %v6484_v28 }
 0x210   : > { %v1900_v59 = vmul.f32 2.0, %v1756_v48  ;;  %v1759_v52 = vmul.f32 0.6931472, %v4833_v32  ;;  %v1771_v3 = vmul.f32 %v6365_v53, %v1770_v20  ;;  %v1781_v16 = vand.u32 2147483647, %v6474_v18  ;;  %v7901_v32 = vld [vmem:[#allocation47_spill] sm:$0xff] }
 0x211   : > { %v1779_v11 = vadd.f32 1.0, %v1778_v2  ;;  %v1788_v39 = vadd.f32 1.0, %v1787_v58  ;;  %v1790_v56 = vand.u32 2147483647, %v6489_v55  ;;  %4840 = vlog2.f32 %v1793_v40  ;;  %v4835_v17 = vpop.eup %4834 }
 0x212   : > { %v2027_v27 = vsel %vm1963_vm9, %v7896_v41, %v1899_v45  ;;  %v2028_v50 = vsel %vm1964_vm10, %v7897_v54, %v1900_v59  ;;  %v1765_v63 = vsel %vm6721_vm12, %v1762_v4, %v1759_v52  ;;  %4842 = vlog2.f32 %v1802_v0  ;;  %v7904_v41 = vld [vmem:[#allocation3_spill] sm:$0xff]  ;;  %v7905_v54 = vld [vmem:[#allocation25_spill] sm:$0xff] }
 0x213   : > { %vm1967_vm15 = vcmp.gt.f32.partialorder %v6309_v7, 14.0  ;;  %vm1968_vm0 = vcmp.gt.f32.partialorder %v6319_v42, 14.0  ;;  %v2065_v53 = vpack.c.bf16 %v2028_v50, %v2027_v27  ;;  %v1768_v25 = vmul.f32 0.6931472, %v4835_v17 }
 0x214   : > { %v1796_v26 = vmul.f32 -0.5, %v6438_v6  ;;  %v1805_v57 = vmul.f32 -0.5, %v6484_v28  ;;  %vm1773_vm1 = vcmp.lt.f32.partialorder %v1772_v15, 0.0004427343  ;;  %v1901_v33 = vmul.f32 2.0, %v1765_v63 }
 0x215   : > { %vm6746_vm2 = vcmp.lt.f32.partialorder %v1781_v16, 0.0004427343  ;;  %v1811_v8 = vadd.f32 1.0, %v6570_v19  ;;  %v4837_v61 = vpop.eup %4836  ;;  %4419 = vmatprep.mubr.bf16.mxu1 %v2065_v53  ;;  %v1774_v14 = vsel %vm1773_vm1, %v1771_v3, %v1768_v25  ;;  %v1780_v13 = vmul.f32 %v6474_v18, %v1779_v11 }
 0x216   : > { %v1799_v46 = vand.u32 2147483647, %v6438_v6  ;;  %v1820_v10 = vadd.f32 1.0, %v6694_v62  ;;  %v4839_v20 = vpop.eup %4838  ;;  %v1902_v2 = vmul.f32 2.0, %v1774_v14  ;;  %v1777_v43 = vmul.f32 0.6931472, %v4837_v61 }
 0x217   : > { %v1789_v60 = vmul.f32 %v6489_v55, %v1788_v39  ;;  %vm1791_vm3 = vcmp.lt.f32.partialorder %v1790_v56, 0.0004427343  ;;  %v1786_v21 = vmul.f32 0.6931472, %v4839_v20  ;;  %v1797_v58 = vadd.f32 1.0, %v1796_v26  ;;  %v7919_v20 = vld [vmem:[#allocation71_spill] sm:$0xff] }
 0x218   : > { %v1806_v45 = vadd.f32 1.0, %v1805_v57  ;;  %4844 = vlog2.f32 %v1811_v8  ;;  %v2029_v40 = vsel %vm1965_vm13, %v7900_v5, %v1901_v33  ;;  %v2030_v18 = vsel %vm1966_vm14, %v7901_v32, %v1902_v2 }
 0x219   : > { %v1783_v48 = vsel %vm6746_vm2, %v1780_v13, %v1777_v43  ;;  %4846 = vlog2.f32 %v1820_v10  ;;  %v2066_v4 = vpack.c.bf16 %v2030_v18, %v2029_v40  ;;  %v1792_v15 = vsel %vm1791_vm3, %v1789_v60, %v1786_v21  ;;  %v7909_v60 = vld [vmem:[#allocation42_spill] sm:$0xff]  ;;  %v7910_v21 = vld [vmem:[#allocation5_spill] sm:$0xff]  ;;  %v4369_v40 = vpop.f32.mrb[0].mxu1 }
 0x21a   : > { %v1903_v55 = vmul.f32 2.0, %v1783_v48  ;;  %v1814_v0 = vmul.f32 -0.5, %v6570_v19  ;;  %v1904_v59 = vmul.f32 2.0, %v1792_v15  ;;  %v1808_v52 = vand.u32 2147483647, %v6484_v28 }
 0x21b   : > { %v1823_v3 = vmul.f32 -0.5, %v6694_v62  ;;  %v1829_v38 = vadd.f32 1.0, %v6543_v36  ;;  %v4841_v16 = vpop.eup %4840  ;;  %4420 = vmatmul.mubr.bf16.gmra.mrb[52].mxu1 %v2066_v4  ;;  %v1798_v29 = vmul.f32 %v6438_v6, %v1797_v58  ;;  %vm6768_vm4 = vcmp.lt.f32.partialorder %v1799_v46, 0.0004427343  ;;  %v2176_v4 = vpop.f32.mrb[1].mxu1 }
 0x21c   : > { %v1817_v39 = vand.u32 2147483647, %v6570_v19  ;;  %v1838_v56 = vadd.f32 1.0, %v6590_v35  ;;  %v4843_v17 = vpop.eup %4842  ;;  %v2031_v27 = vsel %vm1967_vm15, %v7904_v41, %v1903_v55  ;;  %v2032_v50 = vsel %vm1968_vm0, %v7905_v54, %v1904_v59  ;;  %v4370_v59 = vpop.f32.mrb[2].mxu1 }
 0x21d   : > { %v1795_v63 = vmul.f32 0.6931472, %v4841_v16  ;;  %v1807_v6 = vmul.f32 %v6484_v28, %v1806_v45  ;;  %v2067_v53 = vpack.c.bf16 %v2032_v50, %v2031_v27  ;;  %v1804_v25 = vmul.f32 0.6931472, %v4843_v17  ;;  %v6788_v28 = vld [vmem:[%s7491_s7] ss:$0 sm:$0xff] }
 0x21e   : > { %v1815_v26 = vadd.f32 1.0, %v1814_v0  ;;  %4848 = vlog2.f32 %v1829_v38  ;;  %vm1809_vm5 = vcmp.lt.f32.partialorder %v1808_v52, 0.0004427343  ;;  %v1824_v33 = vadd.f32 1.0, %v1823_v3  ;;  %v7911_v38 = vld [vmem:[#allocation21_spill] sm:$0xff] }
 0x21f   : > { %v1801_v57 = vsel %vm6768_vm4, %v1798_v29, %v1795_v63  ;;  %4850 = vlog2.f32 %v1838_v56  ;;  %vm1969_vm6 = vcmp.gt.f32.partialorder %v7906_v1, 14.0  ;;  %4423 = vmatprep.mubr.bf16.mxu1 %v2067_v53  ;;  %v1810_v7 = vsel %vm1809_vm5, %v1807_v6, %v1804_v25  ;;  %v2179_v29 = vpop.f32.mrb[3].mxu1  ;;  %v7912_v56 = vld [vmem:[#allocation13_spill] sm:$0xff]  ;;  %v7915_v63 = vld [vmem:[#allocation20_spill] sm:$0xff]  ;;  %v7916_v25 = vld [vmem:[#allocation50_spill] sm:$0xff] }
 0x220   : > { %v1905_v8 = vmul.f32 2.0, %v1801_v57  ;;  %v1832_v42 = vmul.f32 -0.5, %v6543_v36  ;;  %vm1970_vm7 = vcmp.gt.f32.partialorder %v6316_v49, 14.0  ;;  %v1906_v61 = vmul.f32 2.0, %v1810_v7  ;;  %v7917_v57 = vld [vmem:[#allocation17_spill] sm:$0xff]  ;;  %v7918_v7 = vld [vmem:[#allocation28_spill] sm:$0xff] }
 0x221   : > { %v1826_v14 = vand.u32 2147483647, %v6694_v62  ;;  %v1841_v13 = vmul.f32 -0.5, %v6590_v35  ;;  %vm1971_vm8 = vcmp.gt.f32.partialorder %v6423_v30, 14.0  ;;  %v1816_v10 = vmul.f32 %v6570_v19, %v1815_v26 }
 0x222   : > { %v4845_v46 = vpop.eup %4844  ;;  %vm6795_vm9 = vcmp.lt.f32.partialorder %v1817_v39, 0.0004427343  ;;  %v1835_v2 = vand.u32 2147483647, %v6543_v36  ;;  %v2033_v49 = vsel %vm1969_vm6, %v7909_v60, %v1905_v8  ;;  %v2034_v58 = vsel %vm1970_vm7, %v7910_v21, %v1906_v61  ;;  %v7922_v60 = vld [vmem:[#allocation2_spill] sm:$0xff]  ;;  %v4373_v21 = vpop.f32.mrb[4].mxu1 }
 0x223   : > { %v4847_v43 = vpop.eup %4846  ;;  %v1813_v45 = vmul.f32 0.6931472, %v4845_v46  ;;  %v1825_v5 = vmul.f32 %v6694_v62, %v1824_v33  ;;  %v2068_v32 = vpack.c.bf16 %v2034_v58, %v2033_v49  ;;  %v1833_v19 = vadd.f32 1.0, %v1832_v42 }
 0x224   : > { %v1822_v18 = vmul.f32 0.6931472, %v4847_v43  ;;  %v2185_v48 = vadd.f32 %v4369_v40, %v6788_v28  ;;  %vm1827_vm10 = vcmp.lt.f32.partialorder %v1826_v14, 0.0004427343  ;;  %v1842_v55 = vadd.f32 1.0, %v1841_v13  ;;  %v7921_v43 = vld [vmem:[#allocation69_spill] sm:$0xff] }
 0x225   : > { %v1819_v15 = vsel %vm6795_vm9, %v1816_v10, %v1813_v45  ;;  %v2177_v0 = vadd.f32 %v6788_v28, %v2176_v4  ;;  %4424 = vmatmul.mubr.bf16.gmra.mrb[56].mxu1 %v2068_v32  ;;  %v2188_v16 = vadd.f32 %v4370_v59, %v6788_v28  ;;  %v1844_v39 = vand.u32 2147483647, %v6590_v35  ;;  %v7925_v59 = vld [vmem:[#allocation24_spill] sm:$0xff] }
 0x226   : > { %v1828_v52 = vsel %vm1827_vm10, %v1825_v5, %v1822_v18  ;;  %v1907_v3 = vmul.f32 2.0, %v1819_v15  ;;  %v6810_v62 = vmul.f32 %v7911_v38, %v2185_v48  ;;  %v2180_v41 = vadd.f32 %v6788_v28, %v2179_v29  ;;  %v2192_v5 = vpop.f32.mrb[5].mxu1  ;;  %v7923_v18 = vld [vmem:[#allocation26_spill] sm:$0xff] }
 0x227   : > { %v1908_v11 = vmul.f32 2.0, %v1828_v52  ;;  %v6815_v17 = vmul.f32 %v7912_v56, %v2177_v0  ;;  %vm1972_vm11 = vcmp.gt.f32.partialorder %v6445_v12, 14.0  ;;  %v1834_v54 = vmul.f32 %v6543_v36, %v1833_v19  ;;  %v4374_v32 = vpop.f32.mrb[6].mxu1  ;;  %v7924_v15 = vld [vmem:[#allocation30_spill] sm:$0xff] }
 0x228   : > { %v4849_v27 = vpop.eup %4848  ;;  %vm6820_vm12 = vcmp.lt.f32.partialorder %v1835_v2, 0.0004427343  ;;  %v6825_v6 = vmul.f32 %v7915_v63, %v2188_v16  ;;  %v2035_v26 = vsel %vm1971_vm8, %v7916_v25, %v1907_v3  ;;  %v6832_v8 = vmul.f32 %v7918_v7, %v2180_v41  ;;  %v7920_v2 = vld [vmem:[#allocation75_spill] sm:$0xff]  ;;  %v2195_v4 = vpop.f32.mrb[7].mxu1  ;;  %v7926_v3 = vld [vmem:[#allocation52_spill] sm:$0xff]  ;;  %v7928_v25 = vld [vmem:[#allocation54_spill] sm:$0xff] }
 0x229   : > { %v4851_v53 = vpop.eup %4850  ;;  %v2036_v33 = vsel %vm1972_vm11, %v7917_v57, %v1908_v11  ;;  %v1831_v1 = vmul.f32 0.6931472, %v4849_v27  ;;  %v1843_v42 = vmul.f32 %v6590_v35, %v1842_v55  ;;  %vm1845_vm13 = vcmp.lt.f32.partialorder %v1844_v39, 0.0004427343  ;;  %v7930_v7 = vld [vmem:[#allocation57_spill] sm:$0xff] }
 0x22a   : > { %v2069_v12 = vpack.c.bf16 %v2036_v33, %v2035_v26  ;;  %v1840_v36 = vmul.f32 0.6931472, %v4851_v53  ;;  %v3267_v61 = vpack.c.bf16 %v6825_v6, %v6810_v62  ;;  %v3266_v30 = vpack.c.bf16 %v6832_v8, %v6815_v17  ;;  %v7929_v33 = vld [vmem:[#allocation55_spill] sm:$0xff]  ;;  %v7946_v62 = vld [vmem:[#allocation64_spill] sm:$0xff] }
 0x22b   : > { %v1837_v14 = vsel %vm6820_vm12, %v1834_v54, %v1831_v1  ;;  %vm1973_vm14 = vcmp.gt.f32.partialorder %v7919_v20, 14.0  ;;  %vm1974_vm15 = vcmp.gt.f32.partialorder %v7920_v2, 14.0  ;;  %v2201_v45 = vadd.f32 %v4373_v21, %v6788_v28  ;;  %v7927_v54 = vld [vmem:[#allocation53_spill] sm:$0xff] }
 0x22c   : > { %4427 = vmatprep.mubr.bf16.mxu1 %v2069_v12  ;;  %v1846_v13 = vsel %vm1845_vm13, %v1843_v42, %v1840_v36  ;;  %v1909_v46 = vmul.f32 2.0, %v1837_v14  ;;  %v2193_v40 = vadd.f32 %v6788_v28, %v2192_v5  ;;  %v2204_v48 = vadd.f32 %v4374_v32, %v6788_v28 }
 0x22d   : > { %v1910_v10 = vmul.f32 2.0, %v1846_v13  ;;  %v6848_v19 = vmul.f32 %v7923_v18, %v2201_v45  ;;  %v2196_v0 = vadd.f32 %v6788_v28, %v2195_v4  ;;  %v7931_v14 = vlaneseq  ;;  %v7932_v45 = vld [vmem:[#allocation36_spill] sm:$0xff] }
 0x22e   : > { %v2037_v35 = vsel %vm1973_vm14, %v7921_v43, %v1909_v46  ;;  %v6852_v55 = vmul.f32 %v7924_v15, %v2193_v40  ;;  %v6856_v52 = vmul.f32 %v7925_v59, %v2204_v48  ;;  %v6894_v43 = vld [vmem:[%s363_s23] sm:$0xf] }
 0x22f   : > { %v2038_v49 = vsel %vm1974_vm15, %v7922_v60, %v1910_v10  ;;  %v6859_v38 = vmul.f32 %v7926_v3, %v2196_v0  ;;  %v6886_v13 = vshrl.u32 %v7931_v14, 7  ;;  %v7933_v48 = vld [vmem:[#allocation38_spill] sm:$0xff]  ;;  %v7935_v3 = vld [vmem:[#allocation59_spill] sm:$0xff] }
 0x230   : > { %v2070_v58 = vpack.c.bf16 %v2038_v49, %v2037_v35  ;;  %v3269_v16 = vpack.c.bf16 %v6856_v52, %v6848_v19  ;;  %v7934_v0 = vld [vmem:[#allocation58_spill] sm:$0xff]  ;;  %v7950_v19 = vld [vmem:[#allocation65_spill] sm:$0xff] }
 0x231   : > { %v3268_v29 = vpack.c.bf16 %v6859_v38, %v6852_v55  ;;  %v3322_v10 = vsub.s32 1, %v6886_v13  ;;  %v3318_v35 = vsub.s32 0, %v6886_v13  ;;  %v6899_v21 = vadd.s32 8, %v6886_v13 }
 0x232   : > { %4428 = vmatmul.mubr.bf16.gmra.mrb[60].mxu1 %v2070_v58 }
 0x233   : > { %v6902_v58 = vrot.slane %v6894_v43, %v3322_v10  ;;  %v6909_v18 = vrot.slane %v6894_v43, %v3318_v35  ;;  %v7940_v10 = vld [vmem:[#allocation37_spill] sm:$0xff]  ;;  %v7941_v35 = vld [vmem:[#allocation32_spill] sm:$0xff] }
 0x234   : > { %v4377_v11 = vpop.f32.mrb[8].mxu1 }
 0x235   : > { %v2217_v39 = vadd.f32 %v4377_v11, %v6788_v28  ;;  %v2208_v56 = vpop.f32.mrb[9].mxu1  ;;  %vm3333_vm0 = vcmp.eq.s32.totalorder %v6902_v58, %v6886_v13  ;;  %vm3337_vm1 = vcmp.eq.s32.totalorder %v6902_v58, %v6899_v21  ;;  %vm3332_vm3 = vcmp.eq.s32.totalorder %v6909_v18, %v6886_v13 }
 0x236   : > { %v2209_v41 = vadd.f32 %v6788_v28, %v2208_v56  ;;  %v4378_v27 = vpop.f32.mrb[10].mxu1  ;;  %vm3955_vm2 = vmpackc.low %vm3337_vm1, %vm3333_vm0  ;;  %vm3336_vm4 = vcmp.eq.s32.totalorder %v6909_v18, %v6899_v21  ;;  %v7973_v56 = vld [vmem:[#allocation39_spill] sm:$0xff] }
 0x237   : > { %v6868_v50 = vmul.f32 %v7927_v54, %v2217_v39  ;;  %v2220_v63 = vadd.f32 %v4378_v27, %v6788_v28  ;;  %v2211_v53 = vpop.f32.mrb[11].mxu1  ;;  %v7936_v39 = vmov 1.0|1.0   ;;  %vm6930_vm5 = vmpackc.low %vm3336_vm4, %vm3332_vm3 }
 0x238   : > { %v6872_v26 = vmul.f32 %v7928_v25, %v2209_v41  ;;  %v2212_v57 = vadd.f32 %v6788_v28, %v2211_v53  ;;  %3956 = vmatprep.mubr.msk.bf16.mxu1 %vm3955_vm2, %v7936_v39 }
 0x239   : > { %v6876_v1 = vmul.f32 %v7929_v33, %v2220_v63  ;;  %v7939_v33 = vld [vmem:[#allocation35_spill] sm:$0xff] }
 0x23a   : > { %v6879_v12 = vmul.f32 %v7930_v7, %v2212_v57 }
 0x23b   : > { %v3271_v36 = vpack.c.bf16 %v6876_v1, %v6868_v50 }
 0x23c   : > { %v3270_v42 = vpack.c.bf16 %v6879_v12, %v6872_v26  ;;  %v6992_v26 = vadd.s32 24, %v6886_v13 }
 0x24a   : > { %v4381_v46 = vpop.f32.mrb[12].mxu1 }
 0x24b   : > { %v2233_v20 = vadd.f32 %v4381_v46, %v6788_v28  ;;  %v2224_v2 = vpop.f32.mrb[13].mxu1 }
 0x24c   : > { %v2225_v60 = vadd.f32 %v6788_v28, %v2224_v2  ;;  %v4382_v49 = vpop.f32.mrb[14].mxu1 }
 0x24d   : > { %v6905_v5 = vmul.f32 %v7932_v45, %v2233_v20  ;;  %v2236_v40 = vadd.f32 %v4382_v49, %v6788_v28  ;;  %v2227_v32 = vpop.f32.mrb[15].mxu1  ;;  %v7942_v49 = vld [vmem:[#allocation60_spill] sm:$0xff] }
 0x24e   : > { %v6912_v4 = vmul.f32 %v7933_v48, %v2225_v60  ;;  %v2228_v15 = vadd.f32 %v6788_v28, %v2227_v32 }
 0x24f   : > { %v6920_v59 = vmul.f32 %v7934_v0, %v2236_v40 }
 0x250   : > { %v6927_v11 = vmul.f32 %v7935_v3, %v2228_v15 }
 0x251   : > { %v3273_v41 = vpack.c.bf16 %v6920_v59, %v6905_v5 }
 0x252   : > { %v3272_v27 = vpack.c.bf16 %v6927_v11, %v6912_v4  ;;  %v7969_v4 = vmov 0  ;;  %v7971_v11 = vmov 0 }
 0x25c   : > { %v4385_v54 = vpop.f32.mrb[16].mxu1 }
 0x25d   : > { %v2249_v63 = vadd.f32 %v4385_v54, %v6788_v28  ;;  %v2240_v53 = vpop.f32.mrb[17].mxu1 }
 0x25e   : > { %v2241_v25 = vadd.f32 %v6788_v28, %v2240_v53  ;;  %v4386_v57 = vpop.f32.mrb[18].mxu1 }
 0x25f   : > { %v3220_v7 = vmul.f32 %v7939_v33, %v2249_v63  ;;  %v2252_v14 = vadd.f32 %v4386_v57, %v6788_v28  ;;  %v2243_v46 = vpop.f32.mrb[19].mxu1  ;;  %v7943_v63 = vld [vmem:[#allocation61_spill] sm:$0xff]  ;;  %v7944_v33 = vld [vmem:[#allocation62_spill] sm:$0xff] }
 0x260   : > { %v3218_v20 = vmul.f32 %v7940_v10, %v2241_v25  ;;  %v2244_v2 = vadd.f32 %v6788_v28, %v2243_v46 }
 0x261   : > { %v3221_v60 = vmul.f32 %v7941_v35, %v2252_v14 }
 0x262   : > { %v3219_v45 = vmul.f32 %v7942_v49, %v2244_v2 }
 0x263   : > { %v3275_v40 = vpack.c.bf16 %v3221_v60, %v3220_v7  ;;  %v7947_v60 = vld [vmem:[#allocation41_spill] sm:$0xff] }
 0x264   : > { %v3274_v32 = vpack.c.bf16 %v3219_v45, %v3218_v20 }
 0x266   : > { %4143 = vmatprep.subr.bf16.mxu1 %v3274_v32  ;;  %v7948_v32 = vld [vmem:[#allocation45_spill] sm:$0xff] }
 0x267   : > { %4144 = vmatpush3.bf16.msra.mxu1 %v3266_v30  ;;  %v7945_v30 = vld [vmem:[#allocation63_spill] sm:$0xff] }
 0x268   : > { %4145 = vmatprep.subr.bf16.mxu1 %v3275_v40 }
 0x26b   : > { %4146 = vmatpush3.bf16.msra.mxu1 %v3267_v61 }
 0x26c   : > { %v4389_v48 = vpop.f32.mrb[20].mxu1 }
 0x26d   : > { %v2265_v15 = vadd.f32 %v4389_v48, %v6788_v28  ;;  %v2256_v0 = vpop.f32.mrb[21].mxu1 }
 0x26e   : > { %v2257_v3 = vadd.f32 %v6788_v28, %v2256_v0  ;;  %v4390_v54 = vpop.f32.mrb[22].mxu1  ;;  %v3330_v0 = vsub.s32 3, %v6886_v13 }
 0x26f   : > { %v3224_v53 = vmul.f32 %v7943_v63, %v2265_v15  ;;  %v2268_v25 = vadd.f32 %v4390_v54, %v6788_v28  ;;  %v2259_v57 = vpop.f32.mrb[23].mxu1 }
 0x270   : > { %v3222_v17 = vmul.f32 %v7944_v33, %v2257_v3  ;;  %v2260_v8 = vadd.f32 %v6788_v28, %v2259_v57  ;;  %v3326_v3 = vsub.s32 2, %v6886_v13  ;;  %v6980_v54 = vrot.slane %v6894_v43, %v3330_v0  ;;  %v7957_v57 = vld [vmem:[#allocation44_spill] sm:$0xff] }
 0x271   : > { %v3225_v7 = vmul.f32 %v7945_v30, %v2268_v25 }
 0x272   : > { %v3223_v6 = vmul.f32 %v7946_v62, %v2260_v8  ;;  %v6983_v63 = vrot.slane %v6894_v43, %v3326_v3  ;;  %vm3335_vm6 = vcmp.eq.s32.totalorder %v6980_v54, %v6886_v13  ;;  %vm3339_vm7 = vcmp.eq.s32.totalorder %v6980_v54, %v6899_v21 }
 0x273   : > { %v3277_v61 = vpack.c.bf16 %v3225_v7, %v3224_v53  ;;  %v6989_v53 = vadd.s32 16, %v6886_v13  ;;  %vm7002_vm10 = vmpackc.low %vm3339_vm7, %vm3335_vm6  ;;  %vm3347_vm12 = vcmp.eq.s32.totalorder %v6980_v54, %v6992_v26  ;;  %v7960_v7 = vld [vmem:[#allocation66_spill] sm:$0xff] }
 0x274   : > { %v3276_v14 = vpack.c.bf16 %v3223_v6, %v3222_v17  ;;  %vm3334_vm8 = vcmp.eq.s32.totalorder %v6983_v63, %v6886_v13  ;;  %vm3338_vm9 = vcmp.eq.s32.totalorder %v6983_v63, %v6899_v21  ;;  %vm3346_vm14 = vcmp.eq.s32.totalorder %v6983_v63, %v6992_v26 }
 0x275   : > { %vm3343_vm11 = vcmp.eq.s32.totalorder %v6980_v54, %v6989_v53  ;;  %vm3342_vm13 = vcmp.eq.s32.totalorder %v6983_v63, %v6989_v53  ;;  %vm7015_vm15 = vmpackc.low %vm3338_vm9, %vm3334_vm8  ;;  %vm3341_vm9 = vcmp.eq.s32.totalorder %v6902_v58, %v6989_v53 }
 0x276   : > { %4147 = vmatprep.subr.bf16.mxu1 %v3276_v14  ;;  %vm7020_vm0 = vmpackc.low %vm3347_vm12, %vm3343_vm11  ;;  %v7036_v14 = vadd.s32 40, %v6886_v13  ;;  %vm3345_vm11 = vcmp.eq.s32.totalorder %v6902_v58, %v6992_v26 }
 0x277   : > { %4148 = vmatpush3.bf16.msra.mxu1 %v3268_v29  ;;  %v7949_v29 = vld [vmem:[#allocation40_spill] sm:$0xff]  ;;  %vm7026_vm1 = vmpackc.low %vm3346_vm14, %vm3342_vm13 }
 0x278   : > { %4149 = vmatprep.subr.bf16.mxu1 %v3277_v61  ;;  %v7033_v61 = vadd.s32 32, %v6886_v13  ;;  %vm3355_vm3 = vcmp.eq.s32.totalorder %v6980_v54, %v7036_v14  ;;  %vm3354_vm7 = vcmp.eq.s32.totalorder %v6983_v63, %v7036_v14  ;;  %vm7069_vm12 = vmpackc.low %vm3345_vm11, %vm3341_vm9  ;;  %vm3340_vm9 = vcmp.eq.s32.totalorder %v6909_v18, %v6989_v53  ;;  %v7975_v53 = vld [vmem:[#allocation70_spill] sm:$0xff] }
 0x279   : > { %vm3344_vm11 = vcmp.eq.s32.totalorder %v6909_v18, %v6992_v26 }
 0x27a   : > { %vm3351_vm2 = vcmp.eq.s32.totalorder %v6980_v54, %v7033_v61  ;;  %vm3350_vm6 = vcmp.eq.s32.totalorder %v6983_v63, %v7033_v61 }
 0x27b   : > { %4150 = vmatpush3.bf16.msra.mxu1 %v3269_v16  ;;  %vm7044_vm4 = vmpackc.low %vm3355_vm3, %vm3351_vm2 }
 0x27c   : > { %vm7052_vm8 = vmpackc.low %vm3354_vm7, %vm3350_vm6 }
 0x27e   : > { %v4393_v46 = vpop.f32.mrb[24].mxu1 }
 0x27f   : > { %v2281_v10 = vadd.f32 %v4393_v46, %v6788_v28  ;;  %v2272_v20 = vpop.f32.mrb[25].mxu1  ;;  %v7961_v46 = vld [vmem:[#allocation67_spill] sm:$0xff] }
 0x280   : > { %v2273_v2 = vadd.f32 %v6788_v28, %v2272_v20  ;;  %v4394_v35 = vpop.f32.mrb[26].mxu1  ;;  %v7962_v20 = vld [vmem:[#allocation68_spill] sm:$0xff] }
 0x281   : > { %v3228_v49 = vmul.f32 %v7947_v60, %v2281_v10  ;;  %v2284_v45 = vadd.f32 %v4394_v35, %v6788_v28  ;;  %v2275_v40 = vpop.f32.mrb[27].mxu1  ;;  %v7963_v60 = vmov 0 }
 0x282   : > { %v3226_v55 = vmul.f32 %v7948_v32, %v2273_v2  ;;  %v2276_v38 = vadd.f32 %v6788_v28, %v2275_v40  ;;  %v7964_v60 = vsel %vm7044_vm4, 4294967295, %v7963_v60  ;;  %v7064_v40 = vadd.s32 48, %v6886_v13 }
 0x283   : > { %v3229_v48 = vmul.f32 %v7949_v29, %v2284_v45  ;;  %v7965_v45 = vmov 0  ;;  %v7067_v32 = vadd.s32 56, %v6886_v13 }
 0x284   : > { %v3227_v52 = vmul.f32 %v7950_v19, %v2276_v38  ;;  %v7966_v45 = vsel %vm7052_vm8, 4294967295, %v7965_v45  ;;  %vm3359_vm13 = vcmp.eq.s32.totalorder %v6980_v54, %v7064_v40  ;;  %vm3358_vm3 = vcmp.eq.s32.totalorder %v6983_v63, %v7064_v40 }
 0x285   : > { %v3279_v16 = vpack.c.bf16 %v3229_v48, %v3228_v49  ;;  %vm3363_vm14 = vcmp.eq.s32.totalorder %v6980_v54, %v7067_v32  ;;  %vm3362_vm6 = vcmp.eq.s32.totalorder %v6983_v63, %v7067_v32 }
 0x286   : > { %v3278_v15 = vpack.c.bf16 %v3227_v52, %v3226_v55  ;;  %vm7080_vm2 = vmpackc.low %vm3363_vm14, %vm3359_vm13  ;;  %vm3349_vm13 = vcmp.eq.s32.totalorder %v6902_v58, %v7033_v61  ;;  %vm3353_vm14 = vcmp.eq.s32.totalorder %v6902_v58, %v7036_v14  ;;  %v7113_v52 = vadd.s32 64, %v6886_v13 }
 0x287   : > { %v7970_v4 = vsel %vm7080_vm2, 4294967295, %v7969_v4  ;;  %vm7088_vm7 = vmpackc.low %vm3362_vm6, %vm3358_vm3 }
 0x288   : > { %4151 = vmatprep.subr.bf16.mxu1 %v3278_v15  ;;  %v7972_v11 = vsel %vm7088_vm7, 4294967295, %v7971_v11  ;;  %v7974_v15 = vld [vmem:[#allocation43_spill] sm:$0xff]  ;;  %vm3367_vm3 = vcmp.eq.s32.totalorder %v6980_v54, %v7113_v52 }
 0x289   : > { %4152 = vmatpush3.bf16.msra.mxu1 %v3270_v42 }
 0x28a   : > { %4153 = vmatprep.subr.bf16.mxu1 %v3279_v16  ;;  %v7116_v16 = vadd.s32 72, %v6886_v13 }
 0x28c   : > { %vm3371_vm6 = vcmp.eq.s32.totalorder %v6980_v54, %v7116_v16 }
 0x28d   : > { %4154 = vmatpush3.bf16.msra.mxu1 %v3271_v36  ;;  %vm7132_vm7 = vmpackc.low %vm3371_vm6, %vm3367_vm3  ;;  %vm3352_vm3 = vcmp.eq.s32.totalorder %v6909_v18, %v7036_v14  ;;  %vm3357_vm6 = vcmp.eq.s32.totalorder %v6902_v58, %v7064_v40 }
 0x291   : > { %v4397_v50 = vpop.f32.mrb[28].mxu1 }
 0x292   : > { %v2297_v12 = vadd.f32 %v4397_v50, %v6788_v28  ;;  %v2288_v36 = vpop.f32.mrb[29].mxu1  ;;  %v7976_v50 = vld [vmem:[#allocation4_spill] sm:$0xff] }
 0x293   : > { %v2289_v43 = vadd.f32 %v6788_v28, %v2288_v36  ;;  %v4398_v21 = vpop.f32.mrb[30].mxu1  ;;  %v7977_v36 = vmov 0 }
 0x294   : > { %v3232_v33 = vmul.f32 %v7957_v57, %v2297_v12  ;;  %v2300_v17 = vadd.f32 %v4398_v21, %v6788_v28  ;;  %v2291_v8 = vpop.f32.mrb[31].mxu1  ;;  %v7978_v36 = vsel %vm7132_vm7, 4294967295, %v7977_v36  ;;  %v7979_v21 = vmov 0 }
 0x295   : > { %v3230_v62 = vmul.f32 %v7960_v7, %v2289_v43  ;;  %v2292_v6 = vadd.f32 %v6788_v28, %v2291_v8  ;;  %v7981_v8 = vmov 0  ;;  %v7983_v7 = vmov 0 }
 0x296   : > { %v3233_v10 = vmul.f32 %v7961_v46, %v2300_v17  ;;  %v7162_v17 = vadd.s32 88, %v6886_v13 }
 0x297   : > { %v3231_v2 = vmul.f32 %v7962_v20, %v2292_v6  ;;  %v7196_v20 = vadd.s32 104, %v6886_v13 }
 0x298   : > { %v3281_v35 = vpack.c.bf16 %v3233_v10, %v3232_v33  ;;  %v7159_v33 = vadd.s32 80, %v6886_v13  ;;  %vm3378_vm8 = vcmp.eq.s32.totalorder %v6983_v63, %v7162_v17  ;;  %v7193_v10 = vadd.s32 96, %v6886_v13 }
 0x299   : > { %v3280_v49 = vpack.c.bf16 %v3231_v2, %v3230_v62  ;;  %v7985_v2 = vld [vmem:[#allocation72_spill] sm:$0xff] }
 0x29a   : > { %vm3374_vm2 = vcmp.eq.s32.totalorder %v6983_v63, %v7159_v33 }
 0x29b   : > { %4155 = vmatprep.subr.bf16.mxu1 %v3280_v49  ;;  %vm7176_vm4 = vmpackc.low %vm3378_vm8, %vm3374_vm2  ;;  %vm3365_vm8 = vcmp.eq.s32.totalorder %v6902_v58, %v7113_v52  ;;  %vm3369_vm2 = vcmp.eq.s32.totalorder %v6902_v58, %v7116_v16 }
 0x29c   : > { %4156 = vmatpush3.bf16.msra.mxu1 %v3272_v27  ;;  %v7984_v7 = vsel %vm7176_vm4, 4294967295, %v7983_v7 }
 0x29d   : > { %4157 = vmatprep.subr.bf16.mxu1 %v3281_v35 }
 0x2a0   : > { %4158 = vmatpush3.bf16.msra.mxu1 %v3273_v41 }
 0x2a3   : > { %3958 = vmatmul.mubr.msk.bf16.vlgmr.msra.gmra.mrb[64].mxu1 %vm6930_vm5, %v7936_v39  ;;  %vm3961_vm5 = vmpackc.low %vm3344_vm11, %vm3340_vm9  ;;  %vm3366_vm9 = vcmp.eq.s32.totalorder %v6983_v63, %v7113_v52  ;;  %vm3370_vm11 = vcmp.eq.s32.totalorder %v6983_v63, %v7116_v16 }
 0x2a4   : > { %v4401_v27 = vpop.f32.mrb[32].mxu1  ;;  %3960 = vmatprep.mubr.msk.bf16.mxu1 %vm7069_vm12, %v7936_v39  ;;  %vm3963_vm12 = vmpackc.low %vm3353_vm14, %vm3349_vm13  ;;  %vm3348_vm14 = vcmp.eq.s32.totalorder %v6909_v18, %v7033_v61 }
 0x2a5   : > { %v2313_v38 = vadd.f32 %v4401_v27, %v6788_v28  ;;  %v2304_v29 = vpop.f32.mrb[33].mxu1  ;;  %vm7142_vm13 = vmpackc.low %vm3370_vm11, %vm3366_vm9  ;;  %vm3361_vm9 = vcmp.eq.s32.totalorder %v6902_v58, %v7067_v32 }
 0x2a6   : > { %v2305_v5 = vadd.f32 %v6788_v28, %v2304_v29  ;;  %v4402_v59 = vpop.f32.mrb[34].mxu1  ;;  %v7980_v21 = vsel %vm7142_vm13, 4294967295, %v7979_v21  ;;  %vm3967_vm11 = vmpackc.low %vm3361_vm9, %vm3357_vm6  ;;  %vm3375_vm13 = vcmp.eq.s32.totalorder %v6980_v54, %v7159_v33  ;;  %vm3383_vm9 = vcmp.eq.s32.totalorder %v6980_v54, %v7193_v10 }
 0x2a7   : > { %v7109_v41 = vmul.f32 %v7973_v56, %v2313_v38  ;;  %v2316_v48 = vadd.f32 %v4402_v59, %v6788_v28  ;;  %v2307_v19 = vpop.f32.mrb[35].mxu1  ;;  %vm3971_vm6 = vmpackc.low %vm3369_vm2, %vm3365_vm8  ;;  %v7987_v38 = vld [vmem:[#allocation74_spill] sm:$0xff]  ;;  %v7990_v59 = vld [vmem:[#allocation76_spill] sm:$0xff]  ;;  %vm3364_vm8 = vcmp.eq.s32.totalorder %v6909_v18, %v7113_v52  ;;  %vm3368_vm2 = vcmp.eq.s32.totalorder %v6909_v18, %v7116_v16 }
 0x2a8   : > { %v7119_v0 = vmul.f32 %v7974_v15, %v2305_v5  ;;  %v2308_v3 = vadd.f32 %v6788_v28, %v2307_v19  ;;  %v7988_v5 = vmov 0 }
 0x2a9   : > { %v7123_v26 = vmul.f32 %v7975_v53, %v2316_v48  ;;  %v7991_v48 = vmov 0  ;;  %v3315_v53 = vadd.s32 120, %v6886_v13 }
 0x2aa   : > { %v7130_v12 = vmul.f32 %v7976_v50, %v2308_v3  ;;  %v3314_v3 = vadd.s32 112, %v6886_v13 }
 0x2ab   : > { %v3283_v43 = vpack.c.bf16 %v7123_v26, %v7109_v41  ;;  %3962 = vmatmul.mubr.msk.bf16.gmra.mrb[68].mxu1 %vm3961_vm5, %v7936_v39  ;;  %vm3965_vm5 = vmpackc.low %vm3352_vm3, %vm3348_vm14  ;;  %vm3356_vm14 = vcmp.eq.s32.totalorder %v6909_v18, %v7064_v40  ;;  %vm3394_vm4 = vcmp.eq.s32.totalorder %v6983_v63, %v3315_v53 }
 0x2ac   : > { %v3282_v57 = vpack.c.bf16 %v7130_v12, %v7119_v0  ;;  %3964 = vmatprep.mubr.msk.bf16.mxu1 %vm3963_vm12, %v7936_v39  ;;  %vm3379_vm12 = vcmp.eq.s32.totalorder %v6980_v54, %v7162_v17 }
 0x2ad   : > { %vm7168_vm7 = vmpackc.low %vm3379_vm12, %vm3375_vm13  ;;  %vm3360_vm13 = vcmp.eq.s32.totalorder %v6909_v18, %v7067_v32  ;;  %v7986_v32 = vld [vmem:[#allocation73_spill] sm:$0xff]  ;;  %vm3382_vm12 = vcmp.eq.s32.totalorder %v6983_v63, %v7193_v10 }
 0x2ae   : > { %v7982_v8 = vsel %vm7168_vm7, 4294967295, %v7981_v8  ;;  %vm3969_vm3 = vmpackc.low %vm3360_vm13, %vm3356_vm14  ;;  %vm3386_vm14 = vcmp.eq.s32.totalorder %v6983_v63, %v7196_v20 }
 0x2af   : > { %vm7224_vm13 = vmpackc.low %vm3386_vm14, %vm3382_vm12  ;;  %vm3391_vm14 = vcmp.eq.s32.totalorder %v6980_v54, %v3314_v3 }
 0x2b0   : > { %v7992_v48 = vsel %vm7224_vm13, 4294967295, %v7991_v48  ;;  %vm3973_vm12 = vmpackc.low %vm3368_vm2, %vm3364_vm8  ;;  %vm3395_vm13 = vcmp.eq.s32.totalorder %v6980_v54, %v3315_v53  ;;  %vm3372_vm8 = vcmp.eq.s32.totalorder %v6909_v18, %v7159_v33  ;;  %vm3385_vm2 = vcmp.eq.s32.totalorder %v6902_v58, %v7196_v20 }
 0x2b3   : > { %3966 = vmatmul.mubr.msk.bf16.gmra.mrb[72].mxu1 %vm3965_vm5, %v7936_v39  ;;  %vm3387_vm5 = vcmp.eq.s32.totalorder %v6980_v54, %v7196_v20 }
 0x2b4   : > { %3968 = vmatprep.mubr.msk.bf16.mxu1 %vm3967_vm11, %v7936_v39  ;;  %vm7213_vm11 = vmpackc.low %vm3387_vm5, %vm3383_vm9  ;;  %vm3373_vm9 = vcmp.eq.s32.totalorder %v6902_v58, %v7159_v33  ;;  %vm3377_vm5 = vcmp.eq.s32.totalorder %v6902_v58, %v7162_v17 }
 0x2b5   : > { %v7989_v5 = vsel %vm7213_vm11, 4294967295, %v7988_v5  ;;  %vm7246_vm11 = vmpackc.low %vm3395_vm13, %vm3391_vm14  ;;  %vm3376_vm13 = vcmp.eq.s32.totalorder %v6909_v18, %v7162_v17  ;;  %v7998_v17 = vld [vmem:[#allocation77_spill] sm:$0xff]  ;;  %vm3389_vm14 = vcmp.eq.s32.totalorder %v6902_v58, %v3314_v3 }
 0x2b7   : > { %v4405_v62 = vpop.f32.mrb[36].mxu1 }
 0x2b8   : > { %v2329_v6 = vadd.f32 %v4405_v62, %v6788_v28  ;;  %v2320_v61 = vpop.f32.mrb[37].mxu1 }
 0x2b9   : > { %v2321_v14 = vadd.f32 %v6788_v28, %v2320_v61  ;;  %v4406_v46 = vpop.f32.mrb[38].mxu1 }
 0x2ba   : > { %v7199_v35 = vmul.f32 %v7985_v2, %v2329_v6  ;;  %v2332_v49 = vadd.f32 %v4406_v46, %v6788_v28  ;;  %v2323_v40 = vpop.f32.mrb[39].mxu1  ;;  %v7997_v6 = vld [vmem:[#allocation6_spill] sm:$0xff] }
 0x2bb   : > { %v7203_v55 = vmul.f32 %v7986_v32, %v2321_v14  ;;  %v2324_v27 = vadd.f32 %v6788_v28, %v2323_v40  ;;  %3970 = vmatmul.mubr.msk.bf16.gmra.mrb[76].mxu1 %vm3969_vm3, %v7936_v39  ;;  %vm3975_vm3 = vmpackc.low %vm3377_vm5, %vm3373_vm9  ;;  %v8000_v32 = vld [vmem:[#allocation79_spill] sm:$0xff] }
 0x2bc   : > { %v7211_v29 = vmul.f32 %v7987_v38, %v2332_v49  ;;  %3972 = vmatprep.mubr.msk.bf16.mxu1 %vm3971_vm6, %v7936_v39  ;;  %vm3390_vm6 = vcmp.eq.s32.totalorder %v6983_v63, %v3314_v3  ;;  %vm3977_vm9 = vmpackc.low %vm3376_vm13, %vm3372_vm8  ;;  %v7999_v49 = vld [vmem:[#allocation78_spill] sm:$0xff] }
 0x2bd   : > { %v7222_v56 = vmul.f32 %v7990_v59, %v2324_v27  ;;  %vm7252_vm7 = vmpackc.low %vm3394_vm4, %vm3390_vm6  ;;  %vm3381_vm4 = vcmp.eq.s32.totalorder %v6902_v58, %v7193_v10  ;;  %vm3393_vm6 = vcmp.eq.s32.totalorder %v6902_v58, %v3315_v53 }
 0x2be   : > { %vm3979_vm5 = vmpackc.low %vm3385_vm2, %vm3381_vm4  ;;  %vm3388_vm4 = vcmp.eq.s32.totalorder %v6909_v18, %v3314_v3  ;;  %vm3392_vm2 = vcmp.eq.s32.totalorder %v6909_v18, %v3315_v53  ;;  %v8005_v53 = vld [vmem:[#allocation48_spill] sm:$0xff] }
 0x2bf   : > { %v3284_v15 = vpack.c.bf16 %v7222_v56, %v7203_v55  ;;  %vm3983_vm13 = vmpackc.low %vm3393_vm6, %vm3389_vm14  ;;  %vm8023_vm14 = vnez %v7984_v7  ;;  %vm8024_vm6 = vnez %v7989_v5 }
 0x2c3   : > { %3974 = vmatmul.mubr.msk.bf16.gmra.mrb[80].mxu1 %vm3973_vm12, %v7936_v39  ;;  %vm3380_vm12 = vcmp.eq.s32.totalorder %v6909_v18, %v7193_v10 }
 0x2c4   : > { %3976 = vmatprep.mubr.msk.bf16.mxu1 %vm3975_vm3, %v7936_v39  ;;  %vm3384_vm3 = vcmp.eq.s32.totalorder %v6909_v18, %v7196_v20  ;;  %v8002_v20 = vld [vmem:[#allocation51_spill] sm:$0xff] }
 0x2c5   : > { %vm3981_vm8 = vmpackc.low %vm3384_vm3, %vm3380_vm12  ;;  %vm8018_vm12 = vnez %v7970_v4  ;;  %vm8022_vm3 = vnez %v7982_v8 }
 0x2ca   : > { %v4409_v13 = vpop.f32.mrb[40].mxu1 }
 0x2cb   : > { %v2345_v54 = vadd.f32 %v4409_v13, %v6788_v28  ;;  %v2336_v50 = vpop.f32.mrb[41].mxu1  ;;  %3978 = vmatmul.mubr.msk.bf16.gmra.mrb[84].mxu1 %vm3977_vm9, %v7936_v39  ;;  %vm3985_vm9 = vmpackc.low %vm3392_vm2, %vm3388_vm4 }
 0x2cc   : > { %v2337_v63 = vadd.f32 %v6788_v28, %v2336_v50  ;;  %v4410_v62 = vpop.f32.mrb[42].mxu1  ;;  %3980 = vmatprep.mubr.msk.bf16.mxu1 %vm3979_vm5, %v7936_v39  ;;  %vm8017_vm5 = vnez %v7966_v45 }
 0x2cd   : > { %v7269_v61 = vmul.f32 %v7997_v6, %v2345_v54  ;;  %v2348_v33 = vadd.f32 %v4410_v62, %v6788_v28  ;;  %v2339_v14 = vpop.f32.mrb[43].mxu1  ;;  %v8001_v6 = vld [vmem:[#allocation8_spill] sm:$0xff] }
 0x2ce   : > { %v7273_v46 = vmul.f32 %v7998_v17, %v2337_v63  ;;  %v2340_v2 = vadd.f32 %v6788_v28, %v2339_v14 }
 0x2cf   : > { %v7277_v40 = vmul.f32 %v7999_v49, %v2348_v33 }
 0x2d0   : > { %v7280_v27 = vmul.f32 %v8000_v32, %v2340_v2  ;;  %v8003_v2 = vld [vmem:[#allocation80_spill] sm:$0xff]  ;;  %v8004_v32 = vld [vmem:[#allocation81_spill] sm:$0xff] }
 0x2d3   : > { %3982 = vmatmul.mubr.msk.bf16.gmra.mrb[88].mxu1 %vm3981_vm8, %v7936_v39  ;;  %vm8025_vm8 = vnez %v7992_v48 }
 0x2d4   : > { %v4413_v13 = vpop.f32.mrb[44].mxu1  ;;  %3984 = vmatprep.mubr.msk.bf16.mxu1 %vm3983_vm13, %v7936_v39 }
 0x2d5   : > { %v2361_v54 = vadd.f32 %v4413_v13, %v6788_v28  ;;  %v2352_v50 = vpop.f32.mrb[45].mxu1 }
 0x2d6   : > { %v2353_v63 = vadd.f32 %v6788_v28, %v2352_v50  ;;  %v4414_v62 = vpop.f32.mrb[46].mxu1 }
 0x2d7   : > { %v7297_v33 = vmul.f32 %v8001_v6, %v2361_v54  ;;  %v2364_v10 = vadd.f32 %v4414_v62, %v6788_v28  ;;  %v2355_v14 = vpop.f32.mrb[47].mxu1  ;;  %v8007_v54 = vld [vmem:[#allocation82_spill] sm:$0xff] }
 0x2d8   : > { %v7301_v17 = vmul.f32 %v8002_v20, %v2353_v63  ;;  %v2356_v58 = vadd.f32 %v6788_v28, %v2355_v14 }
 0x2d9   : > { %v7306_v49 = vmul.f32 %v8003_v2, %v2364_v10 }
 0x2da   : > { %v7310_v13 = vmul.f32 %v8004_v32, %v2356_v58  ;;  %v8006_v58 = vld [vmem:[#allocation31_spill] sm:$0xff] }
 0x2db   : > { %3986 = vmatmul.mubr.msk.bf16.gmra.mrb[92].mxu1 %vm3985_vm9, %v7936_v39 }
 0x2dc   : > { %3988 = vmatprep.mubr.msk.bf16.mxu1 %vm7002_vm10, %v7936_v39  ;;  %vm8016_vm10 = vnez %v7964_v60 }
 0x2e1   : > { %v4417_v63 = vpop.f32.mrb[48].mxu1 }
 0x2e2   : > { %v2377_v62 = vadd.f32 %v4417_v63, %v6788_v28  ;;  %v2368_v6 = vpop.f32.mrb[49].mxu1  ;;  %v8008_v63 = vld [vmem:[#allocation83_spill] sm:$0xff] }
 0x2e3   : > { %v2369_v3 = vadd.f32 %v6788_v28, %v2368_v6  ;;  %v4418_v18 = vpop.f32.mrb[50].mxu1 }
 0x2e4   : > { %v3252_v10 = vmul.f32 %v8005_v53, %v2377_v62  ;;  %v2380_v14 = vadd.f32 %v4418_v18, %v6788_v28  ;;  %v2371_v20 = vpop.f32.mrb[51].mxu1  ;;  %v8009_v53 = vld [vmem:[#allocation9_spill] sm:$0xff] }
 0x2e5   : > { %v3250_v2 = vmul.f32 %v8006_v58, %v2369_v3  ;;  %v2372_v32 = vadd.f32 %v6788_v28, %v2371_v20 }
 0x2e6   : > { %v3253_v50 = vmul.f32 %v8007_v54, %v2380_v14 }
 0x2e7   : > { %v3251_v38 = vmul.f32 %v8008_v63, %v2372_v32 }
 0x2e8   : > { %v3291_v59 = vpack.c.bf16 %v3253_v50, %v3252_v10 }
 0x2e9   : > { %v3290_v19 = vpack.c.bf16 %v3251_v38, %v3250_v2 }
 0x2eb   : > { %4207 = vmatprep.subr.bf16.mxu1 %v3290_v19 }
 0x2ec   : > { %4208 = vmatpush3.bf16.msra.mxu1 %v3282_v57  ;;  %v8010_v57 = vld [vmem:[#allocation12_spill] sm:$0xff] }
 0x2ed   : > { %4209 = vmatprep.subr.bf16.mxu1 %v3291_v59 }
 0x2ee   : > { %v4421_v1 = vpop.f32.mrb[52].mxu1 }
 0x2ef   : > { %v2393_v62 = vadd.f32 %v4421_v1, %v6788_v28  ;;  %v2384_v6 = vpop.f32.mrb[53].mxu1 }
 0x2f0   : > { %v2385_v3 = vadd.f32 %v6788_v28, %v2384_v6  ;;  %v4422_v18 = vpop.f32.mrb[54].mxu1  ;;  %4210 = vmatpush3.bf16.msra.mxu1 %v3283_v43 }
 0x2f1   : > { %v3256_v20 = vmul.f32 %v8009_v53, %v2393_v62  ;;  %v2396_v54 = vadd.f32 %v4422_v18, %v6788_v28  ;;  %v2387_v14 = vpop.f32.mrb[55].mxu1  ;;  %v8011_v62 = vpack.c.bf16 %v7211_v29, %v7199_v35  ;;  %v8013_v53 = vpack.c.bf16 %v7277_v40, %v7269_v61 }
 0x2f2   : > { %v3254_v0 = vmul.f32 %v6563_v24, %v2385_v3  ;;  %v2388_v12 = vadd.f32 %v6788_v28, %v2387_v14  ;;  %v8015_v61 = vpack.c.bf16 %v7306_v49, %v7297_v33 }
 0x2f3   : > { %v3257_v19 = vmul.f32 %v8010_v57, %v2396_v54 }
 0x2f4   : > { %v3255_v38 = vmul.f32 %v6582_v34, %v2388_v12 }
 0x2f5   : > { %v3293_v59 = vpack.c.bf16 %v3257_v19, %v3256_v20 }
 0x2f6   : > { %v3292_v50 = vpack.c.bf16 %v3255_v38, %v3254_v0 }
 0x2f8   : > { %v4425_v10 = vpop.f32.mrb[56].mxu1  ;;  %4211 = vmatprep.subr.bf16.mxu1 %v3292_v50 }
 0x2f9   : > { %v2409_v58 = vadd.f32 %v4425_v10, %v6788_v28  ;;  %v2400_v2 = vpop.f32.mrb[57].mxu1  ;;  %4212 = vmatpush3.bf16.msra.mxu1 %v3284_v15 }
 0x2fa   : > { %v2401_v41 = vadd.f32 %v6788_v28, %v2400_v2  ;;  %v4426_v24 = vpop.f32.mrb[58].mxu1  ;;  %4213 = vmatprep.subr.bf16.mxu1 %v3293_v59 }
 0x2fb   : > { %v3260_v26 = vmul.f32 %v6608_v44, %v2409_v58  ;;  %v2412_v43 = vadd.f32 %v4426_v24, %v6788_v28  ;;  %v2403_v34 = vpop.f32.mrb[59].mxu1  ;;  %v8012_v44 = vpack.c.bf16 %v7280_v27, %v7273_v46 }
 0x2fc   : > { %v3258_v32 = vmul.f32 %v6616_v23, %v2401_v41  ;;  %v2404_v63 = vadd.f32 %v6788_v28, %v2403_v34 }
 0x2fd   : > { %v3261_v1 = vmul.f32 %v6620_v9, %v2412_v43  ;;  %4214 = vmatpush3.bf16.msra.mxu1 %v8011_v62 }
 0x2fe   : > { %v3259_v55 = vmul.f32 %v6629_v31, %v2404_v63 }
 0x2ff   : > { %v3295_v56 = vpack.c.bf16 %v3261_v1, %v3260_v26 }
 0x300   : > { %v3294_v15 = vpack.c.bf16 %v3259_v55, %v3258_v32 }
 0x302   : > { %4215 = vmatprep.subr.bf16.mxu1 %v3294_v15 }
 0x303   : > { %4216 = vmatpush3.bf16.msra.mxu1 %v8012_v44 }
 0x304   : > { %4217 = vmatprep.subr.bf16.mxu1 %v3295_v56 }
 0x305   : > { %v4429_v6 = vpop.f32.mrb[60].mxu1 }
 0x306   : > { %v2425_v23 = vadd.f32 %v4429_v6, %v6788_v28  ;;  %v2416_v3 = vpop.f32.mrb[61].mxu1 }
 0x307   : > { %v2417_v9 = vadd.f32 %v6788_v28, %v2416_v3  ;;  %v4430_v18 = vpop.f32.mrb[62].mxu1  ;;  %4218 = vmatpush3.bf16.msra.mxu1 %v8013_v53 }
 0x308   : > { %v3264_v35 = vmul.f32 %v6654_v22, %v2425_v23  ;;  %v2428_v29 = vadd.f32 %v4430_v18, %v6788_v28  ;;  %v2419_v31 = vpop.f32.mrb[63].mxu1  ;;  %v8014_v22 = vpack.c.bf16 %v7310_v13, %v7301_v17 }
 0x309   : > { %v3262_v46 = vmul.f32 %v6660_v47, %v2417_v9  ;;  %v2420_v27 = vadd.f32 %v6788_v28, %v2419_v31 }
 0x30a   : > { %v3265_v20 = vmul.f32 %v6668_v37, %v2428_v29 }
 0x30b   : > { %v3263_v54 = vmul.f32 %v6672_v51, %v2420_v27 }
 0x30c   : > { %v3297_v14 = vpack.c.bf16 %v3265_v20, %v3264_v35 }
 0x30d   : > { %v3296_v0 = vpack.c.bf16 %v3263_v54, %v3262_v46 }
 0x30f   : > { %4219 = vmatprep.subr.bf16.mxu1 %v3296_v0 }
 0x310   : > { %4220 = vmatpush3.bf16.msra.mxu1 %v8014_v22 }
 0x311   : > { %4221 = vmatprep.subr.bf16.mxu1 %v3297_v14 }
 0x314   : > { %4222 = vmatpush3.bf16.msra.mxu1 %v8015_v61 }
 0x317   : > { %3990 = vmatmul.mubr.msk.bf16.vlgmr.msra.gmra.mrb[96].mxu1 %vm7015_vm15, %v7936_v39  ;;  %vm8019_vm15 = vnez %v7972_v11 }
 0x318   : > { %3992 = vmatprep.mubr.msk.bf16.mxu1 %vm7020_vm0, %v7936_v39  ;;  %vm8020_vm0 = vnez %v7978_v36 }
 0x31f   : > { %3994 = vmatmul.mubr.msk.bf16.gmra.mrb[100].mxu1 %vm7026_vm1, %v7936_v39  ;;  %vm8021_vm1 = vnez %v7980_v21 }
 0x320   : > { %3996 = vmatprep.mubr.msk.bf16.mxu1 %vm8016_vm10, %v7936_v39 }
 0x327   : > { %3998 = vmatmul.mubr.msk.bf16.gmra.mrb[104].mxu1 %vm8017_vm5, %v7936_v39 }
 0x328   : > { %4000 = vmatprep.mubr.msk.bf16.mxu1 %vm8018_vm12, %v7936_v39 }
 0x32f   : > { %4002 = vmatmul.mubr.msk.bf16.gmra.mrb[108].mxu1 %vm8019_vm15, %v7936_v39 }
 0x330   : > { %4004 = vmatprep.mubr.msk.bf16.mxu1 %vm8020_vm0, %v7936_v39 }
 0x337   : > { %4006 = vmatmul.mubr.msk.bf16.gmra.mrb[112].mxu1 %vm8021_vm1, %v7936_v39 }
 0x338   : > { %4008 = vmatprep.mubr.msk.bf16.mxu1 %vm8022_vm3, %v7936_v39 }
 0x33f   : > { %4010 = vmatmul.mubr.msk.bf16.gmra.mrb[116].mxu1 %vm8023_vm14, %v7936_v39 }
 0x340   : > { %4012 = vmatprep.mubr.msk.bf16.mxu1 %vm8024_vm6, %v7936_v39 }
 0x347   : > { %4014 = vmatmul.mubr.msk.bf16.gmra.mrb[120].mxu1 %vm8025_vm8, %v7936_v39 }
 0x348   : > { %4016 = vmatprep.mubr.msk.bf16.mxu1 %vm7246_vm11, %v7936_v39 }
 0x34f   : > { %4018 = vmatmul.mubr.msk.bf16.gmra.mrb[124].mxu1 %vm7252_vm7, %v7936_v39 }
 0x376   : > { %v4159_v47 = vpop.f32.mrb[64].mxu1 }
 0x377   : > { %v4160_v37 = vpop.f32.mrb[65].mxu1 }
 0x378   : > { %v4161_v51 = vadd.f32 %v4160_v37, %v4159_v47  ;;  %v4162_v28 = vpop.f32.mrb[66].mxu1 }
 0x379   : > { %v4163_v42 = vpop.f32.mrb[67].mxu1 }
 0x37a   : > { %v4164_v25 = vadd.f32 %v4163_v42, %v4162_v28 }
 0x37e   : > { %v4165_v30 = vpop.f32.mrb[68].mxu1 }
 0x37f   : > { %v4166_v60 = vpop.f32.mrb[69].mxu1 }
 0x380   : > { %v4167_v45 = vadd.f32 %v4166_v60, %v4165_v30  ;;  %v4168_v4 = vpop.f32.mrb[70].mxu1 }
 0x381   : > { %v4169_v11 = vpop.f32.mrb[71].mxu1 }
 0x382   : > { %v4170_v36 = vadd.f32 %v4169_v11, %v4168_v4 }
 0x386   : > { %v4171_v21 = vpop.f32.mrb[72].mxu1 }
 0x387   : > { %v4172_v8 = vpop.f32.mrb[73].mxu1 }
 0x388   : > { %v4173_v7 = vadd.f32 %v4172_v8, %v4171_v21  ;;  %v4174_v5 = vpop.f32.mrb[74].mxu1 }
 0x389   : > { %v4175_v48 = vpop.f32.mrb[75].mxu1 }
 0x38a   : > { %v4176_v52 = vadd.f32 %v4175_v48, %v4174_v5 }
 0x38e   : > { %v4177_v16 = vpop.f32.mrb[76].mxu1 }
 0x38f   : > { %v4178_v39 = vpop.f32.mrb[77].mxu1 }
 0x390   : > { %v7423_v40 = vadd.f32 %v4178_v39, %v4177_v16  ;;  %v4180_v33 = vpop.f32.mrb[78].mxu1 }
 0x391   : > { %v4181_v17 = vpop.f32.mrb[79].mxu1 }
 0x392   : > { %v7425_v49 = vadd.f32 %v4181_v17, %v4180_v33 }
 0x396   : > { %v4183_v13 = vpop.f32.mrb[80].mxu1 }
 0x397   : > { %v4184_v12 = vpop.f32.mrb[81].mxu1 }
 0x398   : > { %v7427_v57 = vadd.f32 %v4184_v12, %v4183_v13  ;;  %v4186_v19 = vpop.f32.mrb[82].mxu1 }
 0x399   : > { %v4187_v38 = vpop.f32.mrb[83].mxu1 }
 0x39a   : > { %v7429_v59 = vadd.f32 %v4187_v38, %v4186_v19 }
 0x39e   : > { %v4189_v50 = vpop.f32.mrb[84].mxu1 }
 0x39f   : > { %v4190_v10 = vpop.f32.mrb[85].mxu1 }
 0x3a0   : > { %v7431_v58 = vadd.f32 %v4190_v10, %v4189_v50  ;;  %v4192_v2 = vpop.f32.mrb[86].mxu1 }
 0x3a1   : > { %v4193_v41 = vpop.f32.mrb[87].mxu1 }
 0x3a2   : > { %v7433_v24 = vadd.f32 %v4193_v41, %v4192_v2 }
 0x3a6   : > { %v4195_v26 = vpop.f32.mrb[88].mxu1 }
 0x3a7   : > { %v4196_v43 = vpop.f32.mrb[89].mxu1 }
 0x3a8   : > { %v7435_v34 = vadd.f32 %v4196_v43, %v4195_v26  ;;  %v4198_v32 = vpop.f32.mrb[90].mxu1 }
 0x3a9   : > { %v4199_v63 = vpop.f32.mrb[91].mxu1 }
 0x3aa   : > { %v7437_v1 = vadd.f32 %v4199_v63, %v4198_v32 }
 0x3ae   : > { %v4201_v62 = vpop.f32.mrb[92].mxu1 }
 0x3af   : > { %v4202_v55 = vpop.f32.mrb[93].mxu1 }
 0x3b0   : > { %v7439_v56 = vadd.f32 %v4202_v55, %v4201_v62  ;;  %v4204_v15 = vpop.f32.mrb[94].mxu1 }
 0x3b1   : > { %v4205_v44 = vpop.f32.mrb[95].mxu1 }
 0x3b2   : > { %v7441_v6 = vadd.f32 %v4205_v44, %v4204_v15 }
 0x3ea   : > { %v4223_v23 = vpop.f32.mrb[96].mxu1 }
 0x3eb   : > { %v4224_v3 = vpop.f32.mrb[97].mxu1 }
 0x3ec   : > { %v4225_v9 = vadd.f32 %v4224_v3, %v4223_v23  ;;  %v4226_v18 = vpop.f32.mrb[98].mxu1 }
 0x3ed   : > { %v4227_v35 = vpop.f32.mrb[99].mxu1 }
 0x3ee   : > { %v3640_v29 = vadd.f32 %v4225_v9, %v4161_v51  ;;  %v4228_v31 = vadd.f32 %v4227_v35, %v4226_v18 }
 0x3f0   : > { %v3643_v53 = vadd.f32 %v4228_v31, %v4164_v25  ;;  %3718 = vst [vmem:[%s7447_s10] sm:$0xff] %v3640_v29 }
 0x3f2   : > { %v4229_v46 = vpop.f32.mrb[100].mxu1  ;;  %3719 = vst [vmem:[%s7447_s10 + $0x8] sm:$0xff] %v3643_v53 }
 0x3f3   : > { %v4230_v27 = vpop.f32.mrb[101].mxu1 }
 0x3f4   : > { %v4231_v20 = vadd.f32 %v4230_v27, %v4229_v46  ;;  %v4232_v54 = vpop.f32.mrb[102].mxu1 }
 0x3f5   : > { %v4233_v14 = vpop.f32.mrb[103].mxu1 }
 0x3f6   : > { %v3648_v0 = vadd.f32 %v4231_v20, %v4167_v45  ;;  %v4234_v22 = vadd.f32 %v4233_v14, %v4232_v54 }
 0x3f8   : > { %v3651_v61 = vadd.f32 %v4234_v22, %v4170_v36  ;;  %3720 = vst [vmem:[%s7447_s10 + $0x10] sm:$0xff] %v3648_v0 }
 0x3fa   : > { %v4235_v47 = vpop.f32.mrb[104].mxu1  ;;  %3721 = vst [vmem:[%s7447_s10 + $0x18] sm:$0xff] %v3651_v61 }
 0x3fb   : > { %v4236_v37 = vpop.f32.mrb[105].mxu1 }
 0x3fc   : > { %v4237_v51 = vadd.f32 %v4236_v37, %v4235_v47  ;;  %v4238_v28 = vpop.f32.mrb[106].mxu1 }
 0x3fd   : > { %v4239_v42 = vpop.f32.mrb[107].mxu1 }
 0x3fe   : > { %v3656_v25 = vadd.f32 %v4237_v51, %v4173_v7  ;;  %v4240_v30 = vadd.f32 %v4239_v42, %v4238_v28 }
 0x400   : > { %v3659_v60 = vadd.f32 %v4240_v30, %v4176_v52  ;;  %3722 = vst [vmem:[%s7447_s10 + $0x20] sm:$0xff] %v3656_v25 }
 0x402   : > { %v4241_v4 = vpop.f32.mrb[108].mxu1  ;;  %3723 = vst [vmem:[%s7447_s10 + $0x28] sm:$0xff] %v3659_v60 }
 0x403   : > { %v4242_v11 = vpop.f32.mrb[109].mxu1 }
 0x404   : > { %v4243_v45 = vadd.f32 %v4242_v11, %v4241_v4  ;;  %v4244_v21 = vpop.f32.mrb[110].mxu1 }
 0x405   : > { %v4245_v36 = vpop.f32.mrb[111].mxu1 }
 0x406   : > { %v3664_v8 = vadd.f32 %v4243_v45, %v7423_v40  ;;  %v4246_v5 = vadd.f32 %v4245_v36, %v4244_v21 }
 0x408   : > { %v3667_v48 = vadd.f32 %v4246_v5, %v7425_v49  ;;  %3724 = vst [vmem:[%s7447_s10 + $0x30] sm:$0xff] %v3664_v8 }
 0x40a   : > { %v4247_v16 = vpop.f32.mrb[112].mxu1  ;;  %3725 = vst [vmem:[%s7447_s10 + $0x38] sm:$0xff] %v3667_v48 }
 0x40b   : > { %v4248_v7 = vpop.f32.mrb[113].mxu1 }
 0x40c   : > { %v4249_v39 = vadd.f32 %v4248_v7, %v4247_v16  ;;  %v4250_v52 = vpop.f32.mrb[114].mxu1 }
 0x40d   : > { %v4251_v33 = vpop.f32.mrb[115].mxu1 }
 0x40e   : > { %v3672_v17 = vadd.f32 %v4249_v39, %v7427_v57  ;;  %v4252_v13 = vadd.f32 %v4251_v33, %v4250_v52 }
 0x410   : > { %v3675_v12 = vadd.f32 %v4252_v13, %v7429_v59  ;;  %3726 = vst [vmem:[%s7447_s10 + $0x40] sm:$0xff] %v3672_v17 }
 0x412   : > { %v4253_v40 = vpop.f32.mrb[116].mxu1  ;;  %3727 = vst [vmem:[%s7447_s10 + $0x48] sm:$0xff] %v3675_v12 }
 0x413   : > { %v4254_v19 = vpop.f32.mrb[117].mxu1 }
 0x414   : > { %v4255_v38 = vadd.f32 %v4254_v19, %v4253_v40  ;;  %v4256_v49 = vpop.f32.mrb[118].mxu1 }
 0x415   : > { %v4257_v50 = vpop.f32.mrb[119].mxu1 }
 0x416   : > { %v3680_v10 = vadd.f32 %v4255_v38, %v7431_v58  ;;  %v4258_v2 = vadd.f32 %v4257_v50, %v4256_v49 }
 0x418   : > { %v3683_v41 = vadd.f32 %v4258_v2, %v7433_v24  ;;  %3728 = vst [vmem:[%s7447_s10 + $0x50] sm:$0xff] %v3680_v10 }
 0x41a   : > { %v4259_v57 = vpop.f32.mrb[120].mxu1  ;;  %3729 = vst [vmem:[%s7447_s10 + $0x58] sm:$0xff] %v3683_v41 }
 0x41b   : > { %v4260_v26 = vpop.f32.mrb[121].mxu1 }
 0x41c   : > { %v4261_v43 = vadd.f32 %v4260_v26, %v4259_v57  ;;  %v4262_v59 = vpop.f32.mrb[122].mxu1 }
 0x41d   : > { %v4263_v32 = vpop.f32.mrb[123].mxu1 }
 0x41e   : > { %v3688_v63 = vadd.f32 %v4261_v43, %v7435_v34  ;;  %v4264_v62 = vadd.f32 %v4263_v32, %v4262_v59 }
 0x420   : > { %v3691_v55 = vadd.f32 %v4264_v62, %v7437_v1  ;;  %3730 = vst [vmem:[%s7447_s10 + $0x60] sm:$0xff] %v3688_v63 }
 0x422   : > { %v4265_v58 = vpop.f32.mrb[124].mxu1  ;;  %3731 = vst [vmem:[%s7447_s10 + $0x68] sm:$0xff] %v3691_v55 }
 0x423   : > { %v4266_v15 = vpop.f32.mrb[125].mxu1 }
 0x424   : > { %v4267_v44 = vadd.f32 %v4266_v15, %v4265_v58  ;;  %v4268_v24 = vpop.f32.mrb[126].mxu1 }
 0x425   : > { %v4269_v23 = vpop.f32.mrb[127].mxu1 }
 0x426   : > { %v3696_v3 = vadd.f32 %v4267_v44, %v7439_v56  ;;  %v4270_v9 = vadd.f32 %v4269_v23, %v4268_v24 }
 0x428   : > { %v3699_v18 = vadd.f32 %v4270_v9, %v7441_v6  ;;  %3732 = vst [vmem:[%s7447_s10 + $0x70] sm:$0xff] %v3696_v3 }
 0x42a   : > { %3733 = vst [vmem:[%s7447_s10 + $0x78] sm:$0xff] %v3699_v18 }
 0x42b PF: > { %s18_s29 = sadd.s32 1, %s4875_s29   ;;  %s8026_s27 = smov %s4871_s28 }
 0x42c   : > { %p15_p6 = scmp.ge.s32.totalorder %s18_s29, 4   ;;  %s8027_s28 = smov %s8029_s30 }
 0x42e   :  { %17 = sbr.rel (!%p15_p6) target bundleno = 2 (0x2), region = 92 }

</bundles_post_ra>
